<compile_context>
chip_gen: v7x
topology: tpu7x:2x2x1
jax: 0.10.0
libtpu: 0.0.40
codegen_flags: <defaults>
</compile_context>

<pallas_src>
import math

import jax
import jax.numpy as jnp
from jax.experimental import pallas as pl
from jax.experimental.pallas import tpu as pltpu

# ---- configuration (stands in for `utils.*`) --------------------------------
B = 2            # batch
N = 8            # num_obj
L = 8            # max_len
V_SIZE = 32      # utils.output_features
T_SIZE = 32      # utils.text_features
HID = 32         # utils.hidden_features
NUM_INTER_HEAD = 4
NUM_INTRA_HEAD = 4
NUM_BLOCK = 1
# drop = 0.0 -> nn.Dropout is identity; exp_id != 2 -> RelationModule branch unused.

assert NUM_INTER_HEAD == NUM_INTRA_HEAD
H = NUM_INTER_HEAD
DH = HID // H                      # 8 = head dim
HB = H * B
NEG_BIG = 1.0e30                   # finite "-inf" for masked keys (no NaN)

# ---- single packed weight slab: [WS_ROWS, 96] --------------------------------
# Each linear occupies an 8-aligned row block: fan_in weight rows + 1 bias row + pad.
BLK32 = 40                         # 32 + 1 + 7 pad
BLK64 = 72                         # 64 + 1 + 7 pad
OFF_INTER_V_KQV = 0 * BLK32        # width 96 (K|Q|V columns, Q pre-scaled)
OFF_INTER_T_KQV = 1 * BLK32
OFF_INTRA_V_KQV = 2 * BLK32
OFF_INTRA_T_KQV = 3 * BLK32
OFF_VLIN = 4 * BLK32               # width 32 from here on
OFF_TLIN = 5 * BLK32
OFF_GATE_V4T = 6 * BLK32
OFF_GATE_T4V = 7 * BLK32
OFF_INTRA_VO = 8 * BLK32
OFF_INTRA_TO = 9 * BLK32
OFF_LIN1 = 10 * BLK32
OFF_INTER_VO = 11 * BLK32          # 64-in (cat(v, v_update))
OFF_INTER_TO = 11 * BLK32 + BLK64
WS_ROWS = 11 * BLK32 + 2 * BLK64   # 584
WS_COLS = 3 * HID                  # 96


def single_block_kernel(v_ref, t_ref, vmask_ref, tmask_ref, ws_ref, out_ref):
    f32 = jnp.float32

    v_in = v_ref[...].astype(f32).reshape(B * N, V_SIZE)
    t_in = t_ref[...].astype(f32).reshape(B * L, T_SIZE)
    vm = vmask_ref[...].astype(f32)                          # [B, N]
    tm = tmask_ref[...].astype(f32)                          # [B, L]

    vm_row = vm[:, None, :]                                  # [B, 1, N]
    tm_row = tm[:, None, :]                                  # [B, 1, L]
    # additive key biases, already tiled over heads for the head-batched attention
    vkb_hb = jnp.concatenate([(vm_row - 1.0) * NEG_BIG] * H, axis=0)   # [HB, 1, N]
    tkb_hb = jnp.concatenate([(tm_row - 1.0) * NEG_BIG] * H, axis=0)   # [HB, 1, L]
    # masked-mean normalizers (clamped so a fully-masked row cannot produce inf/NaN)
    inv_v = pl.reciprocal(jnp.maximum(jnp.sum(vm, axis=-1, keepdims=True), 1.0),
                          approx=True)                       # [B, 1]
    inv_t = pl.reciprocal(jnp.maximum(jnp.sum(tm, axis=-1, keepdims=True), 1.0),
                          approx=True)

    # per-(head,batch) 0/1 lane mask selecting head h's DH lanes out of HID
    # (batch ordering matches the leading-dim replication below: index = h*B + b)
    fidx_b = jax.lax.broadcasted_iota(jnp.int32, (B, 1, HID), 2)
    hmask = jnp.concatenate(
        [((fidx_b >= h * DH) & (fidx_b < (h + 1) * DH)).astype(f32) for h in range(H)],
        axis=0)                                              # [HB, 1, HID]

    def relu(x):
        return jnp.maximum(x, 0.0)

    def mm(x, off, fan_in, width):                  # x @ W + b (slab sub-block)
        w = ws_ref[off:off + fan_in, 0:width]
        b = ws_ref[off + fan_in:off + fan_in + 1, 0:width]
        return jnp.dot(x, w, preferred_element_type=f32) + b

    def mm_cat2(xa, xb, off):                       # cat(xa, xb) @ W[64,32] + b
        w_a = ws_ref[off:off + HID, 0:HID]
        w_b = ws_ref[off + HID:off + 2 * HID, 0:HID]
        b = ws_ref[off + 2 * HID:off + 2 * HID + 1, 0:HID]
        return (jnp.dot(xa, w_a, preferred_element_type=f32)
                + jnp.dot(xb, w_b, preferred_element_type=f32) + b)

    def softmax_last(s):
        m = jnp.max(s, axis=-1, keepdims=True)
        e = jnp.exp(s - m)
        return e * pl.reciprocal(jnp.sum(e, axis=-1, keepdims=True), approx=True)

    def heads_attend(q_full, k_full, v_full, kb_hb):
        # q_full [B,Sq,HID], k_full/v_full [B,Sk,HID], kb_hb [HB,1,Sk] -> [B*Sq, HID]
        sq = q_full.shape[1]
        q_rep = jnp.concatenate([q_full] * H, axis=0) * hmask     # zero other heads' lanes
        k_rep = jnp.concatenate([k_full] * H, axis=0)
        v_rep = jnp.concatenate([v_full] * H, axis=0)
        s = jnp.einsum('bqf,bkf->bqk', q_rep, k_rep,
                       preferred_element_type=f32) + kb_hb        # [HB, Sq, Sk]
        ctx = jnp.einsum('bqk,bkf->bqf', softmax_last(s), v_rep,
                         preferred_element_type=f32) * hmask      # keep own head's lanes
        o3 = ctx[0:B]
        for h in range(1, H):                                     # head merge = lane-disjoint sum
            o3 = o3 + ctx[h * B:(h + 1) * B]
        return o3.reshape(B * sq, HID)

    def kqv_split(x2, off, rows, gate=None):
        # fused [rows,32]@[32,96] projection; k/q/v are 32-aligned lane slices.
        kqv = mm(relu(x2), off, HID, 3 * HID).reshape(B, rows, 3 * HID)
        k = kqv[:, :, 0:HID]
        q = kqv[:, :, HID:2 * HID]        # Q weights/bias pre-scaled by 1/sqrt(DH)
        vv = kqv[:, :, 2 * HID:3 * HID]
        if gate is not None:              # gate lanes are head-aligned with q/k lanes
            g = gate[:, None, :]
            k = k * g
            q = q * g
        return k, q, vv

    def masked_mean(x2, rows, m_row, inv):
        x3 = x2.reshape(B, rows, HID)
        tot = jnp.einsum('bqs,bsf->bqf', m_row, x3, preferred_element_type=f32)
        return jnp.sum(tot, axis=1) * inv                         # [B, HID]

    # ---- InterModalityUpdate (row-masking skipped: output-equivalent, see header) --
    def inter_block(v2, t2):
        v_k, v_q, v_v = kqv_split(v2, OFF_INTER_V_KQV, N)
        t_k, t_q, t_v = kqv_split(t2, OFF_INTER_T_KQV, L)
        v_upd = heads_attend(v_q, t_k, t_v, tkb_hb)               # v attends to t
        t_upd = heads_attend(t_q, v_k, v_v, vkb_hb)               # t attends to v
        new_v = mm_cat2(v2, v_upd, OFF_INTER_VO)                  # v_output(cat(v, upd))
        new_t = mm_cat2(t2, t_upd, OFF_INTER_TO)
        return new_v, new_t

    # ---- DyIntraModalityUpdate ------------------------------------------------
    def intra_block(v2, t2):
        v_mean = masked_mean(v2, N, vm_row, inv_v)
        t_mean = masked_mean(t2, L, tm_row, inv_t)
        g_t = 1.0 + jax.nn.sigmoid(mm(relu(v_mean), OFF_GATE_V4T, HID, HID))  # gates text q/k
        g_v = 1.0 + jax.nn.sigmoid(mm(relu(t_mean), OFF_GATE_T4V, HID, HID))  # gates visual q/k
        v_k, v_q, v_v = kqv_split(v2, OFF_INTRA_V_KQV, N, gate=g_v)
        t_k, t_q, t_v = kqv_split(t2, OFF_INTRA_T_KQV, L, gate=g_t)
        v_upd = heads_attend(v_q, v_k, v_v, vkb_hb)               # v self-attention
        t_upd = heads_attend(t_q, t_k, t_v, tkb_hb)               # t self-attention
        new_v = mm(v2 + v_upd, OFF_INTRA_VO, HID, HID)
        new_t = mm(t2 + t_upd, OFF_INTRA_TO, HID, HID)
        return new_v, new_t

    # ---- SingleBlock.forward ----------------------------------------------------
    v2 = mm(v_in, OFF_VLIN, V_SIZE, HID)                          # [B*N, HID]
    t2 = mm(t_in, OFF_TLIN, T_SIZE, HID)                          # [B*L, HID]
    for _ in range(NUM_BLOCK):
        v2, t2 = inter_block(v2, t2)
        v2, t2 = intra_block(v2, t2)
    v_mean = masked_mean(v2, N, vm_row, inv_v)
    t_mean = masked_mean(t2, L, tm_row, inv_t)
    out = mm(v_mean * t_mean, OFF_LIN1, HID, HID)
    out_ref[...] = out.astype(out_ref.dtype)


# ---- parameter init (deterministic, PyTorch-Linear-style uniform) -----------
def _init_linear(key, fan_in, fan_out):
    k1, k2 = jax.random.split(key)
    bound = 1.0 / math.sqrt(fan_in)
    w = jax.random.uniform(k1, (fan_in, fan_out), jnp.float32, -bound, bound)
    b = jax.random.uniform(k2, (1, fan_out), jnp.float32, -bound, bound)
    return w, b


def make_params(key):
    ks = jax.random.split(key, 13)
    p = []
    p += _init_linear(ks[0], V_SIZE, HID)            # SingleBlock.v_lin
    p += _init_linear(ks[1], T_SIZE, HID)            # SingleBlock.t_lin
    p += _init_linear(ks[2], HID, 3 * HID)           # inter.v_lin
    p += _init_linear(ks[3], HID, 3 * HID)           # inter.t_lin
    p += _init_linear(ks[4], 2 * HID, HID)           # inter.v_output
    p += _init_linear(ks[5], 2 * HID, HID)           # inter.t_output
    p += _init_linear(ks[6], HID, HID)               # intra.v4t_gate_lin
    p += _init_linear(ks[7], HID, HID)               # intra.t4v_gate_lin
    p += _init_linear(ks[8], HID, 3 * HID)           # intra.v_lin
    p += _init_linear(ks[9], HID, 3 * HID)           # intra.t_lin
    p += _init_linear(ks[10], HID, HID)              # intra.v_output
    p += _init_linear(ks[11], HID, HID)              # intra.t_output
    p += _init_linear(ks[12], HID, HID)              # lin1
    return tuple(p)


def pack_params(params):
    """One-time host-side packing of all 26 tensors into a single [584, 96] slab."""
    (vlin_w, vlin_b, tlin_w, tlin_b,
     iv_w, iv_b, it_w, it_b, ivo_w, ivo_b, ito_w, ito_b,
     gv4t_w, gv4t_b, gt4v_w, gt4v_b,
     dv_w, dv_b, dt_w, dt_b, dvo_w, dvo_b, dto_w, dto_b,
     lin1_w, lin1_b) = params
    scale = 1.0 / math.sqrt(DH)
    # fold 1/sqrt(DH) into the Q columns (and Q bias) of every fused k|q|v linear
    qscale = jnp.concatenate([jnp.ones((1, HID), jnp.float32),
                              jnp.full((1, HID), scale, jnp.float32),
                              jnp.ones((1, HID), jnp.float32)], axis=1)     # [1, 96]

    ws = jnp.zeros((WS_ROWS, WS_COLS), jnp.float32)

    def put(ws, off, w, b, width):
        fan_in = w.shape[0]
        ws = ws.at[off:off + fan_in, 0:width].set(w)
        ws = ws.at[off + fan_in:off + fan_in + 1, 0:width].set(b)
        return ws

    ws = put(ws, OFF_INTER_V_KQV, iv_w * qscale, iv_b * qscale, 3 * HID)
    ws = put(ws, OFF_INTER_T_KQV, it_w * qscale, it_b * qscale, 3 * HID)
    ws = put(ws, OFF_INTRA_V_KQV, dv_w * qscale, dv_b * qscale, 3 * HID)
    ws = put(ws, OFF_INTRA_T_KQV, dt_w * qscale, dt_b * qscale, 3 * HID)
    ws = put(ws, OFF_VLIN, vlin_w, vlin_b, HID)
    ws = put(ws, OFF_TLIN, tlin_w, tlin_b, HID)
    ws = put(ws, OFF_GATE_V4T, gv4t_w, gv4t_b, HID)
    ws = put(ws, OFF_GATE_T4V, gt4v_w, gt4v_b, HID)
    ws = put(ws, OFF_INTRA_VO, dvo_w, dvo_b, HID)
    ws = put(ws, OFF_INTRA_TO, dto_w, dto_b, HID)
    ws = put(ws, OFF_LIN1, lin1_w, lin1_b, HID)
    ws = put(ws, OFF_INTER_VO, ivo_w, ivo_b, HID)    # [64,32]: rows 0:32 -> v, 32:64 -> update
    ws = put(ws, OFF_INTER_TO, ito_w, ito_b, HID)
    return ws


def single_block_forward(v, t, v_mask, t_mask, ws):
    # Raw inputs + one weight slab: 5 operand DMAs, no host-side packing ops.
    # TODO(synk): if called repeatedly, keep `ws` resident in VMEM across calls
    # (cross-call sem+VMEM future / input_output_aliases) to drop the weight DMA.
    args = (v, t, v_mask, t_mask, ws)
    return pl.pallas_call(
        single_block_kernel,
        out_shape=jax.ShapeDtypeStruct((v.shape[0], HID), jnp.float32),
        in_specs=[pl.BlockSpec(memory_space=pltpu.MemorySpace.VMEM)] * len(args),
        out_specs=pl.BlockSpec(memory_space=pltpu.MemorySpace.VMEM),
    )(*args)


if __name__ == "__main__":
    key = jax.random.PRNGKey(0)
    kv, kt, kp = jax.random.split(key, 3)

    v = jax.random.normal(kv, (B, N, V_SIZE), dtype=jnp.float32)
    t = jax.random.normal(kt, (B, L, T_SIZE), dtype=jnp.float32)
    v_mask = jnp.array([[1, 1, 1, 1, 1, 1, 0, 0],
                        [1, 1, 1, 1, 1, 1, 1, 1]], dtype=jnp.float32)
    t_mask = jnp.array([[1, 1, 1, 1, 1, 0, 0, 0],
                        [1, 1, 1, 1, 1, 1, 1, 0]], dtype=jnp.float32)

    ws = pack_params(make_params(kp))

    fwd = jax.jit(single_block_forward)
    out = jax.block_until_ready(fwd(v, t, v_mask, t_mask, ws))

    assert out.shape == (B, HID)
    assert bool(jnp.all(jnp.isfinite(out)))
    print("KERNEL_OK")
</pallas_src>

<mosaic_0001>
module attributes {stable_mosaic.version = 11 : i64} {
  func.func @single_block_kernel(%arg0: memref<2x8x32xf32, #tpu.memory_space<vmem>>, %arg1: memref<2x8x32xf32, #tpu.memory_space<vmem>>, %arg2: memref<2x8xf32, #tpu.memory_space<vmem>>, %arg3: memref<2x8xf32, #tpu.memory_space<vmem>>, %arg4: memref<584x96xf32, #tpu.memory_space<vmem>>, %arg5: memref<2x32xf32, #tpu.memory_space<vmem>>) attributes {dimension_semantics = [], scalar_prefetch = 0 : i64, scratch_operands = 0 : i64, tpu.core_type = #tpu.core_type<tc>} {
    %c0 = arith.constant 0 : index
    %c0_0 = arith.constant 0 : index
    %c0_1 = arith.constant 0 : index
    %0 = vector.load %arg0[%c0, %c0_0, %c0_1] : memref<2x8x32xf32, #tpu.memory_space<vmem>>, vector<2x8x32xf32>
    %1 = vector.shape_cast %0 : vector<2x8x32xf32> to vector<16x32xf32>
    %c0_2 = arith.constant 0 : index
    %c0_3 = arith.constant 0 : index
    %c0_4 = arith.constant 0 : index
    %2 = vector.load %arg1[%c0_2, %c0_3, %c0_4] : memref<2x8x32xf32, #tpu.memory_space<vmem>>, vector<2x8x32xf32>
    %3 = vector.shape_cast %2 : vector<2x8x32xf32> to vector<16x32xf32>
    %c0_5 = arith.constant 0 : index
    %c0_6 = arith.constant 0 : index
    %4 = vector.load %arg2[%c0_5, %c0_6] : memref<2x8xf32, #tpu.memory_space<vmem>>, vector<2x8xf32>
    %c0_7 = arith.constant 0 : index
    %c0_8 = arith.constant 0 : index
    %5 = vector.load %arg3[%c0_7, %c0_8] : memref<2x8xf32, #tpu.memory_space<vmem>>, vector<2x8xf32>
    %6 = vector.shape_cast %4 : vector<2x8xf32> to vector<2x1x8xf32>
    %7 = vector.shape_cast %5 : vector<2x8xf32> to vector<2x1x8xf32>
    %cst = arith.constant 1.000000e+00 : f32
    %8 = vector.broadcast %cst : f32 to vector<2x1x8xf32>
    %9 = arith.subf %6, %8 : vector<2x1x8xf32>
    %cst_9 = arith.constant 1.000000e+30 : f32
    %10 = vector.broadcast %cst_9 : f32 to vector<2x1x8xf32>
    %11 = arith.mulf %9, %10 : vector<2x1x8xf32>
    %12 = tpu.concatenate %11, %11, %11, %11 in 0 : vector<2x1x8xf32>, vector<2x1x8xf32>, vector<2x1x8xf32>, vector<2x1x8xf32> -> vector<8x1x8xf32>
    %cst_10 = arith.constant 1.000000e+00 : f32
    %13 = vector.broadcast %cst_10 : f32 to vector<2x1x8xf32>
    %14 = arith.subf %7, %13 : vector<2x1x8xf32>
    %cst_11 = arith.constant 1.000000e+30 : f32
    %15 = vector.broadcast %cst_11 : f32 to vector<2x1x8xf32>
    %16 = arith.mulf %14, %15 : vector<2x1x8xf32>
    %17 = tpu.concatenate %16, %16, %16, %16 in 0 : vector<2x1x8xf32>, vector<2x1x8xf32>, vector<2x1x8xf32>, vector<2x1x8xf32> -> vector<8x1x8xf32>
    %cst_12 = arith.constant dense<0.000000e+00> : vector<2xf32>
    %18 = vector.multi_reduction <add>, %4, %cst_12 [1] : vector<2x8xf32> to vector<2xf32>
    %19 = vector.shape_cast %18 : vector<2xf32> to vector<2x1xf32>
    %cst_13 = arith.constant 1.000000e+00 : f32
    %20 = vector.broadcast %cst_13 : f32 to vector<2x1xf32>
    %21 = arith.maximumf %19, %20 : vector<2x1xf32>
    %22 = tpu.reciprocal %21 {approx = true} : vector<2x1xf32> -> vector<2x1xf32>
    %cst_14 = arith.constant dense<0.000000e+00> : vector<2xf32>
    %23 = vector.multi_reduction <add>, %5, %cst_14 [1] : vector<2x8xf32> to vector<2xf32>
    %24 = vector.shape_cast %23 : vector<2xf32> to vector<2x1xf32>
    %cst_15 = arith.constant 1.000000e+00 : f32
    %25 = vector.broadcast %cst_15 : f32 to vector<2x1xf32>
    %26 = arith.maximumf %24, %25 : vector<2x1xf32>
    %27 = tpu.reciprocal %26 {approx = true} : vector<2x1xf32> -> vector<2x1xf32>
    %28 = tpu.iota {dimensions = array<i32: 2>} : vector<2x1x32xi32>
    %c0_i32 = arith.constant 0 : i32
    %29 = vector.broadcast %c0_i32 : i32 to vector<2x1x32xi32>
    %30 = arith.cmpi sge, %28, %29 : vector<2x1x32xi32>
    %c8_i32 = arith.constant 8 : i32
    %31 = vector.broadcast %c8_i32 : i32 to vector<2x1x32xi32>
    %32 = arith.cmpi slt, %28, %31 : vector<2x1x32xi32>
    %33 = arith.andi %30, %32 : vector<2x1x32xi1>
    %34 = arith.extui %33 : vector<2x1x32xi1> to vector<2x1x32xi32>
    %35 = arith.sitofp %34 : vector<2x1x32xi32> to vector<2x1x32xf32>
    %c8_i32_16 = arith.constant 8 : i32
    %36 = vector.broadcast %c8_i32_16 : i32 to vector<2x1x32xi32>
    %37 = arith.cmpi sge, %28, %36 : vector<2x1x32xi32>
    %c16_i32 = arith.constant 16 : i32
    %38 = vector.broadcast %c16_i32 : i32 to vector<2x1x32xi32>
    %39 = arith.cmpi slt, %28, %38 : vector<2x1x32xi32>
    %40 = arith.andi %37, %39 : vector<2x1x32xi1>
    %41 = arith.extui %40 : vector<2x1x32xi1> to vector<2x1x32xi32>
    %42 = arith.sitofp %41 : vector<2x1x32xi32> to vector<2x1x32xf32>
    %c16_i32_17 = arith.constant 16 : i32
    %43 = vector.broadcast %c16_i32_17 : i32 to vector<2x1x32xi32>
    %44 = arith.cmpi sge, %28, %43 : vector<2x1x32xi32>
    %c24_i32 = arith.constant 24 : i32
    %45 = vector.broadcast %c24_i32 : i32 to vector<2x1x32xi32>
    %46 = arith.cmpi slt, %28, %45 : vector<2x1x32xi32>
    %47 = arith.andi %44, %46 : vector<2x1x32xi1>
    %48 = arith.extui %47 : vector<2x1x32xi1> to vector<2x1x32xi32>
    %49 = arith.sitofp %48 : vector<2x1x32xi32> to vector<2x1x32xf32>
    %c24_i32_18 = arith.constant 24 : i32
    %50 = vector.broadcast %c24_i32_18 : i32 to vector<2x1x32xi32>
    %51 = arith.cmpi sge, %28, %50 : vector<2x1x32xi32>
    %c32_i32 = arith.constant 32 : i32
    %52 = vector.broadcast %c32_i32 : i32 to vector<2x1x32xi32>
    %53 = arith.cmpi slt, %28, %52 : vector<2x1x32xi32>
    %54 = arith.andi %51, %53 : vector<2x1x32xi1>
    %55 = arith.extui %54 : vector<2x1x32xi1> to vector<2x1x32xi32>
    %56 = arith.sitofp %55 : vector<2x1x32xi32> to vector<2x1x32xf32>
    %57 = tpu.concatenate %35, %42, %49, %56 in 0 : vector<2x1x32xf32>, vector<2x1x32xf32>, vector<2x1x32xf32>, vector<2x1x32xf32> -> vector<8x1x32xf32>
    %c160 = arith.constant 160 : index
    %c0_19 = arith.constant 0 : index
    %58 = vector.load %arg4[%c160, %c0_19] : memref<584x96xf32, #tpu.memory_space<vmem>>, vector<32x32xf32>
    %c192 = arith.constant 192 : index
    %c0_20 = arith.constant 0 : index
    %59 = vector.load %arg4[%c192, %c0_20] : memref<584x96xf32, #tpu.memory_space<vmem>>, vector<1x32xf32>
    %cst_21 = arith.constant dense<0.000000e+00> : vector<16x32xf32>
    %60 = tpu.matmul %1, %58, %cst_21 {dimension_numbers = #tpu.dot_dimension_numbers<[1], [0], [0], [1], [0, 0, 1, 1], [], []>} : vector<16x32xf32>, vector<32x32xf32>, vector<16x32xf32> -> vector<16x32xf32>
    %61 = vector.broadcast %59 : vector<1x32xf32> to vector<16x32xf32>
    %62 = arith.addf %60, %61 : vector<16x32xf32>
    %c200 = arith.constant 200 : index
    %c0_22 = arith.constant 0 : index
    %63 = vector.load %arg4[%c200, %c0_22] : memref<584x96xf32, #tpu.memory_space<vmem>>, vector<32x32xf32>
    %c232 = arith.constant 232 : index
    %c0_23 = arith.constant 0 : index
    %64 = vector.load %arg4[%c232, %c0_23] : memref<584x96xf32, #tpu.memory_space<vmem>>, vector<1x32xf32>
    %cst_24 = arith.constant dense<0.000000e+00> : vector<16x32xf32>
    %65 = tpu.matmul %3, %63, %cst_24 {dimension_numbers = #tpu.dot_dimension_numbers<[1], [0], [0], [1], [0, 0, 1, 1], [], []>} : vector<16x32xf32>, vector<32x32xf32>, vector<16x32xf32> -> vector<16x32xf32>
    %66 = vector.broadcast %64 : vector<1x32xf32> to vector<16x32xf32>
    %67 = arith.addf %65, %66 : vector<16x32xf32>
    %cst_25 = arith.constant 0.000000e+00 : f32
    %68 = vector.broadcast %cst_25 : f32 to vector<16x32xf32>
    %69 = arith.maximumf %62, %68 : vector<16x32xf32>
    %c0_26 = arith.constant 0 : index
    %c0_27 = arith.constant 0 : index
    %70 = vector.load %arg4[%c0_26, %c0_27] : memref<584x96xf32, #tpu.memory_space<vmem>>, vector<32x96xf32>
    %c32 = arith.constant 32 : index
    %c0_28 = arith.constant 0 : index
    %71 = vector.load %arg4[%c32, %c0_28] : memref<584x96xf32, #tpu.memory_space<vmem>>, vector<1x96xf32>
    %cst_29 = arith.constant dense<0.000000e+00> : vector<16x96xf32>
    %72 = tpu.matmul %69, %70, %cst_29 {dimension_numbers = #tpu.dot_dimension_numbers<[1], [0], [0], [1], [0, 0, 1, 1], [], []>} : vector<16x32xf32>, vector<32x96xf32>, vector<16x96xf32> -> vector<16x96xf32>
    %73 = vector.broadcast %71 : vector<1x96xf32> to vector<16x96xf32>
    %74 = arith.addf %72, %73 : vector<16x96xf32>
    %75 = vector.shape_cast %74 : vector<16x96xf32> to vector<2x8x96xf32>
    %76 = vector.extract_strided_slice %75 {offsets = [0, 0, 0], sizes = [2, 8, 32], strides = [1, 1, 1]} : vector<2x8x96xf32> to vector<2x8x32xf32>
    %77 = vector.extract_strided_slice %75 {offsets = [0, 0, 32], sizes = [2, 8, 32], strides = [1, 1, 1]} : vector<2x8x96xf32> to vector<2x8x32xf32>
    %78 = vector.extract_strided_slice %75 {offsets = [0, 0, 64], sizes = [2, 8, 32], strides = [1, 1, 1]} : vector<2x8x96xf32> to vector<2x8x32xf32>
    %cst_30 = arith.constant 0.000000e+00 : f32
    %79 = vector.broadcast %cst_30 : f32 to vector<16x32xf32>
    %80 = arith.maximumf %67, %79 : vector<16x32xf32>
    %c40 = arith.constant 40 : index
    %c0_31 = arith.constant 0 : index
    %81 = vector.load %arg4[%c40, %c0_31] : memref<584x96xf32, #tpu.memory_space<vmem>>, vector<32x96xf32>
    %c72 = arith.constant 72 : index
    %c0_32 = arith.constant 0 : index
    %82 = vector.load %arg4[%c72, %c0_32] : memref<584x96xf32, #tpu.memory_space<vmem>>, vector<1x96xf32>
    %cst_33 = arith.constant dense<0.000000e+00> : vector<16x96xf32>
    %83 = tpu.matmul %80, %81, %cst_33 {dimension_numbers = #tpu.dot_dimension_numbers<[1], [0], [0], [1], [0, 0, 1, 1], [], []>} : vector<16x32xf32>, vector<32x96xf32>, vector<16x96xf32> -> vector<16x96xf32>
    %84 = vector.broadcast %82 : vector<1x96xf32> to vector<16x96xf32>
    %85 = arith.addf %83, %84 : vector<16x96xf32>
    %86 = vector.shape_cast %85 : vector<16x96xf32> to vector<2x8x96xf32>
    %87 = vector.extract_strided_slice %86 {offsets = [0, 0, 0], sizes = [2, 8, 32], strides = [1, 1, 1]} : vector<2x8x96xf32> to vector<2x8x32xf32>
    %88 = vector.extract_strided_slice %86 {offsets = [0, 0, 32], sizes = [2, 8, 32], strides = [1, 1, 1]} : vector<2x8x96xf32> to vector<2x8x32xf32>
    %89 = vector.extract_strided_slice %86 {offsets = [0, 0, 64], sizes = [2, 8, 32], strides = [1, 1, 1]} : vector<2x8x96xf32> to vector<2x8x32xf32>
    %90 = tpu.concatenate %77, %77, %77, %77 in 0 : vector<2x8x32xf32>, vector<2x8x32xf32>, vector<2x8x32xf32>, vector<2x8x32xf32> -> vector<8x8x32xf32>
    %91 = vector.broadcast %57 : vector<8x1x32xf32> to vector<8x8x32xf32>
    %92 = arith.mulf %90, %91 : vector<8x8x32xf32>
    %93 = tpu.concatenate %87, %87, %87, %87 in 0 : vector<2x8x32xf32>, vector<2x8x32xf32>, vector<2x8x32xf32>, vector<2x8x32xf32> -> vector<8x8x32xf32>
    %94 = tpu.concatenate %89, %89, %89, %89 in 0 : vector<2x8x32xf32>, vector<2x8x32xf32>, vector<2x8x32xf32>, vector<2x8x32xf32> -> vector<8x8x32xf32>
    "tpu.trace_start"() <{level = 10 : i32, message = "bqf,bkf->bqk"}> : () -> ()
    %cst_34 = arith.constant dense<0.000000e+00> : vector<8x8x8xf32>
    %95 = tpu.matmul %92, %93, %cst_34 {dimension_numbers = #tpu.dot_dimension_numbers<[2], [2], [1], [1], [0, 0, 0, 1, 1, 1], [0], [0]>} : vector<8x8x32xf32>, vector<8x8x32xf32>, vector<8x8x8xf32> -> vector<8x8x8xf32>
    "tpu.trace_stop"() : () -> ()
    %96 = vector.broadcast %17 : vector<8x1x8xf32> to vector<8x8x8xf32>
    %97 = arith.addf %95, %96 : vector<8x8x8xf32>
    %cst_35 = arith.constant dense<0xFF800000> : vector<8x8xf32>
    %98 = vector.multi_reduction <maximumf>, %97, %cst_35 [2] : vector<8x8x8xf32> to vector<8x8xf32>
    %99 = vector.shape_cast %98 : vector<8x8xf32> to vector<8x8x1xf32>
    %100 = vector.broadcast %99 : vector<8x8x1xf32> to vector<8x8x8xf32>
    %101 = arith.subf %97, %100 : vector<8x8x8xf32>
    %102 = math.exp %101 : vector<8x8x8xf32>
    %cst_36 = arith.constant dense<0.000000e+00> : vector<8x8xf32>
    %103 = vector.multi_reduction <add>, %102, %cst_36 [2] : vector<8x8x8xf32> to vector<8x8xf32>
    %104 = vector.shape_cast %103 : vector<8x8xf32> to vector<8x8x1xf32>
    %105 = tpu.reciprocal %104 {approx = true} : vector<8x8x1xf32> -> vector<8x8x1xf32>
    %106 = vector.broadcast %105 : vector<8x8x1xf32> to vector<8x8x8xf32>
    %107 = arith.mulf %102, %106 : vector<8x8x8xf32>
    "tpu.trace_start"() <{level = 10 : i32, message = "bqk,bkf->bqf"}> : () -> ()
    %cst_37 = arith.constant dense<0.000000e+00> : vector<8x8x32xf32>
    %108 = tpu.matmul %107, %94, %cst_37 {dimension_numbers = #tpu.dot_dimension_numbers<[2], [1], [1], [2], [0, 0, 0, 1, 1, 2], [0], [0]>} : vector<8x8x8xf32>, vector<8x8x32xf32>, vector<8x8x32xf32> -> vector<8x8x32xf32>
    "tpu.trace_stop"() : () -> ()
    %109 = vector.broadcast %57 : vector<8x1x32xf32> to vector<8x8x32xf32>
    %110 = arith.mulf %108, %109 : vector<8x8x32xf32>
    %111 = vector.extract_strided_slice %110 {offsets = [0, 0, 0], sizes = [2, 8, 32], strides = [1, 1, 1]} : vector<8x8x32xf32> to vector<2x8x32xf32>
    %112 = vector.extract_strided_slice %110 {offsets = [2, 0, 0], sizes = [2, 8, 32], strides = [1, 1, 1]} : vector<8x8x32xf32> to vector<2x8x32xf32>
    %113 = arith.addf %111, %112 : vector<2x8x32xf32>
    %114 = vector.extract_strided_slice %110 {offsets = [4, 0, 0], sizes = [2, 8, 32], strides = [1, 1, 1]} : vector<8x8x32xf32> to vector<2x8x32xf32>
    %115 = arith.addf %113, %114 : vector<2x8x32xf32>
    %116 = vector.extract_strided_slice %110 {offsets = [6, 0, 0], sizes = [2, 8, 32], strides = [1, 1, 1]} : vector<8x8x32xf32> to vector<2x8x32xf32>
    %117 = arith.addf %115, %116 : vector<2x8x32xf32>
    %118 = vector.shape_cast %117 : vector<2x8x32xf32> to vector<16x32xf32>
    %119 = tpu.concatenate %88, %88, %88, %88 in 0 : vector<2x8x32xf32>, vector<2x8x32xf32>, vector<2x8x32xf32>, vector<2x8x32xf32> -> vector<8x8x32xf32>
    %120 = vector.broadcast %57 : vector<8x1x32xf32> to vector<8x8x32xf32>
    %121 = arith.mulf %119, %120 : vector<8x8x32xf32>
    %122 = tpu.concatenate %76, %76, %76, %76 in 0 : vector<2x8x32xf32>, vector<2x8x32xf32>, vector<2x8x32xf32>, vector<2x8x32xf32> -> vector<8x8x32xf32>
    %123 = tpu.concatenate %78, %78, %78, %78 in 0 : vector<2x8x32xf32>, vector<2x8x32xf32>, vector<2x8x32xf32>, vector<2x8x32xf32> -> vector<8x8x32xf32>
    "tpu.trace_start"() <{level = 10 : i32, message = "bqf,bkf->bqk"}> : () -> ()
    %cst_38 = arith.constant dense<0.000000e+00> : vector<8x8x8xf32>
    %124 = tpu.matmul %121, %122, %cst_38 {dimension_numbers = #tpu.dot_dimension_numbers<[2], [2], [1], [1], [0, 0, 0, 1, 1, 1], [0], [0]>} : vector<8x8x32xf32>, vector<8x8x32xf32>, vector<8x8x8xf32> -> vector<8x8x8xf32>
    "tpu.trace_stop"() : () -> ()
    %125 = vector.broadcast %12 : vector<8x1x8xf32> to vector<8x8x8xf32>
    %126 = arith.addf %124, %125 : vector<8x8x8xf32>
    %cst_39 = arith.constant dense<0xFF800000> : vector<8x8xf32>
    %127 = vector.multi_reduction <maximumf>, %126, %cst_39 [2] : vector<8x8x8xf32> to vector<8x8xf32>
    %128 = vector.shape_cast %127 : vector<8x8xf32> to vector<8x8x1xf32>
    %129 = vector.broadcast %128 : vector<8x8x1xf32> to vector<8x8x8xf32>
    %130 = arith.subf %126, %129 : vector<8x8x8xf32>
    %131 = math.exp %130 : vector<8x8x8xf32>
    %cst_40 = arith.constant dense<0.000000e+00> : vector<8x8xf32>
    %132 = vector.multi_reduction <add>, %131, %cst_40 [2] : vector<8x8x8xf32> to vector<8x8xf32>
    %133 = vector.shape_cast %132 : vector<8x8xf32> to vector<8x8x1xf32>
    %134 = tpu.reciprocal %133 {approx = true} : vector<8x8x1xf32> -> vector<8x8x1xf32>
    %135 = vector.broadcast %134 : vector<8x8x1xf32> to vector<8x8x8xf32>
    %136 = arith.mulf %131, %135 : vector<8x8x8xf32>
    "tpu.trace_start"() <{level = 10 : i32, message = "bqk,bkf->bqf"}> : () -> ()
    %cst_41 = arith.constant dense<0.000000e+00> : vector<8x8x32xf32>
    %137 = tpu.matmul %136, %123, %cst_41 {dimension_numbers = #tpu.dot_dimension_numbers<[2], [1], [1], [2], [0, 0, 0, 1, 1, 2], [0], [0]>} : vector<8x8x8xf32>, vector<8x8x32xf32>, vector<8x8x32xf32> -> vector<8x8x32xf32>
    "tpu.trace_stop"() : () -> ()
    %138 = vector.broadcast %57 : vector<8x1x32xf32> to vector<8x8x32xf32>
    %139 = arith.mulf %137, %138 : vector<8x8x32xf32>
    %140 = vector.extract_strided_slice %139 {offsets = [0, 0, 0], sizes = [2, 8, 32], strides = [1, 1, 1]} : vector<8x8x32xf32> to vector<2x8x32xf32>
    %141 = vector.extract_strided_slice %139 {offsets = [2, 0, 0], sizes = [2, 8, 32], strides = [1, 1, 1]} : vector<8x8x32xf32> to vector<2x8x32xf32>
    %142 = arith.addf %140, %141 : vector<2x8x32xf32>
    %143 = vector.extract_strided_slice %139 {offsets = [4, 0, 0], sizes = [2, 8, 32], strides = [1, 1, 1]} : vector<8x8x32xf32> to vector<2x8x32xf32>
    %144 = arith.addf %142, %143 : vector<2x8x32xf32>
    %145 = vector.extract_strided_slice %139 {offsets = [6, 0, 0], sizes = [2, 8, 32], strides = [1, 1, 1]} : vector<8x8x32xf32> to vector<2x8x32xf32>
    %146 = arith.addf %144, %145 : vector<2x8x32xf32>
    %147 = vector.shape_cast %146 : vector<2x8x32xf32> to vector<16x32xf32>
    %c440 = arith.constant 440 : index
    %c0_42 = arith.constant 0 : index
    %148 = vector.load %arg4[%c440, %c0_42] : memref<584x96xf32, #tpu.memory_space<vmem>>, vector<32x32xf32>
    %c472 = arith.constant 472 : index
    %c0_43 = arith.constant 0 : index
    %149 = vector.load %arg4[%c472, %c0_43] : memref<584x96xf32, #tpu.memory_space<vmem>>, vector<32x32xf32>
    %c504 = arith.constant 504 : index
    %c0_44 = arith.constant 0 : index
    %150 = vector.load %arg4[%c504, %c0_44] : memref<584x96xf32, #tpu.memory_space<vmem>>, vector<1x32xf32>
    %cst_45 = arith.constant dense<0.000000e+00> : vector<16x32xf32>
    %151 = tpu.matmul %62, %148, %cst_45 {dimension_numbers = #tpu.dot_dimension_numbers<[1], [0], [0], [1], [0, 0, 1, 1], [], []>} : vector<16x32xf32>, vector<32x32xf32>, vector<16x32xf32> -> vector<16x32xf32>
    %cst_46 = arith.constant dense<0.000000e+00> : vector<16x32xf32>
    %152 = tpu.matmul %118, %149, %cst_46 {dimension_numbers = #tpu.dot_dimension_numbers<[1], [0], [0], [1], [0, 0, 1, 1], [], []>} : vector<16x32xf32>, vector<32x32xf32>, vector<16x32xf32> -> vector<16x32xf32>
    %153 = arith.addf %151, %152 : vector<16x32xf32>
    %154 = vector.broadcast %150 : vector<1x32xf32> to vector<16x32xf32>
    %155 = arith.addf %153, %154 : vector<16x32xf32>
    %c512 = arith.constant 512 : index
    %c0_47 = arith.constant 0 : index
    %156 = vector.load %arg4[%c512, %c0_47] : memref<584x96xf32, #tpu.memory_space<vmem>>, vector<32x32xf32>
    %c544 = arith.constant 544 : index
    %c0_48 = arith.constant 0 : index
    %157 = vector.load %arg4[%c544, %c0_48] : memref<584x96xf32, #tpu.memory_space<vmem>>, vector<32x32xf32>
    %c576 = arith.constant 576 : index
    %c0_49 = arith.constant 0 : index
    %158 = vector.load %arg4[%c576, %c0_49] : memref<584x96xf32, #tpu.memory_space<vmem>>, vector<1x32xf32>
    %cst_50 = arith.constant dense<0.000000e+00> : vector<16x32xf32>
    %159 = tpu.matmul %67, %156, %cst_50 {dimension_numbers = #tpu.dot_dimension_numbers<[1], [0], [0], [1], [0, 0, 1, 1], [], []>} : vector<16x32xf32>, vector<32x32xf32>, vector<16x32xf32> -> vector<16x32xf32>
    %cst_51 = arith.constant dense<0.000000e+00> : vector<16x32xf32>
    %160 = tpu.matmul %147, %157, %cst_51 {dimension_numbers = #tpu.dot_dimension_numbers<[1], [0], [0], [1], [0, 0, 1, 1], [], []>} : vector<16x32xf32>, vector<32x32xf32>, vector<16x32xf32> -> vector<16x32xf32>
    %161 = arith.addf %159, %160 : vector<16x32xf32>
    %162 = vector.broadcast %158 : vector<1x32xf32> to vector<16x32xf32>
    %163 = arith.addf %161, %162 : vector<16x32xf32>
    %164 = vector.shape_cast %155 : vector<16x32xf32> to vector<2x8x32xf32>
    "tpu.trace_start"() <{level = 10 : i32, message = "bqs,bsf->bqf"}> : () -> ()
    %cst_52 = arith.constant dense<0.000000e+00> : vector<2x1x32xf32>
    %165 = tpu.matmul %6, %164, %cst_52 {dimension_numbers = #tpu.dot_dimension_numbers<[2], [1], [1], [2], [0, 0, 0, 1, 1, 2], [0], [0]>} : vector<2x1x8xf32>, vector<2x8x32xf32>, vector<2x1x32xf32> -> vector<2x1x32xf32>
    "tpu.trace_stop"() : () -> ()
    %cst_53 = arith.constant dense<0.000000e+00> : vector<2x32xf32>
    %166 = vector.multi_reduction <add>, %165, %cst_53 [1] : vector<2x1x32xf32> to vector<2x32xf32>
    %167 = vector.broadcast %22 : vector<2x1xf32> to vector<2x32xf32>
    %168 = arith.mulf %166, %167 : vector<2x32xf32>
    %169 = vector.shape_cast %163 : vector<16x32xf32> to vector<2x8x32xf32>
    "tpu.trace_start"() <{level = 10 : i32, message = "bqs,bsf->bqf"}> : () -> ()
    %cst_54 = arith.constant dense<0.000000e+00> : vector<2x1x32xf32>
    %170 = tpu.matmul %7, %169, %cst_54 {dimension_numbers = #tpu.dot_dimension_numbers<[2], [1], [1], [2], [0, 0, 0, 1, 1, 2], [0], [0]>} : vector<2x1x8xf32>, vector<2x8x32xf32>, vector<2x1x32xf32> -> vector<2x1x32xf32>
    "tpu.trace_stop"() : () -> ()
    %cst_55 = arith.constant dense<0.000000e+00> : vector<2x32xf32>
    %171 = vector.multi_reduction <add>, %170, %cst_55 [1] : vector<2x1x32xf32> to vector<2x32xf32>
    %172 = vector.broadcast %27 : vector<2x1xf32> to vector<2x32xf32>
    %173 = arith.mulf %171, %172 : vector<2x32xf32>
    %cst_56 = arith.constant 0.000000e+00 : f32
    %174 = vector.broadcast %cst_56 : f32 to vector<2x32xf32>
    %175 = arith.maximumf %168, %174 : vector<2x32xf32>
    %c240 = arith.constant 240 : index
    %c0_57 = arith.constant 0 : index
    %176 = vector.load %arg4[%c240, %c0_57] : memref<584x96xf32, #tpu.memory_space<vmem>>, vector<32x32xf32>
    %c272 = arith.constant 272 : index
    %c0_58 = arith.constant 0 : index
    %177 = vector.load %arg4[%c272, %c0_58] : memref<584x96xf32, #tpu.memory_space<vmem>>, vector<1x32xf32>
    %cst_59 = arith.constant dense<0.000000e+00> : vector<2x32xf32>
    %178 = tpu.matmul %175, %176, %cst_59 {dimension_numbers = #tpu.dot_dimension_numbers<[1], [0], [0], [1], [0, 0, 1, 1], [], []>} : vector<2x32xf32>, vector<32x32xf32>, vector<2x32xf32> -> vector<2x32xf32>
    %179 = vector.broadcast %177 : vector<1x32xf32> to vector<2x32xf32>
    %180 = arith.addf %178, %179 : vector<2x32xf32>
    %181 = arith.negf %180 : vector<2x32xf32>
    %182 = math.exp %181 : vector<2x32xf32>
    %cst_60 = arith.constant 1.000000e+00 : f32
    %183 = vector.broadcast %cst_60 : f32 to vector<2x32xf32>
    %184 = arith.addf %183, %182 : vector<2x32xf32>
    %185 = arith.divf %183, %184 : vector<2x32xf32>
    %cst_61 = arith.constant 1.000000e+00 : f32
    %186 = vector.broadcast %cst_61 : f32 to vector<2x32xf32>
    %187 = arith.addf %186, %185 : vector<2x32xf32>
    %cst_62 = arith.constant 0.000000e+00 : f32
    %188 = vector.broadcast %cst_62 : f32 to vector<2x32xf32>
    %189 = arith.maximumf %173, %188 : vector<2x32xf32>
    %c280 = arith.constant 280 : index
    %c0_63 = arith.constant 0 : index
    %190 = vector.load %arg4[%c280, %c0_63] : memref<584x96xf32, #tpu.memory_space<vmem>>, vector<32x32xf32>
    %c312 = arith.constant 312 : index
    %c0_64 = arith.constant 0 : index
    %191 = vector.load %arg4[%c312, %c0_64] : memref<584x96xf32, #tpu.memory_space<vmem>>, vector<1x32xf32>
    %cst_65 = arith.constant dense<0.000000e+00> : vector<2x32xf32>
    %192 = tpu.matmul %189, %190, %cst_65 {dimension_numbers = #tpu.dot_dimension_numbers<[1], [0], [0], [1], [0, 0, 1, 1], [], []>} : vector<2x32xf32>, vector<32x32xf32>, vector<2x32xf32> -> vector<2x32xf32>
    %193 = vector.broadcast %191 : vector<1x32xf32> to vector<2x32xf32>
    %194 = arith.addf %192, %193 : vector<2x32xf32>
    %195 = arith.negf %194 : vector<2x32xf32>
    %196 = math.exp %195 : vector<2x32xf32>
    %cst_66 = arith.constant 1.000000e+00 : f32
    %197 = vector.broadcast %cst_66 : f32 to vector<2x32xf32>
    %198 = arith.addf %197, %196 : vector<2x32xf32>
    %199 = arith.divf %197, %198 : vector<2x32xf32>
    %cst_67 = arith.constant 1.000000e+00 : f32
    %200 = vector.broadcast %cst_67 : f32 to vector<2x32xf32>
    %201 = arith.addf %200, %199 : vector<2x32xf32>
    %cst_68 = arith.constant 0.000000e+00 : f32
    %202 = vector.broadcast %cst_68 : f32 to vector<16x32xf32>
    %203 = arith.maximumf %155, %202 : vector<16x32xf32>
    %c80 = arith.constant 80 : index
    %c0_69 = arith.constant 0 : index
    %204 = vector.load %arg4[%c80, %c0_69] : memref<584x96xf32, #tpu.memory_space<vmem>>, vector<32x96xf32>
    %c112 = arith.constant 112 : index
    %c0_70 = arith.constant 0 : index
    %205 = vector.load %arg4[%c112, %c0_70] : memref<584x96xf32, #tpu.memory_space<vmem>>, vector<1x96xf32>
    %cst_71 = arith.constant dense<0.000000e+00> : vector<16x96xf32>
    %206 = tpu.matmul %203, %204, %cst_71 {dimension_numbers = #tpu.dot_dimension_numbers<[1], [0], [0], [1], [0, 0, 1, 1], [], []>} : vector<16x32xf32>, vector<32x96xf32>, vector<16x96xf32> -> vector<16x96xf32>
    %207 = vector.broadcast %205 : vector<1x96xf32> to vector<16x96xf32>
    %208 = arith.addf %206, %207 : vector<16x96xf32>
    %209 = vector.shape_cast %208 : vector<16x96xf32> to vector<2x8x96xf32>
    %210 = vector.extract_strided_slice %209 {offsets = [0, 0, 0], sizes = [2, 8, 32], strides = [1, 1, 1]} : vector<2x8x96xf32> to vector<2x8x32xf32>
    %211 = vector.extract_strided_slice %209 {offsets = [0, 0, 32], sizes = [2, 8, 32], strides = [1, 1, 1]} : vector<2x8x96xf32> to vector<2x8x32xf32>
    %212 = vector.extract_strided_slice %209 {offsets = [0, 0, 64], sizes = [2, 8, 32], strides = [1, 1, 1]} : vector<2x8x96xf32> to vector<2x8x32xf32>
    %213 = vector.shape_cast %201 : vector<2x32xf32> to vector<2x1x32xf32>
    %214 = vector.broadcast %213 : vector<2x1x32xf32> to vector<2x8x32xf32>
    %215 = arith.mulf %210, %214 : vector<2x8x32xf32>
    %216 = vector.broadcast %213 : vector<2x1x32xf32> to vector<2x8x32xf32>
    %217 = arith.mulf %211, %216 : vector<2x8x32xf32>
    %cst_72 = arith.constant 0.000000e+00 : f32
    %218 = vector.broadcast %cst_72 : f32 to vector<16x32xf32>
    %219 = arith.maximumf %163, %218 : vector<16x32xf32>
    %c120 = arith.constant 120 : index
    %c0_73 = arith.constant 0 : index
    %220 = vector.load %arg4[%c120, %c0_73] : memref<584x96xf32, #tpu.memory_space<vmem>>, vector<32x96xf32>
    %c152 = arith.constant 152 : index
    %c0_74 = arith.constant 0 : index
    %221 = vector.load %arg4[%c152, %c0_74] : memref<584x96xf32, #tpu.memory_space<vmem>>, vector<1x96xf32>
    %cst_75 = arith.constant dense<0.000000e+00> : vector<16x96xf32>
    %222 = tpu.matmul %219, %220, %cst_75 {dimension_numbers = #tpu.dot_dimension_numbers<[1], [0], [0], [1], [0, 0, 1, 1], [], []>} : vector<16x32xf32>, vector<32x96xf32>, vector<16x96xf32> -> vector<16x96xf32>
    %223 = vector.broadcast %221 : vector<1x96xf32> to vector<16x96xf32>
    %224 = arith.addf %222, %223 : vector<16x96xf32>
    %225 = vector.shape_cast %224 : vector<16x96xf32> to vector<2x8x96xf32>
    %226 = vector.extract_strided_slice %225 {offsets = [0, 0, 0], sizes = [2, 8, 32], strides = [1, 1, 1]} : vector<2x8x96xf32> to vector<2x8x32xf32>
    %227 = vector.extract_strided_slice %225 {offsets = [0, 0, 32], sizes = [2, 8, 32], strides = [1, 1, 1]} : vector<2x8x96xf32> to vector<2x8x32xf32>
    %228 = vector.extract_strided_slice %225 {offsets = [0, 0, 64], sizes = [2, 8, 32], strides = [1, 1, 1]} : vector<2x8x96xf32> to vector<2x8x32xf32>
    %229 = vector.shape_cast %187 : vector<2x32xf32> to vector<2x1x32xf32>
    %230 = vector.broadcast %229 : vector<2x1x32xf32> to vector<2x8x32xf32>
    %231 = arith.mulf %226, %230 : vector<2x8x32xf32>
    %232 = vector.broadcast %229 : vector<2x1x32xf32> to vector<2x8x32xf32>
    %233 = arith.mulf %227, %232 : vector<2x8x32xf32>
    %234 = tpu.concatenate %217, %217, %217, %217 in 0 : vector<2x8x32xf32>, vector<2x8x32xf32>, vector<2x8x32xf32>, vector<2x8x32xf32> -> vector<8x8x32xf32>
    %235 = vector.broadcast %57 : vector<8x1x32xf32> to vector<8x8x32xf32>
    %236 = arith.mulf %234, %235 : vector<8x8x32xf32>
    %237 = tpu.concatenate %215, %215, %215, %215 in 0 : vector<2x8x32xf32>, vector<2x8x32xf32>, vector<2x8x32xf32>, vector<2x8x32xf32> -> vector<8x8x32xf32>
    %238 = tpu.concatenate %212, %212, %212, %212 in 0 : vector<2x8x32xf32>, vector<2x8x32xf32>, vector<2x8x32xf32>, vector<2x8x32xf32> -> vector<8x8x32xf32>
    "tpu.trace_start"() <{level = 10 : i32, message = "bqf,bkf->bqk"}> : () -> ()
    %cst_76 = arith.constant dense<0.000000e+00> : vector<8x8x8xf32>
    %239 = tpu.matmul %236, %237, %cst_76 {dimension_numbers = #tpu.dot_dimension_numbers<[2], [2], [1], [1], [0, 0, 0, 1, 1, 1], [0], [0]>} : vector<8x8x32xf32>, vector<8x8x32xf32>, vector<8x8x8xf32> -> vector<8x8x8xf32>
    "tpu.trace_stop"() : () -> ()
    %240 = vector.broadcast %12 : vector<8x1x8xf32> to vector<8x8x8xf32>
    %241 = arith.addf %239, %240 : vector<8x8x8xf32>
    %cst_77 = arith.constant dense<0xFF800000> : vector<8x8xf32>
    %242 = vector.multi_reduction <maximumf>, %241, %cst_77 [2] : vector<8x8x8xf32> to vector<8x8xf32>
    %243 = vector.shape_cast %242 : vector<8x8xf32> to vector<8x8x1xf32>
    %244 = vector.broadcast %243 : vector<8x8x1xf32> to vector<8x8x8xf32>
    %245 = arith.subf %241, %244 : vector<8x8x8xf32>
    %246 = math.exp %245 : vector<8x8x8xf32>
    %cst_78 = arith.constant dense<0.000000e+00> : vector<8x8xf32>
    %247 = vector.multi_reduction <add>, %246, %cst_78 [2] : vector<8x8x8xf32> to vector<8x8xf32>
    %248 = vector.shape_cast %247 : vector<8x8xf32> to vector<8x8x1xf32>
    %249 = tpu.reciprocal %248 {approx = true} : vector<8x8x1xf32> -> vector<8x8x1xf32>
    %250 = vector.broadcast %249 : vector<8x8x1xf32> to vector<8x8x8xf32>
    %251 = arith.mulf %246, %250 : vector<8x8x8xf32>
    "tpu.trace_start"() <{level = 10 : i32, message = "bqk,bkf->bqf"}> : () -> ()
    %cst_79 = arith.constant dense<0.000000e+00> : vector<8x8x32xf32>
    %252 = tpu.matmul %251, %238, %cst_79 {dimension_numbers = #tpu.dot_dimension_numbers<[2], [1], [1], [2], [0, 0, 0, 1, 1, 2], [0], [0]>} : vector<8x8x8xf32>, vector<8x8x32xf32>, vector<8x8x32xf32> -> vector<8x8x32xf32>
    "tpu.trace_stop"() : () -> ()
    %253 = vector.broadcast %57 : vector<8x1x32xf32> to vector<8x8x32xf32>
    %254 = arith.mulf %252, %253 : vector<8x8x32xf32>
    %255 = vector.extract_strided_slice %254 {offsets = [0, 0, 0], sizes = [2, 8, 32], strides = [1, 1, 1]} : vector<8x8x32xf32> to vector<2x8x32xf32>
    %256 = vector.extract_strided_slice %254 {offsets = [2, 0, 0], sizes = [2, 8, 32], strides = [1, 1, 1]} : vector<8x8x32xf32> to vector<2x8x32xf32>
    %257 = arith.addf %255, %256 : vector<2x8x32xf32>
    %258 = vector.extract_strided_slice %254 {offsets = [4, 0, 0], sizes = [2, 8, 32], strides = [1, 1, 1]} : vector<8x8x32xf32> to vector<2x8x32xf32>
    %259 = arith.addf %257, %258 : vector<2x8x32xf32>
    %260 = vector.extract_strided_slice %254 {offsets = [6, 0, 0], sizes = [2, 8, 32], strides = [1, 1, 1]} : vector<8x8x32xf32> to vector<2x8x32xf32>
    %261 = arith.addf %259, %260 : vector<2x8x32xf32>
    %262 = vector.shape_cast %261 : vector<2x8x32xf32> to vector<16x32xf32>
    %263 = tpu.concatenate %233, %233, %233, %233 in 0 : vector<2x8x32xf32>, vector<2x8x32xf32>, vector<2x8x32xf32>, vector<2x8x32xf32> -> vector<8x8x32xf32>
    %264 = vector.broadcast %57 : vector<8x1x32xf32> to vector<8x8x32xf32>
    %265 = arith.mulf %263, %264 : vector<8x8x32xf32>
    %266 = tpu.concatenate %231, %231, %231, %231 in 0 : vector<2x8x32xf32>, vector<2x8x32xf32>, vector<2x8x32xf32>, vector<2x8x32xf32> -> vector<8x8x32xf32>
    %267 = tpu.concatenate %228, %228, %228, %228 in 0 : vector<2x8x32xf32>, vector<2x8x32xf32>, vector<2x8x32xf32>, vector<2x8x32xf32> -> vector<8x8x32xf32>
    "tpu.trace_start"() <{level = 10 : i32, message = "bqf,bkf->bqk"}> : () -> ()
    %cst_80 = arith.constant dense<0.000000e+00> : vector<8x8x8xf32>
    %268 = tpu.matmul %265, %266, %cst_80 {dimension_numbers = #tpu.dot_dimension_numbers<[2], [2], [1], [1], [0, 0, 0, 1, 1, 1], [0], [0]>} : vector<8x8x32xf32>, vector<8x8x32xf32>, vector<8x8x8xf32> -> vector<8x8x8xf32>
    "tpu.trace_stop"() : () -> ()
    %269 = vector.broadcast %17 : vector<8x1x8xf32> to vector<8x8x8xf32>
    %270 = arith.addf %268, %269 : vector<8x8x8xf32>
    %cst_81 = arith.constant dense<0xFF800000> : vector<8x8xf32>
    %271 = vector.multi_reduction <maximumf>, %270, %cst_81 [2] : vector<8x8x8xf32> to vector<8x8xf32>
    %272 = vector.shape_cast %271 : vector<8x8xf32> to vector<8x8x1xf32>
    %273 = vector.broadcast %272 : vector<8x8x1xf32> to vector<8x8x8xf32>
    %274 = arith.subf %270, %273 : vector<8x8x8xf32>
    %275 = math.exp %274 : vector<8x8x8xf32>
    %cst_82 = arith.constant dense<0.000000e+00> : vector<8x8xf32>
    %276 = vector.multi_reduction <add>, %275, %cst_82 [2] : vector<8x8x8xf32> to vector<8x8xf32>
    %277 = vector.shape_cast %276 : vector<8x8xf32> to vector<8x8x1xf32>
    %278 = tpu.reciprocal %277 {approx = true} : vector<8x8x1xf32> -> vector<8x8x1xf32>
    %279 = vector.broadcast %278 : vector<8x8x1xf32> to vector<8x8x8xf32>
    %280 = arith.mulf %275, %279 : vector<8x8x8xf32>
    "tpu.trace_start"() <{level = 10 : i32, message = "bqk,bkf->bqf"}> : () -> ()
    %cst_83 = arith.constant dense<0.000000e+00> : vector<8x8x32xf32>
    %281 = tpu.matmul %280, %267, %cst_83 {dimension_numbers = #tpu.dot_dimension_numbers<[2], [1], [1], [2], [0, 0, 0, 1, 1, 2], [0], [0]>} : vector<8x8x8xf32>, vector<8x8x32xf32>, vector<8x8x32xf32> -> vector<8x8x32xf32>
    "tpu.trace_stop"() : () -> ()
    %282 = vector.broadcast %57 : vector<8x1x32xf32> to vector<8x8x32xf32>
    %283 = arith.mulf %281, %282 : vector<8x8x32xf32>
    %284 = vector.extract_strided_slice %283 {offsets = [0, 0, 0], sizes = [2, 8, 32], strides = [1, 1, 1]} : vector<8x8x32xf32> to vector<2x8x32xf32>
    %285 = vector.extract_strided_slice %283 {offsets = [2, 0, 0], sizes = [2, 8, 32], strides = [1, 1, 1]} : vector<8x8x32xf32> to vector<2x8x32xf32>
    %286 = arith.addf %284, %285 : vector<2x8x32xf32>
    %287 = vector.extract_strided_slice %283 {offsets = [4, 0, 0], sizes = [2, 8, 32], strides = [1, 1, 1]} : vector<8x8x32xf32> to vector<2x8x32xf32>
    %288 = arith.addf %286, %287 : vector<2x8x32xf32>
    %289 = vector.extract_strided_slice %283 {offsets = [6, 0, 0], sizes = [2, 8, 32], strides = [1, 1, 1]} : vector<8x8x32xf32> to vector<2x8x32xf32>
    %290 = arith.addf %288, %289 : vector<2x8x32xf32>
    %291 = vector.shape_cast %290 : vector<2x8x32xf32> to vector<16x32xf32>
    %292 = arith.addf %155, %262 : vector<16x32xf32>
    %c320 = arith.constant 320 : index
    %c0_84 = arith.constant 0 : index
    %293 = vector.load %arg4[%c320, %c0_84] : memref<584x96xf32, #tpu.memory_space<vmem>>, vector<32x32xf32>
    %c352 = arith.constant 352 : index
    %c0_85 = arith.constant 0 : index
    %294 = vector.load %arg4[%c352, %c0_85] : memref<584x96xf32, #tpu.memory_space<vmem>>, vector<1x32xf32>
    %cst_86 = arith.constant dense<0.000000e+00> : vector<16x32xf32>
    %295 = tpu.matmul %292, %293, %cst_86 {dimension_numbers = #tpu.dot_dimension_numbers<[1], [0], [0], [1], [0, 0, 1, 1], [], []>} : vector<16x32xf32>, vector<32x32xf32>, vector<16x32xf32> -> vector<16x32xf32>
    %296 = vector.broadcast %294 : vector<1x32xf32> to vector<16x32xf32>
    %297 = arith.addf %295, %296 : vector<16x32xf32>
    %298 = arith.addf %163, %291 : vector<16x32xf32>
    %c360 = arith.constant 360 : index
    %c0_87 = arith.constant 0 : index
    %299 = vector.load %arg4[%c360, %c0_87] : memref<584x96xf32, #tpu.memory_space<vmem>>, vector<32x32xf32>
    %c392 = arith.constant 392 : index
    %c0_88 = arith.constant 0 : index
    %300 = vector.load %arg4[%c392, %c0_88] : memref<584x96xf32, #tpu.memory_space<vmem>>, vector<1x32xf32>
    %cst_89 = arith.constant dense<0.000000e+00> : vector<16x32xf32>
    %301 = tpu.matmul %298, %299, %cst_89 {dimension_numbers = #tpu.dot_dimension_numbers<[1], [0], [0], [1], [0, 0, 1, 1], [], []>} : vector<16x32xf32>, vector<32x32xf32>, vector<16x32xf32> -> vector<16x32xf32>
    %302 = vector.broadcast %300 : vector<1x32xf32> to vector<16x32xf32>
    %303 = arith.addf %301, %302 : vector<16x32xf32>
    %304 = vector.shape_cast %297 : vector<16x32xf32> to vector<2x8x32xf32>
    "tpu.trace_start"() <{level = 10 : i32, message = "bqs,bsf->bqf"}> : () -> ()
    %cst_90 = arith.constant dense<0.000000e+00> : vector<2x1x32xf32>
    %305 = tpu.matmul %6, %304, %cst_90 {dimension_numbers = #tpu.dot_dimension_numbers<[2], [1], [1], [2], [0, 0, 0, 1, 1, 2], [0], [0]>} : vector<2x1x8xf32>, vector<2x8x32xf32>, vector<2x1x32xf32> -> vector<2x1x32xf32>
    "tpu.trace_stop"() : () -> ()
    %cst_91 = arith.constant dense<0.000000e+00> : vector<2x32xf32>
    %306 = vector.multi_reduction <add>, %305, %cst_91 [1] : vector<2x1x32xf32> to vector<2x32xf32>
    %307 = vector.broadcast %22 : vector<2x1xf32> to vector<2x32xf32>
    %308 = arith.mulf %306, %307 : vector<2x32xf32>
    %309 = vector.shape_cast %303 : vector<16x32xf32> to vector<2x8x32xf32>
    "tpu.trace_start"() <{level = 10 : i32, message = "bqs,bsf->bqf"}> : () -> ()
    %cst_92 = arith.constant dense<0.000000e+00> : vector<2x1x32xf32>
    %310 = tpu.matmul %7, %309, %cst_92 {dimension_numbers = #tpu.dot_dimension_numbers<[2], [1], [1], [2], [0, 0, 0, 1, 1, 2], [0], [0]>} : vector<2x1x8xf32>, vector<2x8x32xf32>, vector<2x1x32xf32> -> vector<2x1x32xf32>
    "tpu.trace_stop"() : () -> ()
    %cst_93 = arith.constant dense<0.000000e+00> : vector<2x32xf32>
    %311 = vector.multi_reduction <add>, %310, %cst_93 [1] : vector<2x1x32xf32> to vector<2x32xf32>
    %312 = vector.broadcast %27 : vector<2x1xf32> to vector<2x32xf32>
    %313 = arith.mulf %311, %312 : vector<2x32xf32>
    %314 = arith.mulf %308, %313 : vector<2x32xf32>
    %c400 = arith.constant 400 : index
    %c0_94 = arith.constant 0 : index
    %315 = vector.load %arg4[%c400, %c0_94] : memref<584x96xf32, #tpu.memory_space<vmem>>, vector<32x32xf32>
    %c432 = arith.constant 432 : index
    %c0_95 = arith.constant 0 : index
    %316 = vector.load %arg4[%c432, %c0_95] : memref<584x96xf32, #tpu.memory_space<vmem>>, vector<1x32xf32>
    %cst_96 = arith.constant dense<0.000000e+00> : vector<2x32xf32>
    %317 = tpu.matmul %314, %315, %cst_96 {dimension_numbers = #tpu.dot_dimension_numbers<[1], [0], [0], [1], [0, 0, 1, 1], [], []>} : vector<2x32xf32>, vector<32x32xf32>, vector<2x32xf32> -> vector<2x32xf32>
    %318 = vector.broadcast %316 : vector<1x32xf32> to vector<2x32xf32>
    %319 = arith.addf %317, %318 : vector<2x32xf32>
    %c0_97 = arith.constant 0 : index
    %c0_98 = arith.constant 0 : index
    %320 = vector.load %arg5[%c0_97, %c0_98] : memref<2x32xf32, #tpu.memory_space<vmem>>, vector<2x32xf32>
    tpu.vector_store %arg5[%c0_97, %c0_98], %319 {strides = array<i32>} : memref<2x32xf32, #tpu.memory_space<vmem>>, vector<2x32xf32>,
    return
  }
}

</mosaic_0001>

<bundles_post_ra>
// kernel: single_block_forward.1
= control target key start
LH: loop header
LB: loop body
LE: loop exit
PB: predicated region body
PF: predicated region fallthrough
CT: control target
= control target key end

     0   :  { %vm127_vm0 = vcmask 261120   ;;  %s9846_s0 = inlined_call_operand.vmem [shape: f32[2,8,32], index: 0, kind: input, shape index: {}]   ;;  %s9847_s1 = inlined_call_operand.vmem [shape: f32[2,8,32], index: 1, kind: input, shape index: {}]   ;;  %s9848_s2 = inlined_call_operand.vmem [shape: f32[2,8], index: 2, kind: input, shape index: {}]   ;;  %s9849_s3 = inlined_call_operand.vmem [shape: f32[2,8], index: 3, kind: input, shape index: {}]   ;;  %s9850_s4 = inlined_call_operand.vmem [shape: f32[584,96], index: 4, kind: input, shape index: {}]   ;;  %s9851_s5 = inlined_call_operand.hbm [shape: f32[2,32], index: 5, kind: output, shape index: {}]  }
   0x1   :  { %v118_v0 = vld [vmem:[%s9850_s4 + $0xa0] sm:$0xff]  ;;  %v119_v1 = vld [vmem:[%s9850_s4 + $0xa8] sm:$0xff]  ;;  %v210_v4 = vld [vmem:[%s9850_s4 + $0xd0] sm:$0xff] }
   0x2   :  { %v209_v2 = vld [vmem:[%s9850_s4 + $0xc8] sm:$0xff]  ;;  %v8370_v3 = vpack.c.bf16 %v119_v1, %v118_v0  ;;  %v120_v5 = vld [vmem:[%s9850_s4 + $0xb0] sm:$0xff]  ;;  %v121_v6 = vld [vmem:[%s9850_s4 + $0xb8] sm:$0xff] }
   0x3   :  { %v8378_v7 = vpack.c.bf16 %v210_v4, %v209_v2  ;;  %v8374_v8 = vpack.c.bf16 %v121_v6, %v120_v5  ;;  %v211_v9 = vld [vmem:[%s9850_s4 + $0xd8] sm:$0xff]  ;;  %v212_v10 = vld [vmem:[%s9850_s4 + $0xe0] sm:$0xff]  ;;  %v302_v15 = vld [vmem:[%s9850_s4 + $0x8] sm:$0xff] }
   0x4   :  { %v21_v11 = vld [vmem:[%s9846_s0] sm:$0xff]  ;;  %8371 = vmatprep.subr.bf16.mxu0 %v8370_v3  ;;  %v8382_v12 = vpack.c.bf16 %v212_v10, %v211_v9  ;;  %v393_v16 = vld [vmem:[%s9850_s4 + $0x28] sm:$0xff]  ;;  %v394_v18 = vld [vmem:[%s9850_s4 + $0x30] sm:$0xff] }
   0x5   :  { %7853 = vmatprep.mubr.msk.f32.mxu0 %vm127_vm0, %v21_v11  ;;  %v23_v13 = vld [vmem:[%s9847_s1] sm:$0xff]  ;;  %8379 = vmatprep.subr.bf16.mxu1 %v8378_v7 }
   0x6   :  { %8373 = vmatpush3.bf16.msra.mxu0 %v8370_v3  ;;  %v301_v14 = vld [vmem:[%s9850_s4] sm:$0xff]  ;;  %8381 = vmatpush3.bf16.msra.mxu1 %v8378_v7 }
   0x7   :  { %8375 = vmatprep.subr.bf16.mxu0 %v8374_v8  ;;  %v8386_v17 = vpack.c.bf16 %v302_v15, %v301_v14 }
   0x8   :  { %10 = vsyncpa [#allocation3], 0  ;;  %8383 = vmatprep.subr.bf16.mxu1 %v8382_v12  ;;  %7864 = vmatprep.mubr.msk.f32.mxu1 %vm127_vm0, %v23_v13  ;;  %v8394_v19 = vpack.c.bf16 %v394_v18, %v393_v16  ;;  %v22_v20 = vld [vmem:[%s9846_s0 + $0x8] sm:$0xff]  ;;  %v303_v22 = vld [vmem:[%s9850_s4 + $0x10] sm:$0xff]  ;;  %v31_v28 = vlaneseq  ;;  %v8662_v29 = vmov 0.0   ;;  %s8663_s6 = smov 32  }
   0x9   :  { %v24_v21 = vld [vmem:[%s9847_s1 + $0x8] sm:$0xff]  ;;  %v304_v23 = vld [vmem:[%s9850_s4 + $0x18] sm:$0xff]  ;;  %v396_v26 = vld [vmem:[%s9850_s4 + $0x40] sm:$0xff]  ;;  %vm8664_vm11 = vmmov 0   ;;  %s8665_s15 = smov 96   ;;  %vm1141_vm12 = vcmask 64512  }
   0xa   :  { %8377 = vmatpush3.bf16.msra.mxu0 %v8374_v8  ;;  %8385 = vmatpush3.bf16.msra.mxu1 %v8382_v12  ;;  %v395_v24 = vld [vmem:[%s9850_s4 + $0x38] sm:$0xff]  ;;  %v8390_v25 = vpack.c.bf16 %v304_v23, %v303_v22  ;;  %v8766_v30 = vshrl.u32 %v31_v28, 7  ;;  %v97_v31 = vand.u32 127, %v31_v28  ;;  %v7468_v41 = vld [vmem:[%s9850_s4 + $0xc0] ss:$0 sm:$0xff]  ;;  %s8667_s18 = smov 64  }
   0xb   :  { %8387 = vmatprep.subr.bf16.mxu0 %v8386_v17  ;;  %8395 = vmatprep.subr.bf16.mxu1 %v8394_v19  ;;  %v8398_v27 = vpack.c.bf16 %v396_v26, %v395_v24  ;;  %v7471_v42 = vld [vmem:[%s9850_s4 + $0xe8] ss:$0 sm:$0xff]  ;;  %v7474_v56 = vld [vmem:[%s9850_s4 + $0x20] ss:$0 sm:$0xff]  ;;  %vm85_vm13 = vcmask 58368   ;;  %vm3824_vm14 = vcmask 1041409  }
   0xc   :  { %vm108_vm1 = vcmp.ge.s32.totalorder %v97_v31, 16  ;;  %vm109_vm2 = vcmp.lt.s32.totalorder %v97_v31, 24  ;;  %v8769_v32 = vsub.s32 0, %v8766_v30  ;;  %vm99_vm3 = vcmp.lt.s32.totalorder %v97_v31, 8  ;;  %v7477_v57 = vld [vmem:[%s9850_s4 + $0x48] ss:$0 sm:$0xff] }
   0xd   :  { %7854 = vmatmul.mubr.msk.f32.vlgmr.msra.gmra.mrb[0].mxu0 %vm127_vm0, %v22_v20  ;;  %7865 = vmatmul.mubr.msk.f32.vlgmr.msra.gmra.mrb[0].mxu1 %vm127_vm0, %v24_v21  ;;  %vm110_vm4 = vmand %vm108_vm1, %vm109_vm2  ;;  %v7464_v33 = vsel %vm99_vm3, 1.0, %v8662_v29  ;;  %vm113_vm5 = vcmp.ge.s32.totalorder %v97_v31, 24  ;;  %vm114_vm6 = vcmp.lt.s32.totalorder %v97_v31, 32  ;;  %vm103_vm8 = vcmp.ge.s32.totalorder %v97_v31, 8 }
   0xe   :  { %8389 = vmatpush3.bf16.msra.mxu0 %v8386_v17  ;;  %8397 = vmatpush3.bf16.msra.mxu1 %v8394_v19  ;;  %v7466_v34 = vsel %vm110_vm4, 1.0, %v8662_v29  ;;  %v8774_v35 = vrot.slane %v7464_v33, %v8769_v32  ;;  %vm115_vm7 = vmand %vm113_vm5, %vm114_vm6  ;;  %vm104_vm9 = vcmp.lt.s32.totalorder %v97_v31, 16  ;;  %v8666_v21 = vmov 1966171168  }
   0xf   :  { %8391 = vmatprep.subr.bf16.mxu0 %v8390_v25  ;;  %8399 = vmatprep.subr.bf16.mxu1 %v8398_v27  ;;  %v8777_v36 = vrot.slane %v7466_v34, %v8769_v32  ;;  %v7467_v37 = vsel %vm115_vm7, 1.0, %v8662_v29  ;;  %vm105_vm10 = vmand %vm103_vm8, %vm104_vm9  ;;  %v29_v22 = vunpack.c.l.s4 %v8666_v21  ;;  %vm7444_vm15 = vcmask 254976  }
  0x10   :  { %503 = vrot.lane.b32.xlu0 %v8774_v35, %s8663_s6  ;;  %v7465_v38 = vsel %vm105_vm10, 1.0, %v8662_v29  ;;  %v8786_v39 = vrot.slane %v7467_v37, %v8769_v32 }
  0x11   :  { %507 = vrot.lane.b32.xlu1 %v8777_v36, %s8663_s6  ;;  %v8789_v40 = vrot.slane %v7465_v38, %v8769_v32  ;;  %v30_v23 = vunpack.c.0.s8 %v29_v22 }
  0x12   :  { %8393 = vmatpush3.bf16.msra.mxu0 %v8390_v25  ;;  %8401 = vmatpush3.bf16.msra.mxu1 %v8398_v27  ;;  %v8637_v25 = vld.sshfl [vmem:[%s9849_s3] sm:$0x11 pattern:$0x75316420] }
  0x13   :  { %7889 = vmatprep.subr.mxu1 %v8662_v29  ;;  %7899 = vmatprep.subr.mxu0 %v8662_v29  ;;  %v8916_v24 = vsub.s32 %v30_v23, %v8766_v30  ;;  %v60_v27 = vcombine.high %v8637_v25, %v8637_v25 }
  0x14   :  { %505 = vrot.lane.b32.xlu0 %v8789_v40, %s8663_s6 }
  0x15   :  { %509 = vrot.lane.b32.xlu1 %v8786_v39, %s8663_s6  ;;  %v8922_v26 = vrot.slane %v8637_v25, %v8916_v24  ;;  %v8926_v31 = vrot.slane %v60_v27, %v8916_v24 }
  0x17   :  { %v7462_v28 = vadd.f32 -1.0, %v8922_v26  ;;  %v7463_v34 = vadd.f32 -1.0, %v8926_v31 }
  0x19   :  { %v83_v33 = vmul.f32 1e+30, %v7462_v28  ;;  %v84_v30 = vmul.f32 1e+30, %v7463_v34 }
  0x1b   :  { %v8930_v37 = vrot.slane %v83_v33, %v8769_v32 }
  0x82   :  { %v8821_v55 = vpop.permute.xlu0 %503 }
  0x83   :  { %v8846_v5 = vpop.permute.xlu1 %507 }
  0x86   :  { %v8839_v3 = vpop.permute.xlu0 %505 }
  0x87   :  { %v8861_v9 = vpop.permute.xlu1 %509 }
  0xe0   :  { %v7855_v43 = vpop.f32.mrb[0].mxu0  ;;  %v7866_v45 = vpop.f32.mrb[0].mxu1 }
  0xe1   :  { %v8801_v44 = vadd.f32 %v7855_v43, %v7468_v41  ;;  %v200_v46 = vpop.f32.mrb[1].mxu0  ;;  %v8803_v47 = vadd.f32 %v7866_v45, %v7471_v42  ;;  %v290_v49 = vpop.f32.mrb[1].mxu1  ;;  %v8934_v43 = vrot.slane %v84_v30, %v8769_v32 }
  0xe2   :  { %v8805_v48 = vadd.f32 %v7468_v41, %v200_v46  ;;  %v8807_v50 = vadd.f32 %v7471_v42, %v290_v49 }
  0xe3   :  { %v392_v51 = vmax.f32 %v8803_v47, 0.0  ;;  %v300_v53 = vmax.f32 %v8801_v44, 0.0 }
  0xe4   :  { %v299_v52 = vmax.f32 %v8805_v48, 0.0  ;;  %v391_v54 = vmax.f32 %v8807_v50, 0.0 }
  0xe6   :  { %7875 = vmatprep.mubr.msk.f32.mxu0 %vm127_vm0, %v299_v52  ;;  %7886 = vmatprep.mubr.msk.f32.mxu1 %vm127_vm0, %v391_v54 }
  0xe7   :  { %7876 = vmatmul.mubr.msk.f32.vlgmr.msra.gmra.mrb[2].mxu0 %vm127_vm0, %v300_v53  ;;  %7887 = vmatmul.mubr.msk.f32.vlgmr.msra.gmra.mrb[2].mxu1 %vm127_vm0, %v392_v51 }
  0xe8   :  { %7891 = vmatprep.mubr.msk.f32.mxu1 %vm8664_vm11, %v8662_v29  ;;  %7901 = vmatprep.mubr.msk.f32.mxu0 %vm8664_vm11, %v8662_v29 }
 0x1ba   :  { %v7877_v58 = vpop.f32.mrb[2].mxu0  ;;  %v7888_v60 = vpop.f32.mrb[2].mxu1 }
 0x1bb   :  { %v8829_v59 = vadd.f32 %v7877_v58, %v7474_v56  ;;  %v382_v61 = vpop.f32.mrb[3].mxu0  ;;  %v8831_v62 = vadd.f32 %v7888_v60, %v7477_v57  ;;  %v474_v0 = vpop.f32.mrb[3].mxu1 }
 0x1bc   :  { %v8833_v63 = vadd.f32 %v7474_v56, %v382_v61  ;;  %v8835_v1 = vadd.f32 %v7477_v57, %v474_v0 }
 0x1bd   :  { %v516_v2 = vmul.f32 %v8821_v55, %v8829_v59  ;;  %v518_v6 = vmul.f32 %v8839_v3, %v8829_v59  ;;  %v520_v8 = vmul.f32 %v8846_v5, %v8829_v59  ;;  %v522_v11 = vmul.f32 %v8861_v9, %v8829_v59 }
 0x1be   :  { %v515_v4 = vmul.f32 %v8821_v55, %v8833_v63  ;;  %7890 = vmatpush3.xpose.msk.msra.mxu1 %vm127_vm0, %v8835_v1  ;;  %7900 = vmatpush3.xpose.msk.msra.mxu0 %vm127_vm0, %v8835_v1  ;;  %v517_v7 = vmul.f32 %v8839_v3, %v8833_v63  ;;  %v519_v10 = vmul.f32 %v8846_v5, %v8833_v63 }
 0x1bf   :  { %614 = vrot.lane.b32.xlu1 %v516_v2, %s8665_s15  ;;  %7894 = vmatprep.subr.mxu1 %v8662_v29  ;;  %v521_v12 = vmul.f32 %v8861_v9, %v8833_v63 }
 0x1c0   :  { %536 = vrot.lane.b32.xlu0 %v515_v4, %s8665_s15  ;;  %7909 = vmatprep.subr.mxu0 %v8662_v29 }
 0x1c3   :  { %767 = vrot.lane.b32.xlu1 %v518_v6, %s8665_s15 }
 0x1c4   :  { %692 = vrot.lane.b32.xlu0 %v517_v7, %s8665_s15 }
 0x1c7   :  { %917 = vrot.lane.b32.xlu1 %v520_v8, %s8665_s15 }
 0x1c8   :  { %842 = vrot.lane.b32.xlu0 %v519_v10, %s8665_s15 }
 0x1cb   :  { %1067 = vrot.lane.b32.xlu1 %v522_v11, %s8665_s15 }
 0x1cc   :  { %992 = vrot.lane.b32.xlu0 %v521_v12, %s8665_s15 }
 0x231   :  { %v615_v13 = vpop.permute.xlu1 %614 }
 0x232   :  { %v537_v14 = vpop.permute.xlu0 %536 }
 0x233   :  { %7892 = vmatmul.mubr.msk.f32.vlgmr.msra.gmra.mrb[4].mxu1 %vm127_vm0, %v537_v14 }
 0x234   :  { %7895 = vmatpush3.xpose.msk.msra.mxu1 %vm127_vm0, %v8831_v62  ;;  %7896 = vmatprep.mubr.msk.f32.mxu1 %vm8664_vm11, %v8662_v29 }
 0x235   :  { %7904 = vmatprep.subr.mxu1 %v8662_v29  ;;  %v768_v15 = vpop.permute.xlu1 %767 }
 0x236   :  { %v693_v16 = vpop.permute.xlu0 %692 }
 0x237   :  { %7897 = vmatmul.mubr.msk.f32.vlgmr.msra.gmra.mrb[6].mxu1 %vm127_vm0, %v615_v13  ;;  %7902 = vmatmul.mubr.msk.f32.vlgmr.msra.gmra.mrb[4].mxu0 %vm127_vm0, %v693_v16 }
 0x238   :  { %7905 = vmatpush3.xpose.msk.msra.mxu1 %vm127_vm0, %v8831_v62  ;;  %7910 = vmatpush3.xpose.msk.msra.mxu0 %vm127_vm0, %v8835_v1 }
 0x239   :  { %7906 = vmatprep.mubr.msk.f32.mxu1 %vm8664_vm11, %v8662_v29  ;;  %7911 = vmatprep.mubr.msk.f32.mxu0 %vm8664_vm11, %v8662_v29  ;;  %v918_v18 = vpop.permute.xlu1 %917 }
 0x23a   :  { %7914 = vmatprep.subr.mxu1 %v8662_v29  ;;  %7919 = vmatprep.subr.mxu0 %v8662_v29  ;;  %v843_v17 = vpop.permute.xlu0 %842 }
 0x23b   :  { %7907 = vmatmul.mubr.msk.f32.vlgmr.msra.gmra.mrb[8].mxu1 %vm127_vm0, %v768_v15  ;;  %7912 = vmatmul.mubr.msk.f32.vlgmr.msra.gmra.mrb[6].mxu0 %vm127_vm0, %v843_v17 }
 0x23c   :  { %7915 = vmatpush3.xpose.msk.msra.mxu1 %vm127_vm0, %v8831_v62  ;;  %7920 = vmatpush3.xpose.msk.msra.mxu0 %vm127_vm0, %v8835_v1 }
 0x23d   :  { %7916 = vmatprep.mubr.msk.f32.mxu1 %vm8664_vm11, %v8662_v29  ;;  %7921 = vmatprep.mubr.msk.f32.mxu0 %vm8664_vm11, %v8662_v29  ;;  %v1068_v20 = vpop.permute.xlu1 %1067 }
 0x23e   :  { %7924 = vmatprep.subr.mxu1 %v8662_v29  ;;  %v993_v19 = vpop.permute.xlu0 %992  ;;  %7929 = vmatprep.subr.mxu0 %v8662_v29 }
 0x23f   :  { %7917 = vmatmul.mubr.msk.f32.vlgmr.msra.gmra.mrb[10].mxu1 %vm127_vm0, %v918_v18  ;;  %7922 = vmatmul.mubr.msk.f32.vlgmr.msra.gmra.mrb[8].mxu0 %vm127_vm0, %v993_v19 }
 0x240   :  { %7925 = vmatpush3.xpose.msk.msra.mxu1 %vm127_vm0, %v8831_v62  ;;  %7926 = vmatprep.mubr.msk.f32.mxu1 %vm8664_vm11, %v8662_v29 }
 0x241   :  { %7931 = vmatprep.mubr.msk.f32.mxu0 %vm8664_vm11, %v8662_v29  ;;  %7934 = vmatprep.subr.mxu1 %v8662_v29 }
 0x243   :  { %7927 = vmatmul.mubr.msk.f32.vlgmr.msra.gmra.mrb[12].mxu1 %vm127_vm0, %v1068_v20 }
 0x244   :  { %7936 = vmatprep.mubr.msk.f32.mxu1 %vm8664_vm11, %v8662_v29 }
 0x306   :  { %v609_v38 = vpop.f32.mrb[4].mxu1 }
 0x307   :  { %v610_v41 = vadd.f32 %v609_v38, %v8930_v37  ;;  %v7893_v42 = vpop.f32.mrb[5].mxu1 }
 0x309   :  { %v1142_v45 = vsel %vm1141_vm12, %v610_v41, -inf }
 0x30a   :  { %1143 = vmax.xlane.f32.xlu0 %v1142_v45  ;;  %v687_v46 = vpop.f32.mrb[6].mxu1  ;;  %v762_v49 = vpop.f32.mrb[4].mxu0 }
 0x30b   :  { %v688_v51 = vadd.f32 %v687_v46, %v8934_v43  ;;  %v763_v52 = vadd.f32 %v762_v49, %v8930_v37  ;;  %v7898_v53 = vpop.f32.mrb[7].mxu1  ;;  %v7903_v54 = vpop.f32.mrb[5].mxu0 }
 0x30d   :  { %v1145_v56 = vsel %vm1141_vm12, %v688_v51, -inf  ;;  %v1148_v57 = vsel %vm1141_vm12, %v763_v52, -inf }
 0x30e   :  { %1146 = vmax.xlane.f32.xlu1 %v1145_v56  ;;  %v837_v58 = vpop.f32.mrb[8].mxu1  ;;  %1149 = vmax.xlane.f32.xlu0 %v1148_v57  ;;  %v912_v60 = vpop.f32.mrb[6].mxu0 }
 0x30f   :  { %v838_v61 = vadd.f32 %v837_v58, %v8934_v43  ;;  %v913_v0 = vadd.f32 %v912_v60, %v8930_v37  ;;  %v7908_v2 = vpop.f32.mrb[9].mxu1  ;;  %v7913_v4 = vpop.f32.mrb[7].mxu0 }
 0x311   :  { %v1151_v6 = vsel %vm1141_vm12, %v838_v61, -inf  ;;  %v1154_v7 = vsel %vm1141_vm12, %v913_v0, -inf }
 0x312   :  { %v987_v8 = vpop.f32.mrb[10].mxu1  ;;  %1152 = vmax.xlane.f32.xlu0 %v1151_v6  ;;  %1155 = vmax.xlane.f32.xlu1 %v1154_v7  ;;  %v1062_v10 = vpop.f32.mrb[8].mxu0 }
 0x313   :  { %v988_v11 = vadd.f32 %v987_v8, %v8934_v43  ;;  %v1063_v12 = vadd.f32 %v1062_v10, %v8930_v37  ;;  %v7918_v13 = vpop.f32.mrb[11].mxu1  ;;  %v7923_v14 = vpop.f32.mrb[9].mxu0 }
 0x315   :  { %v1157_v15 = vsel %vm1141_vm12, %v988_v11, -inf  ;;  %v1160_v16 = vsel %vm1141_vm12, %v1063_v12, -inf }
 0x316   :  { %v1137_v17 = vpop.f32.mrb[12].mxu1  ;;  %1158 = vmax.xlane.f32.xlu0 %v1157_v15  ;;  %1161 = vmax.xlane.f32.xlu1 %v1160_v16 }
 0x317   :  { %v1138_v18 = vadd.f32 %v1137_v17, %v8934_v43  ;;  %v7928_v19 = vpop.f32.mrb[13].mxu1 }
 0x319   :  { %v1163_v20 = vsel %vm1141_vm12, %v1138_v18, -inf }
 0x31a   :  { %1164 = vmax.xlane.f32.xlu0 %v1163_v20 }
 0x327   :  { %1230 = vrot.lane.b32.xlu1 %v8835_v1, %s8667_s18 }
 0x397   :  { %v1144_v21 = vpop.xlane.xlu0 %1143 }
 0x398   :  { %v1166_v22 = vsub.f32 %v610_v41, %v1144_v21  ;;  %v1834_v21 = vmul.f32 %v8821_v55, %v8835_v1 }
 0x39a   :  { %v1174_v23 = vmul.f32 1.442695, %v1166_v22  ;;  %v1835_v22 = vmul.f32 %v8821_v55, %v8831_v62 }
 0x39b   :  { %v1147_v25 = vpop.xlane.xlu1 %1146  ;;  %v1150_v27 = vpop.xlane.xlu0 %1149 }
 0x39c   :  { %8496 = vpow2.f32 %v1174_v23  ;;  %v1167_v28 = vsub.f32 %v688_v51, %v1147_v25  ;;  %v1168_v33 = vsub.f32 %v763_v52, %v1150_v27  ;;  %v1837_v23 = vmul.f32 %v8839_v3, %v8831_v62 }
 0x39d   :  { %v1839_v25 = vmul.f32 %v8846_v5, %v8831_v62  ;;  %v1836_v27 = vmul.f32 %v8839_v3, %v8835_v1 }
 0x39e   :  { %v1176_v34 = vmul.f32 1.442695, %v1167_v28  ;;  %v1178_v30 = vmul.f32 1.442695, %v1168_v33  ;;  %v1841_v28 = vmul.f32 %v8861_v9, %v8831_v62  ;;  %v1838_v33 = vmul.f32 %v8846_v5, %v8835_v1 }
 0x39f   :  { %v1156_v38 = vpop.xlane.xlu1 %1155  ;;  %v1153_v42 = vpop.xlane.xlu0 %1152 }
 0x3a0   :  { %8498 = vpow2.f32 %v1176_v34  ;;  %v1170_v45 = vsub.f32 %v913_v0, %v1156_v38  ;;  %v1169_v46 = vsub.f32 %v838_v61, %v1153_v42  ;;  %v1840_v34 = vmul.f32 %v8861_v9, %v8835_v1 }
 0x3a1   :  { %8500 = vpow2.f32 %v1178_v30 }
 0x3a2   :  { %v1182_v49 = vmul.f32 1.442695, %v1170_v45  ;;  %v1180_v53 = vmul.f32 1.442695, %v1169_v46 }
 0x3a3   :  { %v1162_v54 = vpop.xlane.xlu1 %1161  ;;  %v1159_v56 = vpop.xlane.xlu0 %1158 }
 0x3a4   :  { %8502 = vpow2.f32 %v1182_v49  ;;  %v1172_v41 = vsub.f32 %v1063_v12, %v1162_v54  ;;  %v1171_v57 = vsub.f32 %v988_v11, %v1159_v56 }
 0x3a5   :  { %8504 = vpow2.f32 %v1180_v53 }
 0x3a6   :  { %v8497_v58 = vpop.eup %8496  ;;  %v1186_v60 = vmul.f32 1.442695, %v1172_v41  ;;  %v1184_v51 = vmul.f32 1.442695, %v1171_v57 }
 0x3a7   :  { %v8953_v52 = vpop.permute.xlu1 %1230  ;;  %v1165_v2 = vpop.xlane.xlu0 %1164  ;;  %v1190_v4 = vsel %vm1141_vm12, %v8497_v58, 0.0 }
 0x3a8   :  { %8506 = vpow2.f32 %v1186_v60  ;;  %v1173_v0 = vsub.f32 %v1138_v18, %v1165_v2  ;;  %7930 = vmatpush3.msra.mxu0 %v8953_v52  ;;  %1191 = vadd.xlane.f32.xlu1 %v1190_v4 }
 0x3a9   :  { %8508 = vpow2.f32 %v1184_v51  ;;  %7939 = vmatprep.subr.mxu0 %v8662_v29 }
 0x3aa   :  { %v8958_v61 = vpop.eup %8498  ;;  %v1188_v6 = vmul.f32 1.442695, %v1173_v0 }
 0x3ab   :  { %v8501_v7 = vpop.eup %8500  ;;  %v1193_v8 = vsel %vm1141_vm12, %v8958_v61, 0.0 }
 0x3ac   :  { %8510 = vpow2.f32 %v1188_v6  ;;  %1194 = vadd.xlane.f32.xlu0 %v1193_v8  ;;  %v1196_v10 = vsel %vm1141_vm12, %v8501_v7, 0.0 }
 0x3ad   :  { %1197 = vadd.xlane.f32.xlu1 %v1196_v10 }
 0x3ae   :  { %v8503_v11 = vpop.eup %8502 }
 0x3af   :  { %v8963_v12 = vpop.eup %8504  ;;  %v1202_v13 = vsel %vm1141_vm12, %v8503_v11, 0.0 }
 0x3b0   :  { %v1199_v14 = vsel %vm1141_vm12, %v8963_v12, 0.0 }
 0x3b1   :  { %1203 = vadd.xlane.f32.xlu1 %v1202_v13  ;;  %1200 = vadd.xlane.f32.xlu0 %v1199_v14 }
 0x3b2   :  { %v8968_v15 = vpop.eup %8506 }
 0x3b3   :  { %v8970_v16 = vpop.eup %8508  ;;  %v1208_v17 = vsel %vm1141_vm12, %v8968_v15, 0.0 }
 0x3b4   :  { %v1205_v18 = vsel %vm1141_vm12, %v8970_v16, 0.0 }
 0x3b5   :  { %1209 = vadd.xlane.f32.xlu1 %v1208_v17  ;;  %1206 = vadd.xlane.f32.xlu0 %v1205_v18 }
 0x3b6   :  { %v8976_v19 = vpop.eup %8510 }
 0x3b7   :  { %v1211_v20 = vsel %vm1141_vm12, %v8976_v19, 0.0 }
 0x3b9   :  { %1212 = vadd.xlane.f32.xlu0 %v1211_v20 }
 0x3c6   :  { %1855 = vrot.lane.b32.xlu1 %v1834_v21, %s8665_s15 }
 0x3ca   :  { %1933 = vrot.lane.b32.xlu1 %v1835_v22, %s8665_s15 }
 0x3ce   :  { %2086 = vrot.lane.b32.xlu1 %v1837_v23, %s8665_s15 }
 0x3cf   :  { %1306 = vrot.lane.b32.xlu0 %v8831_v62, %s8667_s18 }
 0x3d2   :  { %2236 = vrot.lane.b32.xlu1 %v1839_v25, %s8665_s15 }
 0x3d3   :  { %2011 = vrot.lane.b32.xlu0 %v1836_v27, %s8665_s15 }
 0x3d6   :  { %2386 = vrot.lane.b32.xlu1 %v1841_v28, %s8665_s15 }
 0x3d7   :  { %2161 = vrot.lane.b32.xlu0 %v1838_v33, %s8665_s15 }
 0x3db   :  { %2311 = vrot.lane.b32.xlu0 %v1840_v34, %s8665_s15 }
 0x435   :  { %v1192_v30 = vpop.xlane.xlu1 %1191 }
 0x436   :  { %8512 = vrcp.f32 %v1192_v30 }
 0x439   :  { %v1195_v38 = vpop.xlane.xlu0 %1194 }
 0x43a   :  { %v1198_v42 = vpop.xlane.xlu1 %1197 }
 0x43b   :  { %8514 = vrcp.f32 %v1198_v42 }
 0x43c   :  { %8516 = vrcp.f32 %v1195_v38 }
 0x43e   :  { %v1204_v45 = vpop.xlane.xlu1 %1203  ;;  %v1201_v62 = vpop.xlane.xlu0 %1200 }
 0x43f   :  { %8518 = vrcp.f32 %v1204_v45 }
 0x440   :  { %v8513_v46 = vpop.eup %8512  ;;  %8520 = vrcp.f32 %v1201_v62 }
 0x441   :  { %v1222_v49 = vmul.f32 %v8513_v46, %v8497_v58 }
 0x442   :  { %v1210_v53 = vpop.xlane.xlu1 %1209  ;;  %v1207_v54 = vpop.xlane.xlu0 %1206 }
 0x443   :  { %8522 = vrcp.f32 %v1210_v53  ;;  %7932 = vmatmul.mubr.msk.f32.vlgmr.msra.gmra.mrb[10].mxu0 %vm1141_vm12, %v1222_v49 }
 0x444   :  { %7940 = vmatpush3.msra.mxu0 %v8953_v52  ;;  %7941 = vmatprep.mubr.msk.f32.mxu0 %vm8664_vm11, %v8662_v29  ;;  %8524 = vrcp.f32 %v1207_v54 }
 0x445   :  { %v8515_v1 = vpop.eup %8514  ;;  %7949 = vmatprep.subr.mxu0 %v8662_v29 }
 0x446   :  { %v1224_v56 = vmul.f32 %v8515_v1, %v8501_v7  ;;  %v1213_v41 = vpop.xlane.xlu0 %1212  ;;  %v8517_v57 = vpop.eup %8516 }
 0x447   :  { %8526 = vrcp.f32 %v1213_v41  ;;  %v1223_v60 = vmul.f32 %v8517_v57, %v8958_v61  ;;  %v1856_v10 = vpop.permute.xlu1 %1855 }
 0x448   :  { %7942 = vmatmul.mubr.msk.f32.vlgmr.msra.gmra.mrb[12].mxu0 %vm1141_vm12, %v1224_v56 }
 0x449   :  { %v8519_v58 = vpop.eup %8518  ;;  %7950 = vmatpush3.msra.mxu0 %v8953_v52  ;;  %7951 = vmatprep.mubr.msk.f32.mxu0 %vm8664_vm11, %v8662_v29 }
 0x44a   :  { %v1226_v51 = vmul.f32 %v8519_v58, %v8503_v11  ;;  %v1307_v2 = vpop.permute.xlu0 %1306  ;;  %7959 = vmatprep.subr.mxu0 %v8662_v29  ;;  %v8521_v4 = vpop.eup %8520 }
 0x44b   :  { %7935 = vmatpush3.msra.mxu1 %v1307_v2  ;;  %v1225_v6 = vmul.f32 %v8521_v4, %v8963_v12  ;;  %v1934_v13 = vpop.permute.xlu1 %1933 }
 0x44c   :  { %7937 = vmatmul.mubr.msk.f32.vlgmr.msra.gmra.mrb[14].mxu1 %vm1141_vm12, %v1223_v60  ;;  %7944 = vmatprep.subr.mxu1 %v8662_v29 }
 0x44d   :  { %v8523_v0 = vpop.eup %8522  ;;  %7952 = vmatmul.mubr.msk.f32.vlgmr.msra.gmra.mrb[14].mxu0 %vm1141_vm12, %v1226_v51  ;;  %7945 = vmatpush3.msra.mxu1 %v1307_v2 }
 0x44e   :  { %v1228_v7 = vmul.f32 %v8523_v0, %v8968_v15  ;;  %7960 = vmatpush3.msra.mxu0 %v8953_v52  ;;  %7946 = vmatprep.mubr.msk.f32.mxu1 %vm8664_vm11, %v8662_v29  ;;  %v8525_v61 = vpop.eup %8524  ;;  %v2012_v12 = vpop.permute.xlu0 %2011 }
 0x44f   :  { %7954 = vmatprep.subr.mxu1 %v8662_v29  ;;  %7961 = vmatprep.mubr.msk.f32.mxu0 %vm8664_vm11, %v8662_v29  ;;  %v1227_v8 = vmul.f32 %v8525_v61, %v8970_v16  ;;  %v2087_v15 = vpop.permute.xlu1 %2086 }
 0x450   :  { %7947 = vmatmul.mubr.msk.f32.vlgmr.msra.gmra.mrb[16].mxu1 %vm1141_vm12, %v1225_v6  ;;  %7969 = vmatprep.subr.mxu0 %v8662_v29 }
 0x451   :  { %7955 = vmatpush3.msra.mxu1 %v1307_v2  ;;  %7962 = vmatmul.mubr.msk.f32.vlgmr.msra.gmra.mrb[16].mxu0 %vm1141_vm12, %v1228_v7  ;;  %v8527_v52 = vpop.eup %8526 }
 0x452   :  { %7956 = vmatprep.mubr.msk.f32.mxu1 %vm8664_vm11, %v8662_v29  ;;  %7964 = vmatprep.subr.mxu1 %v8662_v29  ;;  %v1229_v11 = vmul.f32 %v8527_v52, %v8976_v19  ;;  %v2162_v14 = vpop.permute.xlu0 %2161  ;;  %v9096_v19 = vld [vmem:[%s9848_s2] sm:$0x3] }
 0x453   :  { %7971 = vmatprep.mubr.msk.f32.mxu0 %vm8664_vm11, %v8662_v29  ;;  %v2237_v17 = vpop.permute.xlu1 %2236  ;;  %v34_v22 = vrot.slane %v9096_v19, %v8916_v24 }
 0x454   :  { %7957 = vmatmul.mubr.msk.f32.vlgmr.msra.gmra.mrb[18].mxu1 %vm1141_vm12, %v1227_v8 }
 0x455   :  { %7970 = vmatpush3.xpose.msk.msra.mxu0 %vm127_vm0, %v8833_v63  ;;  %7965 = vmatpush3.msra.mxu1 %v1307_v2  ;;  %v9103_v33 = vrot.slane %v34_v22, %v8916_v24  ;;  %v35_v38 = vcombine.high %v34_v22, %v34_v22 }
 0x456   :  { %7979 = vmatprep.subr.mxu0 %v8662_v29  ;;  %7966 = vmatprep.mubr.msk.f32.mxu1 %vm8664_vm11, %v8662_v29  ;;  %v2312_v16 = vpop.permute.xlu0 %2311 }
 0x457   :  { %7974 = vmatprep.subr.mxu1 %v8662_v29  ;;  %v2387_v18 = vpop.permute.xlu1 %2386  ;;  %v7460_v62 = vadd.f32 -1.0, %v9103_v33  ;;  %v9108_v1 = vrot.slane %v35_v38, %v8916_v24 }
 0x458   :  { %7972 = vmatmul.mubr.msk.f32.vlgmr.msra.gmra.mrb[18].mxu0 %vm127_vm0, %v1856_v10  ;;  %7967 = vmatmul.mubr.msk.f32.vlgmr.msra.gmra.mrb[20].mxu1 %vm1141_vm12, %v1229_v11 }
 0x459   :  { %7980 = vmatpush3.xpose.msk.msra.mxu0 %vm127_vm0, %v8833_v63  ;;  %7981 = vmatprep.mubr.msk.f32.mxu0 %vm8664_vm11, %v8662_v29  ;;  %v79_v60 = vmul.f32 1e+30, %v7460_v62  ;;  %v7461_v7 = vadd.f32 -1.0, %v9108_v1 }
 0x45a   :  { %7989 = vmatprep.subr.mxu0 %v8662_v29  ;;  %7976 = vmatprep.mubr.msk.f32.mxu1 %vm8664_vm11, %v8662_v29 }
 0x45b   :  { %v9118_v10 = vrot.slane %v79_v60, %v8769_v32 }
 0x45c   :  { %7982 = vmatmul.mubr.msk.f32.vlgmr.msra.gmra.mrb[20].mxu0 %vm127_vm0, %v2012_v12  ;;  %7975 = vmatpush3.xpose.msk.msra.mxu1 %vm127_vm0, %v8829_v59 }
 0x45d   :  { %7990 = vmatpush3.xpose.msk.msra.mxu0 %vm127_vm0, %v8833_v63  ;;  %7991 = vmatprep.mubr.msk.f32.mxu0 %vm8664_vm11, %v8662_v29 }
 0x45e   :  { %7984 = vmatprep.subr.mxu1 %v8662_v29  ;;  %7999 = vmatprep.subr.mxu0 %v8662_v29 }
 0x45f   :  { %7977 = vmatmul.mubr.msk.f32.vlgmr.msra.gmra.mrb[22].mxu1 %vm127_vm0, %v1934_v13  ;;  %v80_v13 = vmul.f32 1e+30, %v7461_v7 }
 0x460   :  { %7992 = vmatmul.mubr.msk.f32.vlgmr.msra.gmra.mrb[22].mxu0 %vm127_vm0, %v2162_v14  ;;  %7985 = vmatpush3.xpose.msk.msra.mxu1 %vm127_vm0, %v8829_v59 }
 0x461   :  { %8000 = vmatpush3.xpose.msk.msra.mxu0 %vm127_vm0, %v8833_v63  ;;  %7986 = vmatprep.mubr.msk.f32.mxu1 %vm8664_vm11, %v8662_v29  ;;  %v9126_v22 = vrot.slane %v80_v13, %v8769_v32 }
 0x462   :  { %8001 = vmatprep.mubr.msk.f32.mxu0 %vm8664_vm11, %v8662_v29  ;;  %7994 = vmatprep.subr.mxu1 %v8662_v29 }
 0x463   :  { %7987 = vmatmul.mubr.msk.f32.vlgmr.msra.gmra.mrb[24].mxu1 %vm127_vm0, %v2087_v15  ;;  %8009 = vmatprep.subr.mxu0 %v8662_v29 }
 0x464   :  { %8002 = vmatmul.mubr.msk.f32.vlgmr.msra.gmra.mrb[24].mxu0 %vm127_vm0, %v2312_v16  ;;  %7995 = vmatpush3.xpose.msk.msra.mxu1 %vm127_vm0, %v8829_v59 }
 0x465   :  { %7996 = vmatprep.mubr.msk.f32.mxu1 %vm8664_vm11, %v8662_v29  ;;  %8004 = vmatprep.subr.mxu1 %v8662_v29 }
 0x466   :  { %8011 = vmatprep.mubr.msk.f32.mxu0 %vm8664_vm11, %v8662_v29 }
 0x467   :  { %7997 = vmatmul.mubr.msk.f32.vlgmr.msra.gmra.mrb[26].mxu1 %vm127_vm0, %v2237_v17 }
 0x468   :  { %8005 = vmatpush3.xpose.msk.msra.mxu1 %vm127_vm0, %v8829_v59  ;;  %8006 = vmatprep.mubr.msk.f32.mxu1 %vm8664_vm11, %v8662_v29 }
 0x469   :  { %8014 = vmatprep.subr.mxu1 %v8662_v29 }
 0x46b   :  { %8007 = vmatmul.mubr.msk.f32.vlgmr.msra.gmra.mrb[28].mxu1 %vm127_vm0, %v2387_v18 }
 0x46c   :  { %8016 = vmatprep.mubr.msk.f32.mxu1 %vm8664_vm11, %v8662_v29 }
 0x516   :  { %v1302_v20 = vpop.f32.mrb[10].mxu0 }
 0x517   :  { %v7933_v21 = vpop.f32.mrb[11].mxu0  ;;  %v1820_v25 = vmul.f32 %v1302_v20, %v8774_v35 }
 0x51b   :  { %v1451_v23 = vpop.f32.mrb[12].mxu0 }
 0x51c   :  { %v1822_v27 = vmul.f32 %v1451_v23, %v8789_v40  ;;  %v7943_v28 = vpop.f32.mrb[13].mxu0 }
 0x51e   :  { %v1828_v34 = vadd.f32 %v1822_v27, %v1820_v25 }
 0x51f   :  { %v1378_v30 = vpop.f32.mrb[14].mxu1 }
 0x520   :  { %v1597_v42 = vpop.f32.mrb[14].mxu0  ;;  %v7938_v45 = vpop.f32.mrb[15].mxu1  ;;  %v1821_v56 = vmul.f32 %v1378_v30, %v8774_v35 }
 0x521   :  { %v1824_v46 = vmul.f32 %v1597_v42, %v8777_v36  ;;  %v7953_v49 = vpop.f32.mrb[15].mxu0 }
 0x523   :  { %v1830_v53 = vadd.f32 %v1828_v34, %v1824_v46  ;;  %v1524_v54 = vpop.f32.mrb[16].mxu1 }
 0x524   :  { %v1823_v41 = vmul.f32 %v1524_v54, %v8789_v40  ;;  %v1743_v57 = vpop.f32.mrb[16].mxu0  ;;  %v7948_v58 = vpop.f32.mrb[17].mxu1 }
 0x525   :  { %v1826_v51 = vmul.f32 %v1743_v57, %v8786_v39  ;;  %v7963_v2 = vpop.f32.mrb[17].mxu0 }
 0x526   :  { %v1829_v4 = vadd.f32 %v1823_v41, %v1821_v56 }
 0x527   :  { %v9113_v0 = vadd.f32 %v1830_v53, %v1826_v51  ;;  %v1670_v6 = vpop.f32.mrb[18].mxu1 }
 0x528   :  { %v1825_v61 = vmul.f32 %v1670_v6, %v8777_v36  ;;  %v7958_v8 = vpop.f32.mrb[19].mxu1 }
 0x52a   :  { %v1831_v52 = vadd.f32 %v1829_v4, %v1825_v61 }
 0x52b   :  { %v1928_v11 = vpop.f32.mrb[18].mxu0  ;;  %v1816_v12 = vpop.f32.mrb[20].mxu1 }
 0x52c   :  { %v1929_v14 = vadd.f32 %v1928_v11, %v9118_v10  ;;  %v7973_v15 = vpop.f32.mrb[19].mxu0  ;;  %v1827_v16 = vmul.f32 %v1816_v12, %v8786_v39  ;;  %v7968_v17 = vpop.f32.mrb[21].mxu1 }
 0x52e   :  { %v9122_v18 = vadd.f32 %v1831_v52, %v1827_v16  ;;  %v2460_v20 = vsel %vm1141_vm12, %v1929_v14, -inf }
 0x52f   :  { %2461 = vmax.xlane.f32.xlu0 %v2460_v20  ;;  %v2081_v21 = vpop.f32.mrb[20].mxu0 }
 0x530   :  { %v2082_v23 = vadd.f32 %v2081_v21, %v9118_v10  ;;  %v7983_v25 = vpop.f32.mrb[21].mxu0 }
 0x532   :  { %v2006_v27 = vpop.f32.mrb[22].mxu1  ;;  %v2466_v28 = vsel %vm1141_vm12, %v2082_v23, -inf }
 0x533   :  { %v2007_v34 = vadd.f32 %v2006_v27, %v9126_v22  ;;  %2467 = vmax.xlane.f32.xlu0 %v2466_v28  ;;  %v2231_v30 = vpop.f32.mrb[22].mxu0  ;;  %v7978_v38 = vpop.f32.mrb[23].mxu1 }
 0x534   :  { %v7993_v42 = vpop.f32.mrb[23].mxu0  ;;  %v2232_v45 = vadd.f32 %v2231_v30, %v9118_v10 }
 0x535   :  { %v2463_v62 = vsel %vm1141_vm12, %v2007_v34, -inf }
 0x536   :  { %2464 = vmax.xlane.f32.xlu1 %v2463_v62  ;;  %v2156_v46 = vpop.f32.mrb[24].mxu1  ;;  %v2472_v58 = vsel %vm1141_vm12, %v2232_v45, -inf }
 0x537   :  { %v2157_v49 = vadd.f32 %v2156_v46, %v9126_v22  ;;  %v2381_v53 = vpop.f32.mrb[24].mxu0  ;;  %v7988_v54 = vpop.f32.mrb[25].mxu1 }
 0x538   :  { %v8003_v56 = vpop.f32.mrb[25].mxu0  ;;  %v2382_v41 = vadd.f32 %v2381_v53, %v9118_v10 }
 0x539   :  { %v2469_v57 = vsel %vm1141_vm12, %v2157_v49, -inf }
 0x53a   :  { %v2306_v60 = vpop.f32.mrb[26].mxu1  ;;  %2470 = vmax.xlane.f32.xlu0 %v2469_v57  ;;  %2473 = vmax.xlane.f32.xlu1 %v2472_v58  ;;  %v2478_v6 = vsel %vm1141_vm12, %v2382_v41, -inf }
 0x53b   :  { %v2307_v51 = vadd.f32 %v2306_v60, %v9126_v22  ;;  %v7998_v2 = vpop.f32.mrb[27].mxu1 }
 0x53d   :  { %v2475_v4 = vsel %vm1141_vm12, %v2307_v51, -inf }
 0x53e   :  { %v2456_v7 = vpop.f32.mrb[28].mxu1  ;;  %2476 = vmax.xlane.f32.xlu0 %v2475_v4  ;;  %2479 = vmax.xlane.f32.xlu1 %v2478_v6 }
 0x53f   :  { %v2457_v61 = vadd.f32 %v2456_v7, %v9126_v22  ;;  %v8008_v8 = vpop.f32.mrb[29].mxu1 }
 0x541   :  { %v2481_v52 = vsel %vm1141_vm12, %v2457_v61, -inf }
 0x542   :  { %2482 = vmax.xlane.f32.xlu0 %v2481_v52 }
 0x5bc   :  { %v2462_v11 = vpop.xlane.xlu0 %2461 }
 0x5bd   :  { %v2484_v12 = vsub.f32 %v1929_v14, %v2462_v11 }
 0x5bf   :  { %v2492_v13 = vmul.f32 1.442695, %v2484_v12 }
 0x5c0   :  { %v2468_v15 = vpop.xlane.xlu0 %2467 }
 0x5c1   :  { %8528 = vpow2.f32 %v2492_v13  ;;  %v2486_v16 = vsub.f32 %v2082_v23, %v2468_v15 }
 0x5c3   :  { %v2496_v17 = vmul.f32 1.442695, %v2486_v16  ;;  %v2465_v20 = vpop.xlane.xlu1 %2464 }
 0x5c4   :  { %v2485_v21 = vsub.f32 %v2007_v34, %v2465_v20 }
 0x5c5   :  { %8530 = vpow2.f32 %v2496_v17 }
 0x5c6   :  { %v2494_v25 = vmul.f32 1.442695, %v2485_v21 }
 0x5c7   :  { %v2474_v27 = vpop.xlane.xlu1 %2473  ;;  %v2471_v28 = vpop.xlane.xlu0 %2470 }
 0x5c8   :  { %8532 = vpow2.f32 %v2494_v25  ;;  %v2488_v30 = vsub.f32 %v2232_v45, %v2474_v27  ;;  %v2487_v38 = vsub.f32 %v2157_v49, %v2471_v28 }
 0x5ca   :  { %v2500_v42 = vmul.f32 1.442695, %v2488_v30  ;;  %v2498_v62 = vmul.f32 1.442695, %v2487_v38 }
 0x5cb   :  { %v8529_v46 = vpop.eup %8528  ;;  %v2480_v53 = vpop.xlane.xlu1 %2479 }
 0x5cc   :  { %v2477_v54 = vpop.xlane.xlu0 %2476  ;;  %8534 = vpow2.f32 %v2500_v42  ;;  %v2490_v14 = vsub.f32 %v2382_v41, %v2480_v53  ;;  %v2508_v23 = vsel %vm1141_vm12, %v8529_v46, 0.0 }
 0x5cd   :  { %v2489_v56 = vsub.f32 %v2307_v51, %v2477_v54  ;;  %8536 = vpow2.f32 %v2498_v62  ;;  %2509 = vadd.xlane.f32.xlu1 %v2508_v23  ;;  %v3156_v23 = vld [vmem:[%s9850_s4 + $0x1d8] sm:$0xff] }
 0x5ce   :  { %v2504_v34 = vmul.f32 1.442695, %v2490_v14 }
 0x5cf   :  { %v2502_v57 = vmul.f32 1.442695, %v2489_v56  ;;  %v8531_v58 = vpop.eup %8530 }
 0x5d0   :  { %v2483_v60 = vpop.xlane.xlu0 %2482  ;;  %8538 = vpow2.f32 %v2504_v34  ;;  %v2514_v45 = vsel %vm1141_vm12, %v8531_v58, 0.0  ;;  %v3157_v34 = vld [vmem:[%s9850_s4 + $0x1e0] sm:$0xff] }
 0x5d1   :  { %v2491_v2 = vsub.f32 %v2457_v61, %v2483_v60  ;;  %8540 = vpow2.f32 %v2502_v57  ;;  %2515 = vadd.xlane.f32.xlu1 %v2514_v45  ;;  %v8402_v45 = vpack.c.bf16 %v3157_v34, %v3156_v23 }
 0x5d2   :  { %v8533_v49 = vpop.eup %8532 }
 0x5d3   :  { %v2506_v4 = vmul.f32 1.442695, %v2491_v2  ;;  %v2511_v6 = vsel %vm1141_vm12, %v8533_v49, 0.0 }
 0x5d4   :  { %2512 = vadd.xlane.f32.xlu0 %v2511_v6 }
 0x5d5   :  { %8542 = vpow2.f32 %v2506_v4  ;;  %v3159_v4 = vld [vmem:[%s9850_s4 + $0x1f0] sm:$0xff] }
 0x5d6   :  { %v8535_v41 = vpop.eup %8534 }
 0x5d7   :  { %v8537_v51 = vpop.eup %8536  ;;  %v2520_v7 = vsel %vm1141_vm12, %v8535_v41, 0.0 }
 0x5d8   :  { %2521 = vadd.xlane.f32.xlu1 %v2520_v7  ;;  %v2517_v8 = vsel %vm1141_vm12, %v8537_v51, 0.0 }
 0x5d9   :  { %2518 = vadd.xlane.f32.xlu0 %v2517_v8  ;;  %v3152_v8 = vld [vmem:[%s9850_s4 + $0x1b8] sm:$0xff] }
 0x5da   :  { %v9147_v52 = vpop.eup %8538 }
 0x5db   :  { %v9149_v61 = vpop.eup %8540  ;;  %v2526_v11 = vsel %vm1141_vm12, %v9147_v52, 0.0 }
 0x5dc   :  { %2527 = vadd.xlane.f32.xlu1 %v2526_v11  ;;  %v2523_v12 = vsel %vm1141_vm12, %v9149_v61, 0.0 }
 0x5dd   :  { %2524 = vadd.xlane.f32.xlu0 %v2523_v12  ;;  %v3154_v12 = vld [vmem:[%s9850_s4 + $0x1c8] sm:$0xff] }
 0x5df   :  { %v9155_v13 = vpop.eup %8542 }
 0x5e0   :  { %v2529_v15 = vsel %vm1141_vm12, %v9155_v13, 0.0 }
 0x5e1   :  { %2530 = vadd.xlane.f32.xlu0 %v2529_v15  ;;  %v3155_v15 = vld [vmem:[%s9850_s4 + $0x1d0] sm:$0xff] }
 0x5ed   :  { %2548 = vrot.lane.b32.xlu1 %v8833_v63, %s8667_s18 }
 0x5f7   :  { %2624 = vrot.lane.b32.xlu0 %v8829_v59, %s8667_s18 }
 0x65a   :  { %v2510_v16 = vpop.xlane.xlu1 %2509 }
 0x65b   :  { %8544 = vrcp.f32 %v2510_v16 }
 0x65e   :  { %v2516_v17 = vpop.xlane.xlu1 %2515 }
 0x65f   :  { %8546 = vrcp.f32 %v2516_v17 }
 0x661   :  { %v2513_v20 = vpop.xlane.xlu0 %2512 }
 0x662   :  { %8548 = vrcp.f32 %v2513_v20  ;;  %v3329_v20 = vld [vmem:[%s9850_s4 + $0x200] sm:$0xff] }
 0x665   :  { %v2522_v21 = vpop.xlane.xlu1 %2521  ;;  %v8545_v28 = vpop.eup %8544 }
 0x666   :  { %v2519_v25 = vpop.xlane.xlu0 %2518  ;;  %8550 = vrcp.f32 %v2522_v21  ;;  %v2540_v38 = vmul.f32 %v8545_v28, %v8529_v46  ;;  %v3330_v21 = vld [vmem:[%s9850_s4 + $0x208] sm:$0xff] }
 0x667   :  { %8552 = vrcp.f32 %v2519_v25  ;;  %v8426_v25 = vpack.c.bf16 %v3330_v21, %v3329_v20 }
 0x669   :  { %v2528_v27 = vpop.xlane.xlu1 %2527  ;;  %v8547_v42 = vpop.eup %8546 }
 0x66a   :  { %v2525_v30 = vpop.xlane.xlu0 %2524  ;;  %8554 = vrcp.f32 %v2528_v27  ;;  %v2542_v53 = vmul.f32 %v8547_v42, %v8531_v58  ;;  %v86_v27 = vsel %vm85_vm13, %v9096_v19, 0.0 }
 0x66b   :  { %8556 = vrcp.f32 %v2525_v30  ;;  %87 = vadd.xlane.f32.xlu0 %v86_v27  ;;  %v3812_v27 = vld [vmem:[%s9850_s4 + $0xf0] sm:$0xff] }
 0x66c   :  { %v8549_v59 = vpop.eup %8548 }
 0x66d   :  { %v2549_v63 = vpop.permute.xlu1 %2548  ;;  %v2541_v46 = vmul.f32 %v8549_v59, %v8533_v49  ;;  %v3158_v49 = vld [vmem:[%s9850_s4 + $0x1e8] sm:$0xff] }
 0x66e   :  { %v2531_v62 = vpop.xlane.xlu0 %2530  ;;  %8010 = vmatpush3.msra.mxu0 %v2549_v63  ;;  %v8406_v7 = vpack.c.bf16 %v3159_v4, %v3158_v49 }
 0x66f   :  { %8012 = vmatmul.mubr.msk.f32.vlgmr.msra.gmra.mrb[26].mxu0 %vm1141_vm12, %v2540_v38  ;;  %8019 = vmatprep.subr.mxu0 %v8662_v29  ;;  %8558 = vrcp.f32 %v2531_v62 }
 0x670   :  { %8020 = vmatpush3.msra.mxu0 %v2549_v63  ;;  %8021 = vmatprep.mubr.msk.f32.mxu0 %vm8664_vm11, %v8662_v29  ;;  %v8551_v54 = vpop.eup %8550 }
 0x671   :  { %8029 = vmatprep.subr.mxu0 %v8662_v29  ;;  %v8553_v56 = vpop.eup %8552  ;;  %v2544_v58 = vmul.f32 %v8551_v54, %v8535_v41 }
 0x672   :  { %v2625_v14 = vpop.permute.xlu0 %2624  ;;  %v2543_v60 = vmul.f32 %v8553_v56, %v8537_v51 }
 0x673   :  { %8015 = vmatpush3.msra.mxu1 %v2625_v14  ;;  %8022 = vmatmul.mubr.msk.f32.vlgmr.msra.gmra.mrb[28].mxu0 %vm1141_vm12, %v2542_v53 }
 0x674   :  { %8017 = vmatmul.mubr.msk.f32.vlgmr.msra.gmra.mrb[30].mxu1 %vm1141_vm12, %v2541_v46  ;;  %8024 = vmatprep.subr.mxu1 %v8662_v29  ;;  %v8555_v57 = vpop.eup %8554 }
 0x675   :  { %8030 = vmatpush3.msra.mxu0 %v2549_v63  ;;  %8025 = vmatpush3.msra.mxu1 %v2625_v14  ;;  %v8557_v2 = vpop.eup %8556  ;;  %v2546_v6 = vmul.f32 %v8555_v57, %v9147_v52  ;;  %v3153_v52 = vld [vmem:[%s9850_s4 + $0x1c0] sm:$0xff] }
 0x676   :  { %8026 = vmatprep.mubr.msk.f32.mxu1 %vm8664_vm11, %v8662_v29  ;;  %8031 = vmatprep.mubr.msk.f32.mxu0 %vm8664_vm11, %v8662_v29  ;;  %v2545_v41 = vmul.f32 %v8557_v2, %v9149_v61  ;;  %v8410_v11 = vpack.c.bf16 %v3153_v52, %v3152_v8  ;;  %v3331_v52 = vld [vmem:[%s9850_s4 + $0x210] sm:$0xff] }
 0x677   :  { %8034 = vmatprep.subr.mxu1 %v8662_v29  ;;  %8039 = vmatprep.subr.mxu0 %v8662_v29 }
 0x678   :  { %8027 = vmatmul.mubr.msk.f32.vlgmr.msra.gmra.mrb[32].mxu1 %vm1141_vm12, %v2543_v60  ;;  %8032 = vmatmul.mubr.msk.f32.vlgmr.msra.gmra.mrb[30].mxu0 %vm1141_vm12, %v2544_v58 }
 0x679   :  { %8035 = vmatpush3.msra.mxu1 %v2625_v14  ;;  %8040 = vmatpush3.msra.mxu0 %v2549_v63  ;;  %v8559_v51 = vpop.eup %8558 }
 0x67a   :  { %8036 = vmatprep.mubr.msk.f32.mxu1 %vm8664_vm11, %v8662_v29  ;;  %8041 = vmatprep.mubr.msk.f32.mxu0 %vm8664_vm11, %v8662_v29  ;;  %v2547_v61 = vmul.f32 %v8559_v51, %v9155_v13  ;;  %v8414_v13 = vpack.c.bf16 %v3155_v15, %v3154_v12 }
 0x67b   :  { %8044 = vmatprep.subr.mxu1 %v8662_v29  ;;  %8403 = vmatprep.subr.bf16.mxu0 %v8402_v45 }
 0x67c   :  { %8037 = vmatmul.mubr.msk.f32.vlgmr.msra.gmra.mrb[34].mxu1 %vm1141_vm12, %v2545_v41  ;;  %8042 = vmatmul.mubr.msk.f32.vlgmr.msra.gmra.mrb[32].mxu0 %vm1141_vm12, %v2546_v6 }
 0x67d   :  { %8045 = vmatpush3.msra.mxu1 %v2625_v14  ;;  %8405 = vmatpush3.bf16.msra.mxu0 %v8402_v45 }
 0x67e   :  { %8057 = vmatprep.mubr.msk.f32.mxu0 %vm127_vm0, %v9113_v0  ;;  %8046 = vmatprep.mubr.msk.f32.mxu1 %vm8664_vm11, %v8662_v29  ;;  %v3333_v0 = vld [vmem:[%s9850_s4 + $0x220] sm:$0xff] }
 0x67f   :  { %8407 = vmatprep.subr.bf16.mxu0 %v8406_v7 }
 0x680   :  { %8047 = vmatmul.mubr.msk.f32.vlgmr.msra.gmra.mrb[36].mxu1 %vm1141_vm12, %v2547_v61  ;;  %v3332_v61 = vld [vmem:[%s9850_s4 + $0x218] sm:$0xff] }
 0x681   :  { %8409 = vmatpush3.bf16.msra.mxu0 %v8406_v7 }
 0x682   :  { %8411 = vmatprep.subr.bf16.mxu0 %v8410_v11 }
 0x684   :  { %8058 = vmatmul.mubr.msk.f32.vlgmr.msra.gmra.mrb[34].mxu0 %vm127_vm0, %v9122_v18  ;;  %v3334_v18 = vld [vmem:[%s9850_s4 + $0x228] sm:$0xff] }
 0x685   :  { %8413 = vmatpush3.bf16.msra.mxu0 %v8410_v11  ;;  %8068 = vmatprep.mubr.msk.f32.mxu0 %vm127_vm0, %v8805_v48  ;;  %v8418_v16 = vpack.c.bf16 %v3334_v18, %v3333_v0  ;;  %v3335_v48 = vld [vmem:[%s9850_s4 + $0x230] sm:$0xff]  ;;  %v7532_v0 = vld [vmem:[%s9850_s4 + $0x1f8] ss:$0 sm:$0xff] }
 0x686   :  { %8415 = vmatprep.subr.bf16.mxu0 %v8414_v13 }
 0x687   :  { %8419 = vmatprep.subr.bf16.mxu1 %v8418_v16 }
 0x688   :  { %8421 = vmatpush3.bf16.msra.mxu1 %v8418_v16 }
 0x689   :  { %8417 = vmatpush3.bf16.msra.mxu0 %v8414_v13  ;;  %v8430_v13 = vpack.c.bf16 %v3332_v61, %v3331_v52 }
 0x68a   :  { %8093 = vmatprep.subr.mxu0 %v8662_v29 }
 0x68c   :  { %8069 = vmatmul.mubr.msk.f32.vlgmr.msra.gmra.mrb[34].mxu0 %vm127_vm0, %v8801_v44  ;;  %v3336_v44 = vld [vmem:[%s9850_s4 + $0x238] sm:$0xff] }
 0x68d   :  { %8095 = vmatprep.mubr.msk.f32.mxu0 %vm8664_vm11, %v8662_v29  ;;  %v8422_v17 = vpack.c.bf16 %v3336_v44, %v3335_v48 }
 0x68f   :  { %8423 = vmatprep.subr.bf16.mxu1 %v8422_v17 }
 0x690   :  { %8425 = vmatpush3.bf16.msra.mxu1 %v8422_v17 }
 0x691   :  { %8427 = vmatprep.subr.bf16.mxu1 %v8426_v25 }
 0x6f8   :  { %v88_v17 = vpop.xlane.xlu0 %87 }
 0x6f9   :  { %v89_v20 = vmax.f32 %v88_v17, 1.0 }
 0x6fb   :  { %8560 = vrcp.f32 %v89_v20 }
 0x705   :  { %v9293_v21 = vpop.eup %8560 }
 0x742   :  { %v2620_v28 = vpop.f32.mrb[26].mxu0 }
 0x743   :  { %v8013_v30 = vpop.f32.mrb[27].mxu0  ;;  %v3138_v63 = vmul.f32 %v2620_v28, %v8774_v35  ;;  %v3813_v28 = vld [vmem:[%s9850_s4 + $0xf8] sm:$0xff] }
 0x746   :  { %v2769_v38 = vpop.f32.mrb[28].mxu0 }
 0x747   :  { %v2696_v42 = vpop.f32.mrb[30].mxu1  ;;  %v3140_v62 = vmul.f32 %v2769_v38, %v8789_v40  ;;  %v8023_v59 = vpop.f32.mrb[29].mxu0 }
 0x748   :  { %v8018_v53 = vpop.f32.mrb[31].mxu1  ;;  %v3139_v56 = vmul.f32 %v2696_v42, %v8774_v35  ;;  %v3653_v42 = vrot.slane %v9293_v21, 1  ;;  %v8435_v59 = vpack.c.bf16 %v3813_v28, %v3812_v27 }
 0x749   :  { %v3146_v54 = vadd.f32 %v3140_v62, %v3138_v63  ;;  %v3814_v53 = vld [vmem:[%s9850_s4 + $0x100] sm:$0xff] }
 0x74b   :  { %v2842_v46 = vpop.f32.mrb[32].mxu1  ;;  %v2915_v14 = vpop.f32.mrb[30].mxu0 }
 0x74c   :  { %v3141_v23 = vmul.f32 %v2842_v46, %v8789_v40  ;;  %v3142_v19 = vmul.f32 %v2915_v14, %v8777_v36  ;;  %v8028_v34 = vpop.f32.mrb[33].mxu1  ;;  %v8033_v57 = vpop.f32.mrb[31].mxu0 }
 0x74d   :  { %v8668_v34 = vmov 0.0|0.0  }
 0x74e   :  { %v3147_v58 = vadd.f32 %v3141_v23, %v3139_v56  ;;  %v3148_v60 = vadd.f32 %v3146_v54, %v3142_v19  ;;  %v3815_v54 = vld [vmem:[%s9850_s4 + $0x108] sm:$0xff]  ;;  %v4001_v56 = vld [vmem:[%s9850_s4 + $0x50] sm:$0xff]  ;;  %v4002_v23 = vld [vmem:[%s9850_s4 + $0x58] sm:$0xff] }
 0x74f   :  { %v2988_v2 = vpop.f32.mrb[34].mxu1  ;;  %v3061_v45 = vpop.f32.mrb[32].mxu0 }
 0x750   :  { %v3143_v49 = vmul.f32 %v2988_v2, %v8777_v36  ;;  %v3144_v4 = vmul.f32 %v3061_v45, %v8786_v39  ;;  %v8038_v6 = vpop.f32.mrb[35].mxu1  ;;  %v8043_v41 = vpop.f32.mrb[33].mxu0  ;;  %v8438_v2 = vpack.c.bf16 %v3815_v54, %v3814_v53 }
 0x751   :  { %v4003_v6 = vld [vmem:[%s9850_s4 + $0x60] sm:$0xff]  ;;  %v4004_v41 = vld [vmem:[%s9850_s4 + $0x68] sm:$0xff] }
 0x752   :  { %v3149_v51 = vadd.f32 %v3147_v58, %v3143_v49  ;;  %v3150_v7 = vadd.f32 %v3148_v60, %v3144_v4  ;;  %v8446_v4 = vpack.c.bf16 %v4002_v23, %v4001_v56  ;;  %v4139_v56 = vld [vmem:[%s9850_s4 + $0x90] sm:$0xff] }
 0x753   :  { %v3134_v8 = vpop.f32.mrb[36].mxu1 }
 0x754   :  { %v3145_v11 = vmul.f32 %v3134_v8, %v8786_v39  ;;  %v8048_v12 = vpop.f32.mrb[37].mxu1  ;;  %8079 = vmatprep.mubr.msk.f32.mxu1 %vm127_vm0, %v3150_v7  ;;  %v8450_v8 = vpack.c.bf16 %v4004_v41, %v4003_v6  ;;  %v7545_v41 = vld [vmem:[%s9850_s4 + $0x138] ss:$0 sm:$0xff] }
 0x755   :  { %v3908_v12 = vld [vmem:[%s9850_s4 + $0x120] sm:$0xff] }
 0x756   :  { %v3151_v15 = vadd.f32 %v3149_v51, %v3145_v11  ;;  %v3907_v11 = vld [vmem:[%s9850_s4 + $0x118] sm:$0xff] }
 0x758   :  { %8080 = vmatmul.mubr.msk.f32.vlgmr.msra.gmra.mrb[38].mxu1 %vm127_vm0, %v3151_v15  ;;  %v8441_v15 = vpack.c.bf16 %v3908_v12, %v3907_v11 }
 0x759   :  { %8429 = vmatpush3.bf16.msra.mxu1 %v8426_v25  ;;  %8090 = vmatprep.mubr.msk.f32.mxu1 %vm127_vm0, %v8807_v50  ;;  %v7537_v25 = vld [vmem:[%s9850_s4 + $0x240] ss:$0 sm:$0xff] }
 0x75a   :  { %8431 = vmatprep.subr.bf16.mxu1 %v8430_v13 }
 0x75d   :  { %8433 = vmatpush3.bf16.msra.mxu1 %v8430_v13  ;;  %v3909_v13 = vld [vmem:[%s9850_s4 + $0x128] sm:$0xff] }
 0x75e   :  { %8098 = vmatprep.subr.mxu1 %v8662_v29 }
 0x75f   :  { %v8070_v18 = vpop.f32.mrb[34].mxu0 }
 0x760   :  { %v9269_v16 = vadd.f32 %v8070_v18, %v7532_v0  ;;  %v3314_v48 = vpop.f32.mrb[35].mxu0  ;;  %8091 = vmatmul.mubr.msk.f32.vlgmr.msra.gmra.mrb[38].mxu1 %vm127_vm0, %v8803_v47  ;;  %v8636_v47 = vld [vmem:[%s9849_s3] sm:$0x3] }
 0x761   :  { %v9273_v44 = vadd.f32 %v7532_v0, %v3314_v48  ;;  %8100 = vmatprep.mubr.msk.f32.mxu1 %vm8664_vm11, %v8662_v29  ;;  %v91_v50 = vsel %vm85_vm13, %v8636_v47, 0.0  ;;  %v3910_v0 = vld [vmem:[%s9850_s4 + $0x130] sm:$0xff]  ;;  %v4136_v48 = vld [vmem:[%s9850_s4 + $0x78] sm:$0xff]  ;;  %v4137_v47 = vld [vmem:[%s9850_s4 + $0x80] sm:$0xff] }
 0x762   :  { %8099 = vmatpush3.msra.mxu1 %v9269_v16  ;;  %92 = vadd.xlane.f32.xlu1 %v91_v50  ;;  %v4000_v61 = vmax.f32 %v9269_v16, 0.0  ;;  %v8444_v18 = vpack.c.bf16 %v3910_v0, %v3909_v13  ;;  %v8454_v50 = vpack.c.bf16 %v4137_v47, %v4136_v48  ;;  %v7548_v48 = vld [vmem:[%s9850_s4 + $0x70] ss:$0 sm:$0xff] }
 0x763   :  { %8094 = vmatpush3.msra.mxu0 %v9273_v44  ;;  %8108 = vmatprep.subr.mxu1 %v8662_v29  ;;  %v3999_v52 = vmax.f32 %v9273_v44, 0.0 }
 0x764   :  { %8101 = vmatmul.mubr.msk.f32.vlgmr.msra.gmra.mrb[40].mxu1 %vm1141_vm12, %v9108_v1  ;;  %8096 = vmatmul.mubr.msk.f32.vlgmr.msra.gmra.mrb[36].mxu0 %vm1141_vm12, %v9103_v33 }
 0x765   :  { %8103 = vmatprep.subr.mxu0 %v8662_v29  ;;  %8110 = vmatprep.mubr.msk.f32.mxu1 %vm8664_vm11, %v8662_v29 }
 0x766   :  { %8105 = vmatprep.mubr.msk.f32.mxu0 %vm8664_vm11, %v8662_v29 }
 0x7ef   :  { %v93_v17 = vpop.xlane.xlu1 %92 }
 0x7f0   :  { %v94_v20 = vmax.f32 %v93_v17, 1.0 }
 0x7f2   :  { %8562 = vrcp.f32 %v94_v20 }
 0x833   :  { %v8092_v30 = vpop.f32.mrb[38].mxu1 }
 0x834   :  { %v9304_v38 = vadd.f32 %v8092_v30, %v7537_v25  ;;  %v3491_v63 = vpop.f32.mrb[39].mxu1 }
 0x835   :  { %v9307_v62 = vadd.f32 %v7537_v25, %v3491_v63  ;;  %v9371_v25 = vpop.eup %8562 }
 0x836   :  { %8109 = vmatpush3.msra.mxu1 %v9304_v38  ;;  %v3805_v27 = vrot.slane %v9371_v25, 1 }
 0x837   :  { %8104 = vmatpush3.msra.mxu0 %v9307_v62  ;;  %8111 = vmatmul.mubr.msk.f32.vlgmr.msra.gmra.mrb[42].mxu1 %vm1141_vm12, %v8926_v31  ;;  %v3646_v46 = vpop.f32.mrb[40].mxu1  ;;  %v3574_v14 = vpop.f32.mrb[36].mxu0 }
 0x838   :  { %v3657_v19 = vmul.f32 %v3653_v42, %v3646_v46  ;;  %8106 = vmatmul.mubr.msk.f32.vlgmr.msra.gmra.mrb[38].mxu0 %vm1141_vm12, %v8922_v26  ;;  %8434 = vmatprep.subr.bf16.mxu0 %v8668_v34  ;;  %v3656_v57 = vmul.f32 %v9293_v21, %v3574_v14  ;;  %v8102_v58 = vpop.f32.mrb[41].mxu1  ;;  %v8097_v60 = vpop.f32.mrb[37].mxu0  ;;  %v4138_v14 = vld [vmem:[%s9850_s4 + $0x88] sm:$0xff] }
 0x839   :  { %8436 = vmatpush3.bf16.msra.mxu0 %v8435_v59  ;;  %8121 = vmatprep.mubr.msk.f32.mxu0 %vm8664_vm11, %v8662_v29  ;;  %v4134_v58 = vmax.f32 %v9307_v62, 0.0 }
 0x83a   :  { %v3811_v45 = vmax.f32 %v3657_v19, 0.0  ;;  %v3810_v49 = vmax.f32 %v3656_v57, 0.0  ;;  %8437 = vmatprep.subr.bf16.mxu0 %v8668_v34  ;;  %8440 = vmatprep.subr.bf16.mxu1 %v8668_v34  ;;  %v8458_v57 = vpack.c.bf16 %v4139_v56, %v4138_v14 }
 0x83b   :  { %8132 = vmatprep.mubr.msk.f32.mxu1 %vm8664_vm11, %v8662_v29  ;;  %8442 = vmatpush3.bf16.msra.mxu1 %v8441_v15 }
 0x83c   :  { %v3823_v51 = vrot.slane %v3811_v45, 7  ;;  %8443 = vmatprep.subr.bf16.mxu1 %v8668_v34 }
 0x83d   :  { %8439 = vmatpush3.bf16.msra.mxu0 %v8438_v2 }
 0x83e   :  { %v3825_v7 = vsel %vm3824_vm14, %v3823_v51, %v3810_v49  ;;  %8447 = vmatprep.subr.bf16.mxu0 %v8446_v4  ;;  %v4135_v49 = vmax.f32 %v9304_v38, 0.0 }
 0x83f   :  { %8445 = vmatpush3.bf16.msra.mxu1 %v8444_v18 }
 0x840   :  { %8122 = vmatmul.mubr.msk.f32.vlgmr.msra.gmra.mrb[40].mxu0 %vm127_vm0, %v3825_v7  ;;  %8455 = vmatprep.subr.bf16.mxu1 %v8454_v50 }
 0x841   :  { %8449 = vmatpush3.bf16.msra.mxu0 %v8446_v4  ;;  %8143 = vmatprep.mubr.msk.f32.mxu0 %vm127_vm0, %v3999_v52 }
 0x842   :  { %8451 = vmatprep.subr.bf16.mxu0 %v8450_v8 }
 0x845   :  { %8453 = vmatpush3.bf16.msra.mxu0 %v8450_v8 }
 0x846   :  { %8157 = vmatprep.subr.mxu0 %v8662_v29 }
 0x848   :  { %8144 = vmatmul.mubr.msk.f32.vlgmr.msra.gmra.mrb[42].mxu0 %vm127_vm0, %v4000_v61 }
 0x849   :  { %8159 = vmatprep.mubr.msk.f32.mxu0 %vm8664_vm11, %v8662_v29 }
 0x90a   :  { %v3798_v28 = vpop.f32.mrb[42].mxu1 }
 0x90b   :  { %v3809_v30 = vmul.f32 %v3805_v27, %v3798_v28  ;;  %v3726_v63 = vpop.f32.mrb[38].mxu0  ;;  %v8112_v59 = vpop.f32.mrb[43].mxu1 }
 0x90c   :  { %v3808_v53 = vmul.f32 %v9371_v25, %v3726_v63  ;;  %v8107_v54 = vpop.f32.mrb[39].mxu0 }
 0x90d   :  { %v3906_v46 = vmax.f32 %v3809_v30, 0.0 }
 0x90e   :  { %v3905_v23 = vmax.f32 %v3808_v53, 0.0 }
 0x90f   :  { %v3918_v19 = vrot.slane %v3906_v46, 7 }
 0x911   :  { %v3919_v60 = vsel %vm3824_vm14, %v3918_v19, %v3905_v23 }
 0x912   :  { %8133 = vmatmul.mubr.msk.f32.vlgmr.msra.gmra.mrb[44].mxu1 %vm127_vm0, %v3919_v60 }
 0x913   :  { %8457 = vmatpush3.bf16.msra.mxu1 %v8454_v50  ;;  %8154 = vmatprep.mubr.msk.f32.mxu1 %vm127_vm0, %v4134_v58  ;;  %v9387_v2 = vpop.f32.mrb[40].mxu0 }
 0x914   :  { %8459 = vmatprep.subr.bf16.mxu1 %v8458_v57  ;;  %v8123_v45 = vpop.f32.mrb[41].mxu0 }
 0x917   :  { %8461 = vmatpush3.bf16.msra.mxu1 %v8458_v57 }
 0x918   :  { %8162 = vmatprep.subr.mxu1 %v8662_v29 }
 0x91a   :  { %8155 = vmatmul.mubr.msk.f32.vlgmr.msra.gmra.mrb[46].mxu1 %vm127_vm0, %v4135_v49 }
 0x91b   :  { %v8145_v4 = vpop.f32.mrb[42].mxu0  ;;  %8164 = vmatprep.mubr.msk.f32.mxu1 %vm8664_vm11, %v8662_v29 }
 0x91c   :  { %v4082_v6 = vpop.f32.mrb[43].mxu0  ;;  %v9410_v30 = vadd.f32 %v8145_v4, %v7548_v48 }
 0x91d   :  { %v9406_v17 = vadd.f32 %v7548_v48, %v4082_v6 }
 0x9e5   :  { %v3988_v51 = vpop.f32.mrb[44].mxu1 }
 0x9e6   :  { %v3989_v7 = vadd.f32 %v7545_v41, %v3988_v51  ;;  %v8134_v8 = vpop.f32.mrb[45].mxu1 }
 0x9e8   :  { %v7547_v52 = vmul.f32 -1.442695, %v3989_v7 }
 0x9ea   :  { %8564 = vpow2.f32 %v7547_v52 }
 0x9ed   :  { %v9397_v61 = vpop.f32.mrb[46].mxu1 }
 0x9ee   :  { %v9399_v11 = vpop.f32.mrb[47].mxu1 }
 0x9f4   :  { %v8565_v12 = vpop.eup %8564 }
 0x9f5   :  { %v3995_v15 = vadd.f32 1.0, %v8565_v12 }
 0x9f7   :  { %8566 = vrcp.f32 %v3995_v15 }
 0xa01   :  { %v8567_v13 = vpop.eup %8566 }
 0xa02   :  { %v3998_v0 = vadd.f32 1.0, %v8567_v13  ;;  %v7542_v13 = vld [vmem:[%s9850_s4 + $0x110] ss:$0 sm:$0xff] }
 0xa04   :  { %v4098_v18 = vrot.slane %v3998_v0, %v8916_v24  ;;  %v3895_v0 = vadd.f32 %v7542_v13, %v9387_v2 }
 0xa06   :  { %v4106_v47 = vrot.slane %v4098_v18, %v8916_v24  ;;  %v4099_v50 = vcombine.high %v4098_v18, %v4098_v18  ;;  %v7544_v18 = vmul.f32 -1.442695, %v3895_v0 }
 0xa08   :  { %v4117_v20 = vrot.slane %v4106_v47, %v8769_v32  ;;  %v4113_v28 = vrot.slane %v4099_v50, %v8916_v24  ;;  %8568 = vpow2.f32 %v7544_v18 }
 0xa0a   :  { %4126 = vrot.lane.b32.xlu1 %v4117_v20, %s8663_s6  ;;  %v4124_v63 = vmul.f32 %v4117_v20, %v9406_v17  ;;  %v4121_v59 = vrot.slane %v4113_v28, %v8769_v32 }
 0xa0c   :  { %4128 = vrot.lane.b32.xlu0 %v4121_v59, %s8663_s6  ;;  %v4125_v53 = vmul.f32 %v4121_v59, %v9410_v30  ;;  %8158 = vmatpush3.xpose.msk.msra.mxu0 %vm127_vm0, %v4124_v63 }
 0xa0d   :  { %8167 = vmatprep.subr.mxu0 %v8662_v29 }
 0xa0e   :  { %8163 = vmatpush3.xpose.msk.msra.mxu1 %vm127_vm0, %v4125_v53 }
 0xa0f   :  { %8172 = vmatprep.subr.mxu1 %v8662_v29 }
 0xa12   :  { %v8569_v47 = vpop.eup %8568 }
 0xa7c   :  { %v4127_v54 = vpop.permute.xlu1 %4126 }
 0xa7d   :  { %v4132_v46 = vmul.f32 %v4127_v54, %v9406_v17 }
 0xa7e   :  { %v4129_v14 = vpop.permute.xlu0 %4128 }
 0xa7f   :  { %v4133_v56 = vmul.f32 %v4129_v14, %v9410_v30  ;;  %v4271_v23 = vmul.f32 %v4132_v46, %v8839_v3  ;;  %v4269_v19 = vmul.f32 %v4132_v46, %v8821_v55  ;;  %v4273_v57 = vmul.f32 %v4132_v46, %v8846_v5 }
 0xa80   :  { %v4275_v60 = vmul.f32 %v4132_v46, %v8861_v9 }
 0xa81   :  { %4434 = vrot.lane.b32.xlu0 %v4271_v23, %s8665_s15  ;;  %4278 = vrot.lane.b32.xlu1 %v4269_v19, %s8665_s15  ;;  %v4270_v58 = vmul.f32 %v4133_v56, %v8821_v55  ;;  %v4272_v45 = vmul.f32 %v4133_v56, %v8839_v3  ;;  %v4274_v49 = vmul.f32 %v4133_v56, %v8846_v5 }
 0xa82   :  { %v4276_v4 = vmul.f32 %v4133_v56, %v8861_v9 }
 0xa85   :  { %4584 = vrot.lane.b32.xlu0 %v4273_v57, %s8665_s15  ;;  %4356 = vrot.lane.b32.xlu1 %v4270_v58, %s8665_s15 }
 0xa89   :  { %4734 = vrot.lane.b32.xlu0 %v4275_v60, %s8665_s15  ;;  %4509 = vrot.lane.b32.xlu1 %v4272_v45, %s8665_s15 }
 0xa8d   :  { %4659 = vrot.lane.b32.xlu1 %v4274_v49, %s8665_s15 }
 0xa91   :  { %4809 = vrot.lane.b32.xlu1 %v4276_v4, %s8665_s15 }
 0xaf3   :  { %v4279_v6 = vpop.permute.xlu1 %4278  ;;  %v4435_v41 = vpop.permute.xlu0 %4434 }
 0xaf4   :  { %8160 = vmatmul.mubr.msk.f32.vlgmr.msra.gmra.mrb[44].mxu0 %vm127_vm0, %v4279_v6 }
 0xaf5   :  { %8168 = vmatpush3.xpose.msk.msra.mxu0 %vm127_vm0, %v4124_v63  ;;  %8169 = vmatprep.mubr.msk.f32.mxu0 %vm8664_vm11, %v8662_v29 }
 0xaf6   :  { %8177 = vmatprep.subr.mxu0 %v8662_v29 }
 0xaf7   :  { %v4357_v51 = vpop.permute.xlu1 %4356  ;;  %v4585_v7 = vpop.permute.xlu0 %4584 }
 0xaf8   :  { %8165 = vmatmul.mubr.msk.f32.vlgmr.msra.gmra.mrb[48].mxu1 %vm127_vm0, %v4357_v51  ;;  %8170 = vmatmul.mubr.msk.f32.vlgmr.msra.gmra.mrb[46].mxu0 %vm127_vm0, %v4435_v41 }
 0xaf9   :  { %8173 = vmatpush3.xpose.msk.msra.mxu1 %vm127_vm0, %v4125_v53  ;;  %8178 = vmatpush3.xpose.msk.msra.mxu0 %vm127_vm0, %v4124_v63 }
 0xafa   :  { %8174 = vmatprep.mubr.msk.f32.mxu1 %vm8664_vm11, %v8662_v29  ;;  %8182 = vmatprep.subr.mxu1 %v8662_v29 }
 0xafb   :  { %v4510_v8 = vpop.permute.xlu1 %4509  ;;  %8179 = vmatprep.mubr.msk.f32.mxu0 %vm8664_vm11, %v8662_v29  ;;  %8187 = vmatprep.subr.mxu0 %v8662_v29  ;;  %v4735_v52 = vpop.permute.xlu0 %4734 }
 0xafc   :  { %8175 = vmatmul.mubr.msk.f32.vlgmr.msra.gmra.mrb[50].mxu1 %vm127_vm0, %v4510_v8  ;;  %8180 = vmatmul.mubr.msk.f32.vlgmr.msra.gmra.mrb[48].mxu0 %vm127_vm0, %v4585_v7 }
 0xafd   :  { %8183 = vmatpush3.xpose.msk.msra.mxu1 %vm127_vm0, %v4125_v53  ;;  %8188 = vmatpush3.xpose.msk.msra.mxu0 %vm127_vm0, %v4124_v63  ;;  %v3901_v63 = vadd.f32 1.0, %v8569_v47 }
 0xafe   :  { %8184 = vmatprep.mubr.msk.f32.mxu1 %vm8664_vm11, %v8662_v29  ;;  %8192 = vmatprep.subr.mxu1 %v8662_v29 }
 0xaff   :  { %v4660_v12 = vpop.permute.xlu1 %4659  ;;  %8189 = vmatprep.mubr.msk.f32.mxu0 %vm8664_vm11, %v8662_v29  ;;  %8197 = vmatprep.subr.mxu0 %v8662_v29  ;;  %8570 = vrcp.f32 %v3901_v63 }
 0xb00   :  { %8185 = vmatmul.mubr.msk.f32.vlgmr.msra.gmra.mrb[52].mxu1 %vm127_vm0, %v4660_v12  ;;  %8190 = vmatmul.mubr.msk.f32.vlgmr.msra.gmra.mrb[50].mxu0 %vm127_vm0, %v4735_v52 }
 0xb01   :  { %8193 = vmatpush3.xpose.msk.msra.mxu1 %vm127_vm0, %v4125_v53  ;;  %8194 = vmatprep.mubr.msk.f32.mxu1 %vm8664_vm11, %v8662_v29 }
 0xb02   :  { %8199 = vmatprep.mubr.msk.f32.mxu0 %vm8664_vm11, %v8662_v29  ;;  %8202 = vmatprep.subr.mxu1 %v8662_v29 }
 0xb03   :  { %v4810_v15 = vpop.permute.xlu1 %4809 }
 0xb04   :  { %8195 = vmatmul.mubr.msk.f32.vlgmr.msra.gmra.mrb[54].mxu1 %vm127_vm0, %v4810_v15 }
 0xb05   :  { %8204 = vmatprep.mubr.msk.f32.mxu1 %vm8664_vm11, %v8662_v29 }
 0xb09   :  { %v8571_v47 = vpop.eup %8570 }
 0xbc7   :  { %v4351_v48 = vpop.f32.mrb[44].mxu0 }
 0xbc8   :  { %v4352_v50 = vadd.f32 %v4351_v48, %v9118_v10  ;;  %v8161_v20 = vpop.f32.mrb[45].mxu0 }
 0xbca   :  { %v4883_v28 = vsel %vm1141_vm12, %v4352_v50, -inf }
 0xbcb   :  { %4884 = vmax.xlane.f32.xlu0 %v4883_v28  ;;  %v4429_v59 = vpop.f32.mrb[48].mxu1  ;;  %v4504_v53 = vpop.f32.mrb[46].mxu0  ;;  %v3904_v28 = vadd.f32 1.0, %v8571_v47 }
 0xbcc   :  { %v4430_v54 = vadd.f32 %v4429_v59, %v9126_v22  ;;  %v4505_v46 = vadd.f32 %v4504_v53, %v9118_v10  ;;  %v8166_v14 = vpop.f32.mrb[49].mxu1  ;;  %v8171_v56 = vpop.f32.mrb[47].mxu0 }
 0xbcd   :  { %v4233_v63 = vrot.slane %v3904_v28, %v8916_v24 }
 0xbce   :  { %v4886_v2 = vsel %vm1141_vm12, %v4430_v54, -inf  ;;  %v4889_v23 = vsel %vm1141_vm12, %v4505_v46, -inf }
 0xbcf   :  { %4887 = vmax.xlane.f32.xlu1 %v4886_v2  ;;  %v4579_v19 = vpop.f32.mrb[50].mxu1  ;;  %4890 = vmax.xlane.f32.xlu0 %v4889_v23  ;;  %v4654_v57 = vpop.f32.mrb[48].mxu0  ;;  %v4234_v53 = vcombine.high %v4233_v63, %v4233_v63 }
 0xbd0   :  { %v4580_v58 = vadd.f32 %v4579_v19, %v9126_v22  ;;  %v4655_v60 = vadd.f32 %v4654_v57, %v9118_v10  ;;  %v8176_v45 = vpop.f32.mrb[51].mxu1  ;;  %v8181_v49 = vpop.f32.mrb[49].mxu0 }
 0xbd1   :  { %v4248_v14 = vrot.slane %v4234_v53, %v8916_v24 }
 0xbd2   :  { %v4892_v4 = vsel %vm1141_vm12, %v4580_v58, -inf  ;;  %v4895_v6 = vsel %vm1141_vm12, %v4655_v60, -inf }
 0xbd3   :  { %v4729_v41 = vpop.f32.mrb[52].mxu1  ;;  %4893 = vmax.xlane.f32.xlu0 %v4892_v4  ;;  %4896 = vmax.xlane.f32.xlu1 %v4895_v6  ;;  %v4804_v51 = vpop.f32.mrb[50].mxu0 }
 0xbd4   :  { %v4730_v7 = vadd.f32 %v4729_v41, %v9126_v22  ;;  %v4805_v8 = vadd.f32 %v4804_v51, %v9118_v10  ;;  %v8186_v52 = vpop.f32.mrb[53].mxu1  ;;  %v8191_v12 = vpop.f32.mrb[51].mxu0  ;;  %v4241_v10 = vrot.slane %v4233_v63, %v8916_v24 }
 0xbd6   :  { %v4898_v15 = vsel %vm1141_vm12, %v4730_v7, -inf  ;;  %v4901_v13 = vsel %vm1141_vm12, %v4805_v8, -inf  ;;  %v9498_v59 = vrot.slane %v4241_v10, %v8769_v32 }
 0xbd7   :  { %v4879_v0 = vpop.f32.mrb[54].mxu1  ;;  %4899 = vmax.xlane.f32.xlu0 %v4898_v15  ;;  %4902 = vmax.xlane.f32.xlu1 %v4901_v13 }
 0xbd8   :  { %v4880_v18 = vadd.f32 %v4879_v0, %v9126_v22  ;;  %v8196_v48 = vpop.f32.mrb[55].mxu1  ;;  %v9506_v22 = vrot.slane %v4248_v14, %v8769_v32 }
 0xbda   :  { %v4904_v20 = vsel %vm1141_vm12, %v4880_v18, -inf }
 0xbdb   :  { %4905 = vmax.xlane.f32.xlu0 %v4904_v20 }
 0xbe8   :  { %4261 = vrot.lane.b32.xlu1 %v9498_v59, %s8663_s6 }
 0xbec   :  { %4972 = vrot.lane.b32.xlu1 %v9406_v17, %s8667_s18 }
 0xbf1   :  { %4263 = vrot.lane.b32.xlu0 %v9506_v22, %s8663_s6 }
 0xc58   :  { %v4885_v56 = vpop.xlane.xlu0 %4884 }
 0xc59   :  { %v4907_v2 = vsub.f32 %v4352_v50, %v4885_v56 }
 0xc5b   :  { %v4915_v23 = vmul.f32 1.442695, %v4907_v2 }
 0xc5c   :  { %v4888_v19 = vpop.xlane.xlu1 %4887  ;;  %v4891_v57 = vpop.xlane.xlu0 %4890 }
 0xc5d   :  { %8572 = vpow2.f32 %v4915_v23  ;;  %v4908_v45 = vsub.f32 %v4430_v54, %v4888_v19  ;;  %v4909_v49 = vsub.f32 %v4505_v46, %v4891_v57 }
 0xc5f   :  { %v4917_v4 = vmul.f32 1.442695, %v4908_v45  ;;  %v4919_v6 = vmul.f32 1.442695, %v4909_v49 }
 0xc60   :  { %v4897_v24 = vpop.xlane.xlu1 %4896  ;;  %v4894_v41 = vpop.xlane.xlu0 %4893 }
 0xc61   :  { %8574 = vpow2.f32 %v4917_v4  ;;  %v4911_v17 = vsub.f32 %v4655_v60, %v4897_v24  ;;  %v4910_v51 = vsub.f32 %v4580_v58, %v4894_v41  ;;  %v7551_v4 = vld [vmem:[%s9850_s4 + $0x98] ss:$0 sm:$0xff] }
 0xc62   :  { %8576 = vpow2.f32 %v4919_v6  ;;  %v9550_v6 = vadd.f32 %v7551_v4, %v9399_v11 }
 0xc63   :  { %v4923_v32 = vmul.f32 1.442695, %v4911_v17  ;;  %v4921_v52 = vmul.f32 1.442695, %v4910_v51  ;;  %v9554_v17 = vadd.f32 %v9397_v61, %v7551_v4 }
 0xc64   :  { %v4903_v12 = vpop.xlane.xlu1 %4902  ;;  %v4900_v15 = vpop.xlane.xlu0 %4899 }
 0xc65   :  { %8578 = vpow2.f32 %v4923_v32  ;;  %v4913_v50 = vsub.f32 %v4805_v8, %v4903_v12  ;;  %v4912_v13 = vsub.f32 %v4730_v7, %v4900_v15 }
 0xc66   :  { %8580 = vpow2.f32 %v4921_v52 }
 0xc67   :  { %v9510_v0 = vpop.eup %8572  ;;  %v4927_v54 = vmul.f32 1.442695, %v4913_v50  ;;  %v4925_v46 = vmul.f32 1.442695, %v4912_v13 }
 0xc68   :  { %v4262_v48 = vpop.permute.xlu1 %4261  ;;  %v4906_v47 = vpop.xlane.xlu0 %4905  ;;  %v4931_v20 = vsel %vm1141_vm12, %v9510_v0, 0.0 }
 0xc69   :  { %8582 = vpow2.f32 %v4927_v54  ;;  %v4914_v58 = vsub.f32 %v4880_v18, %v4906_v47  ;;  %4932 = vadd.xlane.f32.xlu1 %v4931_v20  ;;  %v4267_v24 = vmul.f32 %v4262_v48, %v9550_v6 }
 0xc6a   :  { %8584 = vpow2.f32 %v4925_v46 }
 0xc6b   :  { %v9514_v60 = vpop.eup %8574  ;;  %v4929_v28 = vmul.f32 1.442695, %v4914_v58  ;;  %v5577_v32 = vmul.f32 %v4267_v24, %v8821_v55  ;;  %v5579_v11 = vmul.f32 %v4267_v24, %v8839_v3  ;;  %v5583_v50 = vmul.f32 %v4267_v24, %v8861_v9 }
 0xc6c   :  { %v9516_v63 = vpop.eup %8576  ;;  %v9518_v7 = vpop.permute.xlu1 %4972  ;;  %v4934_v8 = vsel %vm1141_vm12, %v9514_v60, 0.0 }
 0xc6d   :  { %8586 = vpow2.f32 %v4929_v28  ;;  %4935 = vadd.xlane.f32.xlu0 %v4934_v8  ;;  %8198 = vmatpush3.msra.mxu0 %v9518_v7  ;;  %v4937_v10 = vsel %vm1141_vm12, %v9516_v63, 0.0  ;;  %v4264_v41 = vpop.permute.xlu0 %4263 }
 0xc6e   :  { %4938 = vadd.xlane.f32.xlu1 %v4937_v10  ;;  %8207 = vmatprep.subr.mxu0 %v8662_v29  ;;  %v4268_v51 = vmul.f32 %v4264_v41, %v9554_v17 }
 0xc6f   :  { %v9526_v18 = vpop.eup %8578 }
 0xc70   :  { %v9528_v53 = vpop.eup %8580  ;;  %v4943_v14 = vsel %vm1141_vm12, %v9526_v18, 0.0  ;;  %v5578_v52 = vmul.f32 %v4268_v51, %v8821_v55  ;;  %v5580_v12 = vmul.f32 %v4268_v51, %v8839_v3  ;;  %v5582_v61 = vmul.f32 %v4268_v51, %v8846_v5 }
 0xc71   :  { %v4940_v56 = vsel %vm1141_vm12, %v9528_v53, 0.0  ;;  %v5584_v15 = vmul.f32 %v4268_v51, %v8861_v9  ;;  %v5581_v55 = vmul.f32 %v4267_v24, %v8846_v5 }
 0xc72   :  { %4944 = vadd.xlane.f32.xlu1 %v4943_v14  ;;  %4941 = vadd.xlane.f32.xlu0 %v4940_v56 }
 0xc73   :  { %v9534_v2 = vpop.eup %8582 }
 0xc74   :  { %v9536_v23 = vpop.eup %8584  ;;  %v4949_v19 = vsel %vm1141_vm12, %v9534_v2, 0.0 }
 0xc75   :  { %v4946_v57 = vsel %vm1141_vm12, %v9536_v23, 0.0 }
 0xc76   :  { %4950 = vadd.xlane.f32.xlu1 %v4949_v19  ;;  %4947 = vadd.xlane.f32.xlu0 %v4946_v57 }
 0xc77   :  { %v9542_v45 = vpop.eup %8586 }
 0xc78   :  { %v4952_v49 = vsel %vm1141_vm12, %v9542_v45, 0.0 }
 0xc7a   :  { %4953 = vadd.xlane.f32.xlu0 %v4952_v49 }
 0xc87   :  { %5586 = vrot.lane.b32.xlu1 %v5577_v32, %s8665_s15 }
 0xc8b   :  { %5664 = vrot.lane.b32.xlu1 %v5578_v52, %s8665_s15 }
 0xc8f   :  { %5817 = vrot.lane.b32.xlu1 %v5580_v12, %s8665_s15 }
 0xc90   :  { %5049 = vrot.lane.b32.xlu0 %v9410_v30, %s8667_s18 }
 0xc93   :  { %5967 = vrot.lane.b32.xlu1 %v5582_v61, %s8665_s15 }
 0xc94   :  { %5742 = vrot.lane.b32.xlu0 %v5579_v11, %s8665_s15 }
 0xc97   :  { %6117 = vrot.lane.b32.xlu1 %v5584_v15, %s8665_s15 }
 0xc98   :  { %5892 = vrot.lane.b32.xlu0 %v5581_v55, %s8665_s15 }
 0xc9c   :  { %6042 = vrot.lane.b32.xlu0 %v5583_v50, %s8665_s15 }
 0xcf6   :  { %v4933_v30 = vpop.xlane.xlu1 %4932 }
 0xcf7   :  { %8588 = vrcp.f32 %v4933_v30 }
 0xcfa   :  { %v4936_v13 = vpop.xlane.xlu0 %4935 }
 0xcfb   :  { %v4939_v3 = vpop.xlane.xlu1 %4938 }
 0xcfc   :  { %8590 = vrcp.f32 %v4939_v3 }
 0xcfd   :  { %8592 = vrcp.f32 %v4936_v13 }
 0xcff   :  { %v4945_v54 = vpop.xlane.xlu1 %4944  ;;  %v4942_v46 = vpop.xlane.xlu0 %4941 }
 0xd00   :  { %8594 = vrcp.f32 %v4945_v54 }
 0xd01   :  { %v8589_v48 = vpop.eup %8588  ;;  %8596 = vrcp.f32 %v4942_v46 }
 0xd02   :  { %v4963_v5 = vmul.f32 %v8589_v48, %v9510_v0 }
 0xd03   :  { %v4951_v47 = vpop.xlane.xlu1 %4950  ;;  %v4948_v20 = vpop.xlane.xlu0 %4947 }
 0xd04   :  { %8598 = vrcp.f32 %v4951_v47  ;;  %8200 = vmatmul.mubr.msk.f32.vlgmr.msra.gmra.mrb[52].mxu0 %vm1141_vm12, %v4963_v5 }
 0xd05   :  { %8208 = vmatpush3.msra.mxu0 %v9518_v7  ;;  %8209 = vmatprep.mubr.msk.f32.mxu0 %vm8664_vm11, %v8662_v29  ;;  %8600 = vrcp.f32 %v4948_v20 }
 0xd06   :  { %v8591_v9 = vpop.eup %8590  ;;  %8217 = vmatprep.subr.mxu0 %v8662_v29 }
 0xd07   :  { %v4965_v58 = vmul.f32 %v8591_v9, %v9516_v63  ;;  %v4954_v28 = vpop.xlane.xlu0 %4953  ;;  %v8593_v8 = vpop.eup %8592 }
 0xd08   :  { %8602 = vrcp.f32 %v4954_v28  ;;  %v4964_v10 = vmul.f32 %v8593_v8, %v9514_v60 }
 0xd09   :  { %8210 = vmatmul.mubr.msk.f32.vlgmr.msra.gmra.mrb[54].mxu0 %vm1141_vm12, %v4965_v58 }
 0xd0a   :  { %v8595_v0 = vpop.eup %8594  ;;  %8218 = vmatpush3.msra.mxu0 %v9518_v7  ;;  %8219 = vmatprep.mubr.msk.f32.mxu0 %vm8664_vm11, %v8662_v29 }
 0xd0b   :  { %v4967_v14 = vmul.f32 %v8595_v0, %v9526_v18  ;;  %v5050_v56 = vpop.permute.xlu0 %5049  ;;  %8227 = vmatprep.subr.mxu0 %v8662_v29  ;;  %v8597_v19 = vpop.eup %8596 }
 0xd0c   :  { %8203 = vmatpush3.msra.mxu1 %v5050_v56  ;;  %v4966_v57 = vmul.f32 %v8597_v19, %v9528_v53  ;;  %v5587_v53 = vpop.permute.xlu1 %5586 }
 0xd0d   :  { %8205 = vmatmul.mubr.msk.f32.vlgmr.msra.gmra.mrb[56].mxu1 %vm1141_vm12, %v4964_v10  ;;  %8212 = vmatprep.subr.mxu1 %v8662_v29 }
 0xd0e   :  { %v8599_v63 = vpop.eup %8598  ;;  %8220 = vmatmul.mubr.msk.f32.vlgmr.msra.gmra.mrb[56].mxu0 %vm1141_vm12, %v4967_v14  ;;  %8213 = vmatpush3.msra.mxu1 %v5050_v56 }
 0xd0f   :  { %v4969_v49 = vmul.f32 %v8599_v63, %v9534_v2  ;;  %8228 = vmatpush3.msra.mxu0 %v9518_v7  ;;  %8214 = vmatprep.mubr.msk.f32.mxu1 %vm8664_vm11, %v8662_v29  ;;  %v8601_v60 = vpop.eup %8600  ;;  %v4259_v2 = vmul.f32 %v9498_v59, %v9550_v6  ;;  %v5743_v4 = vpop.permute.xlu0 %5742  ;;  %v4260_v59 = vmul.f32 %v9506_v22, %v9554_v17 }
 0xd10   :  { %8222 = vmatprep.subr.mxu1 %v8662_v29  ;;  %8229 = vmatprep.mubr.msk.f32.mxu0 %vm8664_vm11, %v8662_v29  ;;  %v4968_v18 = vmul.f32 %v8601_v60, %v9536_v23  ;;  %v5665_v24 = vpop.permute.xlu1 %5664 }
 0xd11   :  { %8215 = vmatmul.mubr.msk.f32.vlgmr.msra.gmra.mrb[58].mxu1 %vm1141_vm12, %v4966_v57  ;;  %8237 = vmatprep.subr.mxu0 %v8662_v29 }
 0xd12   :  { %8223 = vmatpush3.msra.mxu1 %v5050_v56  ;;  %8230 = vmatmul.mubr.msk.f32.vlgmr.msra.gmra.mrb[58].mxu0 %vm1141_vm12, %v4969_v49  ;;  %v8603_v7 = vpop.eup %8602 }
 0xd13   :  { %8224 = vmatprep.mubr.msk.f32.mxu1 %vm8664_vm11, %v8662_v29  ;;  %8232 = vmatprep.subr.mxu1 %v8662_v29  ;;  %v4970_v23 = vmul.f32 %v8603_v7, %v9542_v45  ;;  %v5893_v45 = vpop.permute.xlu0 %5892 }
 0xd14   :  { %8239 = vmatprep.mubr.msk.f32.mxu0 %vm8664_vm11, %v8662_v29  ;;  %v5818_v41 = vpop.permute.xlu1 %5817 }
 0xd15   :  { %8225 = vmatmul.mubr.msk.f32.vlgmr.msra.gmra.mrb[60].mxu1 %vm1141_vm12, %v4968_v18 }
 0xd16   :  { %8238 = vmatpush3.xpose.msk.msra.mxu0 %vm127_vm0, %v4259_v2  ;;  %8233 = vmatpush3.msra.mxu1 %v5050_v56 }
 0xd17   :  { %8247 = vmatprep.subr.mxu0 %v8662_v29  ;;  %8234 = vmatprep.mubr.msk.f32.mxu1 %vm8664_vm11, %v8662_v29  ;;  %v6043_v22 = vpop.permute.xlu0 %6042 }
 0xd18   :  { %8242 = vmatprep.subr.mxu1 %v8662_v29  ;;  %v5968_v51 = vpop.permute.xlu1 %5967 }
 0xd19   :  { %8240 = vmatmul.mubr.msk.f32.vlgmr.msra.gmra.mrb[60].mxu0 %vm127_vm0, %v5587_v53  ;;  %8235 = vmatmul.mubr.msk.f32.vlgmr.msra.gmra.mrb[62].mxu1 %vm1141_vm12, %v4970_v23 }
 0xd1a   :  { %8248 = vmatpush3.xpose.msk.msra.mxu0 %vm127_vm0, %v4259_v2  ;;  %8249 = vmatprep.mubr.msk.f32.mxu0 %vm8664_vm11, %v8662_v29 }
 0xd1b   :  { %8257 = vmatprep.subr.mxu0 %v8662_v29  ;;  %8244 = vmatprep.mubr.msk.f32.mxu1 %vm8664_vm11, %v8662_v29 }
 0xd1c   :  { %v6118_v32 = vpop.permute.xlu1 %6117 }
 0xd1d   :  { %8250 = vmatmul.mubr.msk.f32.vlgmr.msra.gmra.mrb[62].mxu0 %vm127_vm0, %v5743_v4  ;;  %8243 = vmatpush3.xpose.msk.msra.mxu1 %vm127_vm0, %v4260_v59 }
 0xd1e   :  { %8258 = vmatpush3.xpose.msk.msra.mxu0 %vm127_vm0, %v4259_v2  ;;  %8259 = vmatprep.mubr.msk.f32.mxu0 %vm8664_vm11, %v8662_v29 }
 0xd1f   :  { %8252 = vmatprep.subr.mxu1 %v8662_v29  ;;  %8267 = vmatprep.subr.mxu0 %v8662_v29 }
 0xd20   :  { %8245 = vmatmul.mubr.msk.f32.vlgmr.msra.gmra.mrb[64].mxu1 %vm127_vm0, %v5665_v24 }
 0xd21   :  { %8260 = vmatmul.mubr.msk.f32.vlgmr.msra.gmra.mrb[64].mxu0 %vm127_vm0, %v5893_v45  ;;  %8253 = vmatpush3.xpose.msk.msra.mxu1 %vm127_vm0, %v4260_v59 }
 0xd22   :  { %8268 = vmatpush3.xpose.msk.msra.mxu0 %vm127_vm0, %v4259_v2  ;;  %8254 = vmatprep.mubr.msk.f32.mxu1 %vm8664_vm11, %v8662_v29 }
 0xd23   :  { %8269 = vmatprep.mubr.msk.f32.mxu0 %vm8664_vm11, %v8662_v29  ;;  %8262 = vmatprep.subr.mxu1 %v8662_v29 }
 0xd24   :  { %8255 = vmatmul.mubr.msk.f32.vlgmr.msra.gmra.mrb[66].mxu1 %vm127_vm0, %v5818_v41  ;;  %8277 = vmatprep.subr.mxu0 %v8662_v29 }
 0xd25   :  { %8270 = vmatmul.mubr.msk.f32.vlgmr.msra.gmra.mrb[66].mxu0 %vm127_vm0, %v6043_v22  ;;  %8263 = vmatpush3.xpose.msk.msra.mxu1 %vm127_vm0, %v4260_v59 }
 0xd26   :  { %8264 = vmatprep.mubr.msk.f32.mxu1 %vm8664_vm11, %v8662_v29  ;;  %8272 = vmatprep.subr.mxu1 %v8662_v29 }
 0xd27   :  { %8279 = vmatprep.mubr.msk.f32.mxu0 %vm8664_vm11, %v8662_v29 }
 0xd28   :  { %8265 = vmatmul.mubr.msk.f32.vlgmr.msra.gmra.mrb[68].mxu1 %vm127_vm0, %v5968_v51 }
 0xd29   :  { %8273 = vmatpush3.xpose.msk.msra.mxu1 %vm127_vm0, %v4260_v59  ;;  %8274 = vmatprep.mubr.msk.f32.mxu1 %vm8664_vm11, %v8662_v29 }
 0xd2a   :  { %8282 = vmatprep.subr.mxu1 %v8662_v29 }
 0xd2c   :  { %8275 = vmatmul.mubr.msk.f32.vlgmr.msra.gmra.mrb[70].mxu1 %vm127_vm0, %v6118_v32 }
 0xd2d   :  { %8284 = vmatprep.mubr.msk.f32.mxu1 %vm8664_vm11, %v8662_v29 }
 0xdd7   :  { %v5044_v52 = vpop.f32.mrb[52].mxu0 }
 0xdd8   :  { %v8201_v12 = vpop.f32.mrb[53].mxu0  ;;  %v5563_v11 = vmul.f32 %v5044_v52, %v8774_v35 }
 0xddc   :  { %v5194_v61 = vpop.f32.mrb[54].mxu0 }
 0xddd   :  { %v5565_v15 = vmul.f32 %v5194_v61, %v8789_v40  ;;  %v8211_v55 = vpop.f32.mrb[55].mxu0 }
 0xddf   :  { %v5571_v50 = vadd.f32 %v5565_v15, %v5563_v11 }
 0xde0   :  { %v5121_v30 = vpop.f32.mrb[56].mxu1 }
 0xde1   :  { %v5340_v13 = vpop.f32.mrb[56].mxu0  ;;  %v8206_v3 = vpop.f32.mrb[57].mxu1  ;;  %v5564_v47 = vmul.f32 %v5121_v30, %v8774_v35 }
 0xde2   :  { %v5567_v54 = vmul.f32 %v5340_v13, %v8777_v36  ;;  %v8221_v46 = vpop.f32.mrb[57].mxu0 }
 0xde4   :  { %v5573_v48 = vadd.f32 %v5571_v50, %v5567_v54  ;;  %v5267_v5 = vpop.f32.mrb[58].mxu1 }
 0xde5   :  { %v5566_v20 = vmul.f32 %v5267_v5, %v8789_v40  ;;  %v5486_v9 = vpop.f32.mrb[58].mxu0  ;;  %v8216_v58 = vpop.f32.mrb[59].mxu1 }
 0xde6   :  { %v5569_v28 = vmul.f32 %v5486_v9, %v8786_v39  ;;  %v8231_v8 = vpop.f32.mrb[59].mxu0 }
 0xde7   :  { %v5572_v0 = vadd.f32 %v5566_v20, %v5564_v47 }
 0xde8   :  { %v9667_v10 = vadd.f32 %v5573_v48, %v5569_v28  ;;  %v5413_v14 = vpop.f32.mrb[60].mxu1 }
 0xde9   :  { %v5568_v56 = vmul.f32 %v5413_v14, %v8777_v36  ;;  %v8226_v19 = vpop.f32.mrb[61].mxu1 }
 0xdeb   :  { %v5574_v63 = vadd.f32 %v5572_v0, %v5568_v56 }
 0xdec   :  { %v5659_v57 = vpop.f32.mrb[60].mxu0  ;;  %v5559_v49 = vpop.f32.mrb[62].mxu1 }
 0xded   :  { %v5660_v60 = vadd.f32 %v5659_v57, %v8930_v37  ;;  %v8241_v18 = vpop.f32.mrb[61].mxu0  ;;  %v5570_v53 = vmul.f32 %v5559_v49, %v8786_v39  ;;  %v8236_v7 = vpop.f32.mrb[63].mxu1 }
 0xdef   :  { %v9672_v2 = vadd.f32 %v5574_v63, %v5570_v53  ;;  %v6191_v23 = vsel %vm1141_vm12, %v5660_v60, -inf }
 0xdf0   :  { %6192 = vmax.xlane.f32.xlu0 %v6191_v23  ;;  %v5812_v4 = vpop.f32.mrb[62].mxu0 }
 0xdf1   :  { %v5813_v24 = vadd.f32 %v5812_v4, %v8930_v37  ;;  %v8251_v59 = vpop.f32.mrb[63].mxu0 }
 0xdf3   :  { %v5737_v45 = vpop.f32.mrb[64].mxu1  ;;  %v6197_v41 = vsel %vm1141_vm12, %v5813_v24, -inf }
 0xdf4   :  { %v5738_v22 = vadd.f32 %v5737_v45, %v8934_v43  ;;  %6198 = vmax.xlane.f32.xlu0 %v6197_v41  ;;  %v5962_v51 = vpop.f32.mrb[64].mxu0  ;;  %v8246_v32 = vpop.f32.mrb[65].mxu1 }
 0xdf5   :  { %v8261_v52 = vpop.f32.mrb[65].mxu0  ;;  %v5963_v12 = vadd.f32 %v5962_v51, %v8930_v37 }
 0xdf6   :  { %v6194_v61 = vsel %vm1141_vm12, %v5738_v22, -inf }
 0xdf7   :  { %6195 = vmax.xlane.f32.xlu1 %v6194_v61  ;;  %v5887_v11 = vpop.f32.mrb[66].mxu1  ;;  %v6203_v54 = vsel %vm1141_vm12, %v5963_v12, -inf }
 0xdf8   :  { %v5888_v15 = vadd.f32 %v5887_v11, %v8934_v43  ;;  %v6112_v55 = vpop.f32.mrb[66].mxu0  ;;  %v8256_v50 = vpop.f32.mrb[67].mxu1 }
 0xdf9   :  { %v8271_v30 = vpop.f32.mrb[67].mxu0  ;;  %v6113_v13 = vadd.f32 %v6112_v55, %v8930_v37 }
 0xdfa   :  { %v6200_v3 = vsel %vm1141_vm12, %v5888_v15, -inf }
 0xdfb   :  { %v6037_v46 = vpop.f32.mrb[68].mxu1  ;;  %6201 = vmax.xlane.f32.xlu0 %v6200_v3  ;;  %6204 = vmax.xlane.f32.xlu1 %v6203_v54  ;;  %v6209_v20 = vsel %vm1141_vm12, %v6113_v13, -inf }
 0xdfc   :  { %v6038_v48 = vadd.f32 %v6037_v46, %v8934_v43  ;;  %v8266_v5 = vpop.f32.mrb[69].mxu1 }
 0xdfe   :  { %v6206_v47 = vsel %vm1141_vm12, %v6038_v48, -inf }
 0xdff   :  { %v6187_v9 = vpop.f32.mrb[70].mxu1  ;;  %6207 = vmax.xlane.f32.xlu0 %v6206_v47  ;;  %6210 = vmax.xlane.f32.xlu1 %v6209_v20 }
 0xe00   :  { %v6188_v58 = vadd.f32 %v6187_v9, %v8934_v43  ;;  %v8276_v37 = vpop.f32.mrb[71].mxu1 }
 0xe02   :  { %v6212_v28 = vsel %vm1141_vm12, %v6188_v58, -inf }
 0xe03   :  { %6213 = vmax.xlane.f32.xlu0 %v6212_v28 }
 0xe7d   :  { %v6193_v8 = vpop.xlane.xlu0 %6192 }
 0xe7e   :  { %v6215_v0 = vsub.f32 %v5660_v60, %v6193_v8 }
 0xe80   :  { %v6223_v14 = vmul.f32 1.442695, %v6215_v0 }
 0xe81   :  { %v6199_v56 = vpop.xlane.xlu0 %6198 }
 0xe82   :  { %8604 = vpow2.f32 %v6223_v14  ;;  %v6217_v19 = vsub.f32 %v5813_v24, %v6199_v56 }
 0xe84   :  { %v6227_v63 = vmul.f32 1.442695, %v6217_v19  ;;  %v6196_v57 = vpop.xlane.xlu1 %6195 }
 0xe85   :  { %v6216_v49 = vsub.f32 %v5738_v22, %v6196_v57 }
 0xe86   :  { %8606 = vpow2.f32 %v6227_v63 }
 0xe87   :  { %v6225_v18 = vmul.f32 1.442695, %v6216_v49 }
 0xe88   :  { %v6205_v53 = vpop.xlane.xlu1 %6204  ;;  %v6202_v7 = vpop.xlane.xlu0 %6201 }
 0xe89   :  { %8608 = vpow2.f32 %v6225_v18  ;;  %v6219_v23 = vsub.f32 %v5963_v12, %v6205_v53  ;;  %v6218_v43 = vsub.f32 %v5888_v15, %v6202_v7 }
 0xe8b   :  { %v6231_v4 = vmul.f32 1.442695, %v6219_v23  ;;  %v6229_v59 = vmul.f32 1.442695, %v6218_v43 }
 0xe8c   :  { %v8605_v45 = vpop.eup %8604  ;;  %v6211_v41 = vpop.xlane.xlu1 %6210 }
 0xe8d   :  { %v6208_v51 = vpop.xlane.xlu0 %6207  ;;  %8610 = vpow2.f32 %v6231_v4  ;;  %v6221_v60 = vsub.f32 %v6113_v13, %v6211_v41  ;;  %v6239_v24 = vsel %vm1141_vm12, %v8605_v45, 0.0 }
 0xe8e   :  { %v6220_v32 = vsub.f32 %v6038_v48, %v6208_v51  ;;  %8612 = vpow2.f32 %v6229_v59  ;;  %6240 = vadd.xlane.f32.xlu1 %v6239_v24  ;;  %v6887_v59 = vld [vmem:[%s9850_s4 + $0x140] sm:$0xff] }
 0xe8f   :  { %v6235_v22 = vmul.f32 1.442695, %v6221_v60 }
 0xe90   :  { %v6233_v52 = vmul.f32 1.442695, %v6220_v32  ;;  %v8607_v61 = vpop.eup %8606 }
 0xe91   :  { %v6214_v11 = vpop.xlane.xlu0 %6213  ;;  %8614 = vpow2.f32 %v6235_v22  ;;  %v6245_v12 = vsel %vm1141_vm12, %v8607_v61, 0.0  ;;  %v6889_v22 = vld [vmem:[%s9850_s4 + $0x150] sm:$0xff] }
 0xe92   :  { %v6222_v55 = vsub.f32 %v6188_v58, %v6214_v11  ;;  %8616 = vpow2.f32 %v6233_v52  ;;  %6246 = vadd.xlane.f32.xlu1 %v6245_v12  ;;  %v6890_v52 = vld [vmem:[%s9850_s4 + $0x158] sm:$0xff] }
 0xe93   :  { %v8609_v15 = vpop.eup %8608  ;;  %v8466_v12 = vpack.c.bf16 %v6890_v52, %v6889_v22 }
 0xe94   :  { %v6237_v50 = vmul.f32 1.442695, %v6222_v55  ;;  %v6242_v30 = vsel %vm1141_vm12, %v8609_v15, 0.0 }
 0xe95   :  { %6243 = vadd.xlane.f32.xlu0 %v6242_v30  ;;  %v6980_v30 = vld [vmem:[%s9850_s4 + $0x170] sm:$0xff] }
 0xe96   :  { %8618 = vpow2.f32 %v6237_v50 }
 0xe97   :  { %v8611_v13 = vpop.eup %8610 }
 0xe98   :  { %v8613_v3 = vpop.eup %8612  ;;  %v6251_v54 = vsel %vm1141_vm12, %v8611_v13, 0.0 }
 0xe99   :  { %6252 = vadd.xlane.f32.xlu1 %v6251_v54  ;;  %v6248_v46 = vsel %vm1141_vm12, %v8613_v3, 0.0 }
 0xe9a   :  { %6249 = vadd.xlane.f32.xlu0 %v6248_v46 }
 0xe9b   :  { %v9694_v48 = vpop.eup %8614 }
 0xe9c   :  { %v9696_v5 = vpop.eup %8616  ;;  %v6257_v47 = vsel %vm1141_vm12, %v9694_v48, 0.0 }
 0xe9d   :  { %6258 = vadd.xlane.f32.xlu1 %v6257_v47  ;;  %v6254_v20 = vsel %vm1141_vm12, %v9696_v5, 0.0 }
 0xe9e   :  { %6255 = vadd.xlane.f32.xlu0 %v6254_v20 }
 0xea0   :  { %v9702_v9 = vpop.eup %8618 }
 0xea1   :  { %v6260_v58 = vsel %vm1141_vm12, %v9702_v9, 0.0 }
 0xea2   :  { %6261 = vadd.xlane.f32.xlu0 %v6260_v58 }
 0xeae   :  { %6280 = vrot.lane.b32.xlu1 %v9550_v6, %s8667_s18 }
 0xeb8   :  { %6357 = vrot.lane.b32.xlu0 %v9554_v17, %s8667_s18  ;;  %s8669_s18 = smov [#allocation2]  }
 0xeb9   :  { %s7452_s2 = sshll.u32 %s8669_s18, 4  ;;  %s7453_s2 = int_to_ptr.vmem [resolvable:$true] %s7452_s2 }
 0xeba   :  { %s8638_s21 = scalar_lea.vmem %s7453_s2, 32  ;;  %p8643_p1 = scmp.lt.s32.totalorder %s7453_s2, %s7453_s2 }
 0xebb   :  { %p8639_p0 = scmp.ne.s32.totalorder %s7453_s2, %s8638_s21  ;;  %p8644_p2 = scmp.lt.s32.totalorder %s8638_s21, %s8638_s21 }
 0xebd   :  { %p8645_p3 = por %p8644_p2, %p8643_p1 }
 0xebf   :  { %p8646_p4 = pnand %p8645_p3, %p8639_p0 }
 0xf1b   :  { %v6241_v37 = vpop.xlane.xlu1 %6240 }
 0xf1c   :  { %8620 = vrcp.f32 %v6241_v37 }
 0xf1f   :  { %v6247_v28 = vpop.xlane.xlu1 %6246 }
 0xf20   :  { %8622 = vrcp.f32 %v6247_v28 }
 0xf22   :  { %v6244_v8 = vpop.xlane.xlu0 %6243 }
 0xf23   :  { %8624 = vrcp.f32 %v6244_v8 }
 0xf26   :  { %v6253_v0 = vpop.xlane.xlu1 %6252  ;;  %v8621_v19 = vpop.eup %8620 }
 0xf27   :  { %v6250_v14 = vpop.xlane.xlu0 %6249  ;;  %8626 = vrcp.f32 %v6253_v0  ;;  %v6271_v57 = vmul.f32 %v8621_v19, %v8605_v45  ;;  %v6888_v45 = vld [vmem:[%s9850_s4 + $0x148] sm:$0xff] }
 0xf28   :  { %8628 = vrcp.f32 %v6250_v14  ;;  %v8462_v24 = vpack.c.bf16 %v6888_v45, %v6887_v59 }
 0xf2a   :  { %v6259_v56 = vpop.xlane.xlu1 %6258  ;;  %v8623_v49 = vpop.eup %8622 }
 0xf2b   :  { %v6256_v63 = vpop.xlane.xlu0 %6255  ;;  %8630 = vrcp.f32 %v6259_v56  ;;  %v6273_v53 = vmul.f32 %v8623_v49, %v8607_v61 }
 0xf2c   :  { %8632 = vrcp.f32 %v6256_v63 }
 0xf2d   :  { %v8625_v17 = vpop.eup %8624 }
 0xf2e   :  { %v6281_v6 = vpop.permute.xlu1 %6280  ;;  %v6272_v23 = vmul.f32 %v8625_v17, %v8609_v15  ;;  %v6885_v15 = vadd.f32 %v9667_v10, %v9273_v44  ;;  %v6886_v44 = vadd.f32 %v9672_v2, %v9269_v16  ;;  %v6979_v10 = vld [vmem:[%s9850_s4 + $0x168] sm:$0xff]  ;;  %v6981_v16 = vld [vmem:[%s9850_s4 + $0x178] sm:$0xff]  ;;  %v6982_v2 = vld [vmem:[%s9850_s4 + $0x180] sm:$0xff] }
 0xf2f   :  { %v6262_v18 = vpop.xlane.xlu0 %6261  ;;  %8278 = vmatpush3.msra.mxu0 %v6281_v6 }
 0xf30   :  { %8280 = vmatmul.mubr.msk.f32.vlgmr.msra.gmra.mrb[68].mxu0 %vm1141_vm12, %v6271_v57  ;;  %8287 = vmatprep.subr.mxu0 %v8662_v29  ;;  %8634 = vrcp.f32 %v6262_v18 }
 0xf31   :  { %8288 = vmatpush3.msra.mxu0 %v6281_v6  ;;  %8289 = vmatprep.mubr.msk.f32.mxu0 %vm8664_vm11, %v8662_v29  ;;  %v8627_v7 = vpop.eup %8626 }
 0xf32   :  { %8297 = vmatprep.subr.mxu0 %v8662_v29  ;;  %v8629_v4 = vpop.eup %8628  ;;  %v6275_v51 = vmul.f32 %v8627_v7, %v8611_v13  ;;  %v8470_v13 = vpack.c.bf16 %v6980_v30, %v6979_v10 }
 0xf33   :  { %v6358_v43 = vpop.permute.xlu0 %6357  ;;  %v6274_v60 = vmul.f32 %v8629_v4, %v8613_v3  ;;  %v8474_v3 = vpack.c.bf16 %v6982_v2, %v6981_v16 }
 0xf34   :  { %8283 = vmatpush3.msra.mxu1 %v6358_v43  ;;  %8290 = vmatmul.mubr.msk.f32.vlgmr.msra.gmra.mrb[70].mxu0 %vm1141_vm12, %v6273_v53 }
 0xf35   :  { %8285 = vmatmul.mubr.msk.f32.vlgmr.msra.gmra.mrb[72].mxu1 %vm1141_vm12, %v6272_v23  ;;  %8292 = vmatprep.subr.mxu1 %v8662_v29  ;;  %v8631_v41 = vpop.eup %8630 }
 0xf36   :  { %8298 = vmatpush3.msra.mxu0 %v6281_v6  ;;  %8293 = vmatpush3.msra.mxu1 %v6358_v43  ;;  %v8633_v32 = vpop.eup %8632  ;;  %v6277_v61 = vmul.f32 %v8631_v41, %v9694_v48  ;;  %v7602_v41 = vld [vmem:[%s9850_s4 + $0x160] ss:$0 sm:$0xff] }
 0xf37   :  { %8294 = vmatprep.mubr.msk.f32.mxu1 %vm8664_vm11, %v8662_v29  ;;  %8299 = vmatprep.mubr.msk.f32.mxu0 %vm8664_vm11, %v8662_v29  ;;  %v6276_v11 = vmul.f32 %v8633_v32, %v9696_v5 }
 0xf38   :  { %8302 = vmatprep.subr.mxu1 %v8662_v29  ;;  %8307 = vmatprep.subr.mxu0 %v8662_v29 }
 0xf39   :  { %8295 = vmatmul.mubr.msk.f32.vlgmr.msra.gmra.mrb[74].mxu1 %vm1141_vm12, %v6274_v60  ;;  %8300 = vmatmul.mubr.msk.f32.vlgmr.msra.gmra.mrb[72].mxu0 %vm1141_vm12, %v6275_v51 }
 0xf3a   :  { %8303 = vmatpush3.msra.mxu1 %v6358_v43  ;;  %8308 = vmatpush3.msra.mxu0 %v6281_v6  ;;  %v8635_v55 = vpop.eup %8634 }
 0xf3b   :  { %8304 = vmatprep.mubr.msk.f32.mxu1 %vm8664_vm11, %v8662_v29  ;;  %8309 = vmatprep.mubr.msk.f32.mxu0 %vm8664_vm11, %v8662_v29  ;;  %v6278_v50 = vmul.f32 %v8635_v55, %v9702_v9 }
 0xf3c   :  { %8312 = vmatprep.subr.mxu1 %v8662_v29  ;;  %8463 = vmatprep.subr.bf16.mxu0 %v8462_v24 }
 0xf3d   :  { %8305 = vmatmul.mubr.msk.f32.vlgmr.msra.gmra.mrb[76].mxu1 %vm1141_vm12, %v6276_v11  ;;  %8310 = vmatmul.mubr.msk.f32.vlgmr.msra.gmra.mrb[74].mxu0 %vm1141_vm12, %v6277_v61 }
 0xf3e   :  { %8313 = vmatpush3.msra.mxu1 %v6358_v43  ;;  %8465 = vmatpush3.bf16.msra.mxu0 %v8462_v24 }
 0xf3f   :  { %8325 = vmatprep.mubr.msk.f32.mxu0 %vm127_vm0, %v6885_v15  ;;  %8314 = vmatprep.mubr.msk.f32.mxu1 %vm8664_vm11, %v8662_v29  ;;  %v7360_v15 = vld [vmem:[%s9850_s4 + $0x198] sm:$0xff] }
 0xf40   :  { %8467 = vmatprep.subr.bf16.mxu0 %v8466_v12  ;;  %8471 = vmatprep.subr.bf16.mxu1 %v8470_v13 }
 0xf41   :  { %8315 = vmatmul.mubr.msk.f32.vlgmr.msra.gmra.mrb[78].mxu1 %vm1141_vm12, %v6278_v50 }
 0xf42   :  { %8469 = vmatpush3.bf16.msra.mxu0 %v8466_v12  ;;  %8473 = vmatpush3.bf16.msra.mxu1 %v8470_v13  ;;  %v7359_v12 = vld [vmem:[%s9850_s4 + $0x190] sm:$0xff] }
 0xf43   :  { %8339 = vmatprep.subr.mxu0 %v8662_v29  ;;  %8475 = vmatprep.subr.bf16.mxu1 %v8474_v3  ;;  %v8479_v50 = vpack.c.bf16 %v7360_v15, %v7359_v12 }
 0xf45   :  { %8326 = vmatmul.mubr.msk.f32.vlgmr.msra.gmra.mrb[76].mxu0 %vm127_vm0, %v6886_v44 }
 0xf46   :  { %8341 = vmatprep.mubr.msk.f32.mxu0 %vm8664_vm11, %v8662_v29  ;;  %8477 = vmatpush3.bf16.msra.mxu1 %v8474_v3 }
 0xf47   :  { %8344 = vmatprep.subr.mxu1 %v8662_v29 }
0x1003   :  { %v6352_v54 = vpop.f32.mrb[68].mxu0 }
0x1004   :  { %v8281_v46 = vpop.f32.mrb[69].mxu0  ;;  %v6871_v5 = vmul.f32 %v6352_v54, %v8774_v35 }
0x1007   :  { %v6502_v48 = vpop.f32.mrb[70].mxu0 }
0x1008   :  { %v6429_v47 = vpop.f32.mrb[72].mxu1  ;;  %v6873_v20 = vmul.f32 %v6502_v48, %v8789_v40  ;;  %v8291_v9 = vpop.f32.mrb[71].mxu0 }
0x1009   :  { %v8286_v58 = vpop.f32.mrb[73].mxu1  ;;  %v6872_v0 = vmul.f32 %v6429_v47, %v8774_v35 }
0x100a   :  { %v6879_v37 = vadd.f32 %v6873_v20, %v6871_v5 }
0x100c   :  { %v6575_v28 = vpop.f32.mrb[74].mxu1  ;;  %v6648_v8 = vpop.f32.mrb[72].mxu0 }
0x100d   :  { %v6874_v14 = vmul.f32 %v6575_v28, %v8789_v40  ;;  %v6875_v56 = vmul.f32 %v6648_v8, %v8777_v36  ;;  %v8296_v19 = vpop.f32.mrb[75].mxu1  ;;  %v8301_v63 = vpop.f32.mrb[73].mxu0 }
0x100f   :  { %v6880_v57 = vadd.f32 %v6874_v14, %v6872_v0  ;;  %v6881_v6 = vadd.f32 %v6879_v37, %v6875_v56 }
0x1010   :  { %v6721_v49 = vpop.f32.mrb[76].mxu1  ;;  %v6794_v18 = vpop.f32.mrb[74].mxu0 }
0x1011   :  { %v6876_v17 = vmul.f32 %v6721_v49, %v8777_v36  ;;  %v6877_v53 = vmul.f32 %v6794_v18, %v8786_v39  ;;  %v8306_v7 = vpop.f32.mrb[77].mxu1  ;;  %v8311_v23 = vpop.f32.mrb[75].mxu0 }
0x1013   :  { %v6882_v43 = vadd.f32 %v6880_v57, %v6876_v17  ;;  %v6883_v4 = vadd.f32 %v6881_v6, %v6877_v53 }
0x1014   :  { %v6867_v59 = vpop.f32.mrb[78].mxu1 }
0x1015   :  { %v6977_v35 = vadd.f32 %v6883_v4, %v9307_v62  ;;  %v6878_v40 = vmul.f32 %v6867_v59, %v8786_v39  ;;  %v8316_v45 = vpop.f32.mrb[79].mxu1  ;;  %v7605_v39 = vld [vmem:[%s9850_s4 + $0x188] ss:$0 sm:$0xff] }
0x1017   :  { %v6884_v51 = vadd.f32 %v6882_v43, %v6878_v40  ;;  %8336 = vmatprep.mubr.msk.f32.mxu1 %vm127_vm0, %v6977_v35 }
0x1018   :  { %v8327_v36 = vpop.f32.mrb[76].mxu0 }
0x1019   :  { %v6978_v60 = vadd.f32 %v6884_v51, %v9304_v38  ;;  %v6974_v32 = vadd.f32 %v8327_v36, %v7602_v41  ;;  %v6968_v24 = vpop.f32.mrb[77].mxu0 }
0x101a   :  { %v6969_v22 = vadd.f32 %v7602_v41, %v6968_v24 }
0x101b   :  { %8337 = vmatmul.mubr.msk.f32.vlgmr.msra.gmra.mrb[80].mxu1 %vm127_vm0, %v6978_v60 }
0x101c   :  { %8340 = vmatpush3.msra.mxu0 %v6969_v22  ;;  %8345 = vmatpush3.msra.mxu1 %v6974_v32 }
0x101d   :  { %8342 = vmatmul.mubr.msk.f32.vlgmr.msra.gmra.mrb[78].mxu0 %vm1141_vm12, %v9103_v33  ;;  %8346 = vmatprep.mubr.msk.f32.mxu1 %vm8664_vm11, %v8662_v29 }
0x101e   :  { %8354 = vmatprep.subr.mxu1 %v8662_v29  ;;  %8349 = vmatprep.subr.mxu0 %v8662_v29 }
0x101f   :  { %8347 = vmatmul.mubr.msk.f32.vlgmr.msra.gmra.mrb[82].mxu1 %vm1141_vm12, %v9108_v1  ;;  %8351 = vmatprep.mubr.msk.f32.mxu0 %vm8664_vm11, %v8662_v29 }
0x1020   :  { %8356 = vmatprep.mubr.msk.f32.mxu1 %vm8664_vm11, %v8662_v29 }
0x10ee   :  { %v8338_v33 = vpop.f32.mrb[80].mxu1 }
0x10ef   :  { %v7066_v38 = vadd.f32 %v8338_v33, %v7605_v39  ;;  %v7060_v62 = vpop.f32.mrb[81].mxu1 }
0x10f0   :  { %v7061_v52 = vadd.f32 %v7605_v39, %v7060_v62  ;;  %v7135_v61 = vpop.f32.mrb[78].mxu0 }
0x10f1   :  { %8355 = vmatpush3.msra.mxu1 %v7066_v38  ;;  %v8343_v11 = vpop.f32.mrb[79].mxu0 }
0x10f2   :  { %v7205_v55 = vpop.f32.mrb[82].mxu1  ;;  %8350 = vmatpush3.msra.mxu0 %v7061_v52  ;;  %8357 = vmatmul.mubr.msk.f32.vlgmr.msra.gmra.mrb[84].mxu1 %vm1141_vm12, %v8926_v31 }
0x10f3   :  { %8352 = vmatmul.mubr.msk.f32.vlgmr.msra.gmra.mrb[80].mxu0 %vm1141_vm12, %v8922_v26  ;;  %v8348_v1 = vpop.f32.mrb[83].mxu1  ;;  %8478 = vmatprep.subr.bf16.mxu0 %v8668_v34  ;;  %v7361_v26 = vld [vmem:[%s9850_s4 + $0x1a0] sm:$0xff]  ;;  %v7212_v10 = vmul.f32 %v7205_v55, %v3653_v42  ;;  %v7612_v42 = vld [vmem:[%s9850_s4 + $0x1b0] ss:$0 sm:$0xff] }
0x10f4   :  { %8367 = vmatprep.mubr.msk.f32.mxu0 %vm8664_vm11, %v8662_v29  ;;  %8480 = vmatpush3.bf16.msra.mxu0 %v8479_v50  ;;  %v7362_v29 = vld [vmem:[%s9850_s4 + $0x1a8] sm:$0xff] }
0x10f5   :  { %8481 = vmatprep.subr.bf16.mxu0 %v8668_v34  ;;  %v8482_v31 = vpack.c.bf16 %v7362_v29, %v7361_v26  ;;  %v7211_v34 = vmul.f32 %v9293_v21, %v7135_v61 }
0x10f8   :  { %8483 = vmatpush3.bf16.msra.mxu0 %v8482_v31 }
0x11c5   :  { %v7349_v44 = vpop.f32.mrb[84].mxu1 }
0x11c6   :  { %v7356_v30 = vmul.f32 %v7349_v44, %v3805_v27  ;;  %v7279_v13 = vpop.f32.mrb[80].mxu0  ;;  %v8358_v16 = vpop.f32.mrb[85].mxu1 }
0x11c7   :  { %v7355_v2 = vmul.f32 %v9371_v25, %v7279_v13  ;;  %v8353_v3 = vpop.f32.mrb[81].mxu0 }
0x11c8   :  { %v7358_v54 = vmul.f32 %v7356_v30, %v7212_v10 }
0x11c9   :  { %v7357_v46 = vmul.f32 %v7355_v2, %v7211_v34 }
0x11ca   :  { %v7370_v48 = vrot.slane %v7358_v54, 7 }
0x11cc   :  { %v7371_v5 = vsel %vm3824_vm14, %v7370_v48, %v7357_v46 }
0x11cd   :  { %8368 = vmatmul.mubr.msk.f32.vlgmr.msra.gmra.mrb[82].mxu0 %vm127_vm0, %v7371_v5 }
0x12a0   :  { %v7440_v27 = vpop.f32.mrb[82].mxu0 }
0x12a1   :  { %v7441_v47 = vadd.f32 %v7612_v42, %v7440_v27  ;;  %v8369_v21 = vpop.f32.mrb[83].mxu0 }
0x12a3   :  { %7445 = vst.msk [vmem:[#allocation2] sm:$0x3] %vm7444_vm15, %v7441_v47 }
0x12a4   :  { %8649 = shalt.err (!%p8646_p4)
}
0x12a5   :  { %s8650_s24 = scalar_lea.hbm %s9851_s5, 32 }
0x12a6   :  { %p8651_p5 = scmp.ne.s32.totalorder %s9851_s5, %s8650_s24  ;;  %p8654_p6 = scmp.lt.u32.totalorder %s8650_s24, %s9851_s5 }
0x12a8   :  { %p8656_p7 = pnand %p8654_p6, %p8651_p5 }
0x12aa   :  { %8659 = shalt.err (!%p8656_p7)
}
0x12ab   :  { %7455 = dma.vmem_to_hbm [thread:$0]  %s7453_s2, 32, %s9851_s5, [#allocation3]  }
0x12ac   :  { %8660 = dma.done.wait [#allocation3], 32  }
0x12ad   :  { %8661 = vsyncadd [#allocation3], 4294967264 }
0x12ae   :  { %7459 = vsyncpa [#allocation3], 1 }

</bundles_post_ra>
